<compile_context>
chip_gen: v7x
topology: tpu7x:2x2x1
jax: 0.10.0
libtpu: 0.0.40
codegen_flags: <defaults>
</compile_context>

<pallas_src>
import functools
import math

import jax
import jax.numpy as jnp
from jax.experimental import pallas as pl
from jax.experimental.pallas import tpu as pltpu


# ---------------------------------------------------------------------------
# Helpers
# ---------------------------------------------------------------------------

def _vmem_limit_bytes():
    """Chip-dependent scoped-VMEM limit: ~75% of physical, capped at 100 MiB."""
    try:
        cap = int(pltpu.get_tpu_info().vmem_capacity_bytes)
    except Exception:
        cap = 64 * 1024 * 1024          # conservative fallback (v7x physical)
    return min((cap * 3) // 4, 100 * 1024 * 1024)


_VMEM_LIMIT_BYTES = _vmem_limit_bytes()


def _cparams(*semantics):
    return pltpu.CompilerParams(dimension_semantics=semantics,
                                vmem_limit_bytes=_VMEM_LIMIT_BYTES)


def _pick_tile(dim, target, align):
    """Largest divisor of `dim` that is <= target and a multiple of `align`.
    Falls back to the full dimension (always a legal block) if none exists."""
    if dim <= target:
        return dim
    for cand in range(target, align - 1, -1):
        if dim % cand == 0 and cand % align == 0:
            return cand
    return dim


def _gelu_tanh(x):
    # tanh-approx GELU (EUP tanh); see TODO at top about exact erf GELU.
    c = 0.7978845608028654  # sqrt(2/pi)
    return 0.5 * x * (1.0 + jnp.tanh(c * (x + 0.044715 * x * x * x)))


def _ln_f32(x, g, b, eps):
    xf = x.astype(jnp.float32)
    mean = jnp.mean(xf, axis=-1, keepdims=True)
    var = jnp.mean(jnp.square(xf - mean), axis=-1, keepdims=True)
    y = (xf - mean) * jax.lax.rsqrt(var + eps)
    return y * g.astype(jnp.float32) + b.astype(jnp.float32)


# ---------------------------------------------------------------------------
# Pallas kernels
# ---------------------------------------------------------------------------

def _matmul_kernel(x_ref, w_ref, b_ref, o_ref, acc_ref, *, gelu):
    """K-tiled y = act(x @ w + b). Grid = (M/tm, N/tn, K/tk), K axis last."""
    kk = pl.program_id(2)

    @pl.when(kk == 0)
    def _():
        acc_ref[...] = jnp.zeros(acc_ref.shape, jnp.float32)

    acc_ref[...] += jnp.dot(x_ref[...], w_ref[...],
                            preferred_element_type=jnp.float32)

    @pl.when(kk == pl.num_programs(2) - 1)
    def _():
        y = acc_ref[...] + b_ref[...].astype(jnp.float32)
        if gelu:
            y = _gelu_tanh(y)
        o_ref[...] = y.astype(o_ref.dtype)


def _matmul_residual_kernel(x_ref, w_ref, b_ref, res_ref, o_ref, acc_ref):
    """K-tiled y = x @ w + b + res (bias and residual fused into the finalize)."""
    kk = pl.program_id(2)

    @pl.when(kk == 0)
    def _():
        acc_ref[...] = jnp.zeros(acc_ref.shape, jnp.float32)

    acc_ref[...] += jnp.dot(x_ref[...], w_ref[...],
                            preferred_element_type=jnp.float32)

    @pl.when(kk == pl.num_programs(2) - 1)
    def _():
        y = acc_ref[...] + b_ref[...].astype(jnp.float32) \
            + res_ref[...].astype(jnp.float32)
        o_ref[...] = y.astype(o_ref.dtype)


def _ln_linear_kernel(x_ref, g_ref, bln_ref, w_ref, b_ref, o_ref, *, gelu, eps):
    """y = act(LayerNorm(x) @ w + b); LN needs the full row, so K is not tiled."""
    xn = _ln_f32(x_ref[...], g_ref[...], bln_ref[...], eps)
    y = jnp.dot(xn.astype(w_ref.dtype), w_ref[...],
                preferred_element_type=jnp.float32)
    y = y + b_ref[...].astype(jnp.float32)
    if gelu:
        y = _gelu_tanh(y)
    o_ref[...] = y.astype(o_ref.dtype)


def _layernorm_kernel(x_ref, g_ref, b_ref, o_ref, *, eps):
    o_ref[...] = _ln_f32(x_ref[...], g_ref[...], b_ref[...], eps).astype(o_ref.dtype)


def _attn_kernel(q_ref, kv_ref, w_ref, b_ref, res_ref, o_ref,
                 m_sc, l_sc, acc_sc, *, num_heads, scale):
    """Fused flash-style attention core for one (batch, q-tile, kv-tile) grid step.

    q_ref:  (tq, D)    projected queries
    kv_ref: (tk, 2D)   projected keys||values (current KV tile)
    w_ref:  (D, D)     output projection weight
    b_ref:  (1, D)     output projection bias
    res_ref:(tq, D)    residual (pre-norm sub-layer input)
    o_ref:  (tq, D)
    scratch: m_sc/l_sc (tq, H) f32 running max / denom, acc_sc (tq, D) f32.
    """
    kvi = pl.program_id(2)
    nkv = pl.num_programs(2)

    @pl.when(kvi == 0)
    def _():
        m_sc[...] = jnp.full(m_sc.shape, -jnp.inf, jnp.float32)
        l_sc[...] = jnp.zeros(l_sc.shape, jnp.float32)
        acc_sc[...] = jnp.zeros(acc_sc.shape, jnp.float32)

    q = q_ref[...]                       # (tq, D)  bf16
    kv = kv_ref[...]                     # (tk, 2D) bf16
    D = q.shape[-1]
    Dh = D // num_heads
    k = kv[:, :D]
    v = kv[:, D:]

    # TODO(synk): memory_mask / trg_mask not applied (masks are None in this forward).
    for h in range(num_heads):           # static unroll; temporaries die per head
        qh = q[:, h * Dh:(h + 1) * Dh]
        kh = k[:, h * Dh:(h + 1) * Dh]
        vh = v[:, h * Dh:(h + 1) * Dh]
        # Lane-dense (tq, tk) scores, bf16 MXU inputs, f32 accumulation.
        s = jax.lax.dot_general(qh, kh, (((1,), (1,)), ((), ())),
                                preferred_element_type=jnp.float32) * scale
        m_prev = m_sc[:, h:h + 1]
        m_new = jnp.maximum(m_prev, jnp.max(s, axis=-1, keepdims=True))
        alpha = jnp.exp(m_prev - m_new)
        p = jnp.exp(s - m_new)                               # unnormalized probs (f32)
        l_sc[:, h:h + 1] = alpha * l_sc[:, h:h + 1] + jnp.sum(p, -1, keepdims=True)
        pv = jnp.dot(p.astype(vh.dtype), vh, preferred_element_type=jnp.float32)
        acc_sc[:, h * Dh:(h + 1) * Dh] = alpha * acc_sc[:, h * Dh:(h + 1) * Dh] + pv
        m_sc[:, h:h + 1] = m_new

    @pl.when(kvi == nkv - 1)
    def _():
        # Deferred softmax normalization on the (tq, Dh) accumulators (not (tq, Lk)),
        # using the EUP reciprocal.  Then fused output projection + bias + residual.
        inv = pl.reciprocal(l_sc[...], approx=True)          # (tq, H)
        for h in range(num_heads):
            acc_sc[:, h * Dh:(h + 1) * Dh] = acc_sc[:, h * Dh:(h + 1) * Dh] * inv[:, h:h + 1]
        attn = acc_sc[...].astype(w_ref.dtype)               # (tq, D) bf16
        o = jnp.dot(attn, w_ref[...], preferred_element_type=jnp.float32)
        o = o + b_ref[...].astype(jnp.float32) + res_ref[...].astype(jnp.float32)
        o_ref[...] = o.astype(o_ref.dtype)


# ---------------------------------------------------------------------------
# pallas_call wrappers
# ---------------------------------------------------------------------------

def linear(x, w, b, *, gelu=False, tm=256, tn=512, tk=1024):
    """y = act(x @ w + b).  x: (M, K), w: (K, N), b: (N,).  K-tiled reduction."""
    M, K = x.shape
    N = w.shape[1]
    tm = _pick_tile(M, tm, 8)
    tn = _pick_tile(N, tn, 128)
    tk = _pick_tile(K, tk, 128)
    return pl.pallas_call(
        functools.partial(_matmul_kernel, gelu=gelu),
        out_shape=jax.ShapeDtypeStruct((M, N), x.dtype),
        grid=(M // tm, N // tn, K // tk),
        in_specs=[pl.BlockSpec((tm, tk), lambda i, j, k: (i, k)),
                  pl.BlockSpec((tk, tn), lambda i, j, k: (k, j)),
                  pl.BlockSpec((1, tn), lambda i, j, k: (0, j))],
        out_specs=pl.BlockSpec((tm, tn), lambda i, j, k: (i, j)),
        scratch_shapes=[pltpu.VMEM((tm, tn), jnp.float32)],
        compiler_params=_cparams("parallel", "parallel", "arbitrary"),
    )(x, w, b.reshape(1, N))


def linear_residual(x, w, b, res, *, tm=256, tn=512, tk=1024):
    """y = x @ w + b + res (bias and residual add fused).  K-tiled reduction."""
    M, K = x.shape
    N = w.shape[1]
    tm = _pick_tile(M, tm, 8)
    tn = _pick_tile(N, tn, 128)
    tk = _pick_tile(K, tk, 128)
    return pl.pallas_call(
        _matmul_residual_kernel,
        out_shape=jax.ShapeDtypeStruct((M, N), res.dtype),
        grid=(M // tm, N // tn, K // tk),
        in_specs=[pl.BlockSpec((tm, tk), lambda i, j, k: (i, k)),
                  pl.BlockSpec((tk, tn), lambda i, j, k: (k, j)),
                  pl.BlockSpec((1, tn), lambda i, j, k: (0, j)),
                  pl.BlockSpec((tm, tn), lambda i, j, k: (i, j))],
        out_specs=pl.BlockSpec((tm, tn), lambda i, j, k: (i, j)),
        scratch_shapes=[pltpu.VMEM((tm, tn), jnp.float32)],
        compiler_params=_cparams("parallel", "parallel", "arbitrary"),
    )(x, w, b.reshape(1, N), res)


def ln_linear(x, g, bln, w, b, *, gelu=False, eps=1e-5, tm=256, tn=512):
    """y = act(LayerNorm(x) @ w + b) with LN fused into the matmul kernel.
    K (= LN feature dim) is kept whole so the LN statistics see the full row."""
    M, K = x.shape
    N = w.shape[1]
    tm = _pick_tile(M, tm, 8)
    tn = _pick_tile(N, tn, 128)
    return pl.pallas_call(
        functools.partial(_ln_linear_kernel, gelu=gelu, eps=eps),
        out_shape=jax.ShapeDtypeStruct((M, N), x.dtype),
        grid=(M // tm, N // tn),
        in_specs=[pl.BlockSpec((tm, K), lambda i, j: (i, 0)),
                  pl.BlockSpec((1, K), lambda i, j: (0, 0)),
                  pl.BlockSpec((1, K), lambda i, j: (0, 0)),
                  pl.BlockSpec((K, tn), lambda i, j: (0, j)),
                  pl.BlockSpec((1, tn), lambda i, j: (0, j))],
        out_specs=pl.BlockSpec((tm, tn), lambda i, j: (i, j)),
        compiler_params=_cparams("parallel", "parallel"),
    )(x, g.reshape(1, K), bln.reshape(1, K), w, b.reshape(1, N))


def layernorm(x, g, b, *, eps=1e-5, tm=512):
    """Standalone LayerNorm over the last axis, tiled over rows."""
    shape = x.shape
    D = shape[-1]
    x2 = x.reshape(-1, D)
    M = x2.shape[0]
    tm = _pick_tile(M, tm, 8)
    y = pl.pallas_call(
        functools.partial(_layernorm_kernel, eps=eps),
        out_shape=jax.ShapeDtypeStruct((M, D), x.dtype),
        grid=(M // tm,),
        in_specs=[pl.BlockSpec((tm, D), lambda i: (i, 0)),
                  pl.BlockSpec((1, D), lambda i: (0, 0)),
                  pl.BlockSpec((1, D), lambda i: (0, 0))],
        out_specs=pl.BlockSpec((tm, D), lambda i: (i, 0)),
        compiler_params=_cparams("parallel"),
    )(x2, g.reshape(1, D), b.reshape(1, D))
    return y.reshape(shape)


def attention_block(q, kv, proj_w, proj_b, res, *, num_heads, scale,
                    tq=256, tk=512):
    """Fused multi-head flash attention + output projection + residual.

    q:   (B, Lq, D)   projected queries
    kv:  (B, Lk, 2D)  projected keys||values
    res: (B, Lq, D)   residual stream (pre-norm input of the sub-layer)
    returns (B, Lq, D)
    """
    B, Lq, D = q.shape
    Lk = kv.shape[1]
    tq = _pick_tile(Lq, tq, 8)
    tk = _pick_tile(Lk, tk, 8)
    return pl.pallas_call(
        functools.partial(_attn_kernel, num_heads=num_heads, scale=scale),
        out_shape=jax.ShapeDtypeStruct((B, Lq, D), res.dtype),
        grid=(B, Lq // tq, Lk // tk),
        in_specs=[pl.BlockSpec((None, tq, D), lambda b, i, k: (b, i, 0)),
                  pl.BlockSpec((None, tk, 2 * D), lambda b, i, k: (b, k, 0)),
                  pl.BlockSpec((D, D), lambda b, i, k: (0, 0)),
                  pl.BlockSpec((1, D), lambda b, i, k: (0, 0)),
                  pl.BlockSpec((None, tq, D), lambda b, i, k: (b, i, 0))],
        out_specs=pl.BlockSpec((None, tq, D), lambda b, i, k: (b, i, 0)),
        scratch_shapes=[pltpu.VMEM((tq, num_heads), jnp.float32),   # m
                        pltpu.VMEM((tq, num_heads), jnp.float32),   # l
                        pltpu.VMEM((tq, D), jnp.float32)],          # acc
        compiler_params=_cparams("parallel", "parallel", "arbitrary"),
    )(q, kv, proj_w, proj_b.reshape(1, D), res)


# ---------------------------------------------------------------------------
# Model composition
# ---------------------------------------------------------------------------

def decoder_block(x, memory, p, num_heads, scale):
    B, L, D = x.shape
    S = memory.shape[1]
    x2 = x.reshape(B * L, D)

    # --- self-attention sub-layer (pre-norm) ---
    # Single fused LN + qkv projection over the full (D, 3D) weight (LN and the
    # x reads happen once); result sliced into q / kv.  qkv_bias=False -> zero bias.
    qkv = ln_linear(x2, p['ln1_g'], p['ln1_b'], p['qkv_w'], p['qkv_b'])
    qkv = qkv.reshape(B, L, 3 * D)
    q = qkv[:, :, :D]
    kv = qkv[:, :, D:]
    x = attention_block(q, kv, p['proj_w'], p['proj_b'], x,
                        num_heads=num_heads, scale=scale)

    # --- cross-attention sub-layer; queries from LN(x), keys/values from memory ---
    x2 = x.reshape(B * L, D)
    q = ln_linear(x2, p['lnq_g'], p['lnq_b'], p['q_w'], p['q_b']).reshape(B, L, D)
    kv = linear(memory.reshape(B * S, D), p['kv_w'], p['kv_b']).reshape(B, S, 2 * D)
    x = attention_block(q, kv, p['cproj_w'], p['cproj_b'], x,
                        num_heads=num_heads, scale=scale)

    # --- MLP sub-layer: LN + fc1 + bias + GELU fused; fc2 + bias + residual fused ---
    x2 = x.reshape(B * L, D)
    h = ln_linear(x2, p['ln2_g'], p['ln2_b'], p['fc1_w'], p['fc1_b'], gelu=True)
    x2 = linear_residual(h, p['fc2_w'], p['fc2_b'], x2)
    return x2.reshape(B, L, D)


def sinusoidal_pos_encoding(length, dim):
    pos = jnp.arange(length, dtype=jnp.float32)[:, None]
    div = jnp.exp(jnp.arange(0, dim, 2, dtype=jnp.float32) * (-math.log(10000.0) / dim))
    pe = jnp.zeros((length, dim), dtype=jnp.float32)
    pe = pe.at[:, 0::2].set(jnp.sin(pos * div))
    pe = pe.at[:, 1::2].set(jnp.cos(pos * div))
    return pe


def cross_attention_forward(params, trg, memory, num_heads, scale):
    """trg: (B, T, N, F); memory: (B, S, D) -> (B, N*T, D)."""
    B, T, N, F = trg.shape
    D = params['emb_w'].shape[1]
    cdt = params['emb_w'].dtype             # compute dtype (bf16)
    trg = trg.astype(cdt)
    memory = memory.astype(cdt)

    # trg_embedding (Linear) -- tiled Pallas matmul
    x = linear(trg.reshape(B * T * N, F), params['emb_w'], params['emb_b'])
    x = x.reshape(B, T, N, D)

    # 'b t n m -> (b t) n m'; + pos_embed (over patches)
    x = x + params['pos_embed'][None]                       # (1,1,N,D) broadcast

    # '(b t) n m -> (b n) t m'; + sinusoidal time embedding (over frames)
    x = jnp.transpose(x, (0, 2, 1, 3))                      # (B, N, T, D)
    x = x + sinusoidal_pos_encoding(T, D)[None, None].astype(cdt)

    # '(b n) t m -> b (n t) m'
    x = x.reshape(B, N * T, D).astype(cdt)

    for bp in params['blocks']:
        x = decoder_block(x, memory, bp, num_heads, scale)

    x = layernorm(x, params['norm_g'], params['norm_b'])
    return x


# ---------------------------------------------------------------------------
# Deterministic parameter initialization (shapes from __init__)
# ---------------------------------------------------------------------------

def init_params(key, in_features, num_patches, embed_dim, depth, mlp_ratio,
                dtype=jnp.bfloat16):
    hidden = int(embed_dim * mlp_ratio)

    def nrm(k, shape):
        return (jax.random.normal(k, shape, jnp.float32) * 0.02).astype(dtype)

    def zeros(shape):
        return jnp.zeros(shape, dtype)

    def ones(shape):
        return jnp.ones(shape, dtype)

    keys = iter(jax.random.split(key, 2 + 7 * depth))
    params = {
        'emb_w': nrm(next(keys), (in_features, embed_dim)),
        'emb_b': zeros((embed_dim,)),
        'pos_embed': nrm(next(keys), (1, num_patches, embed_dim)),
        'norm_g': ones((embed_dim,)),
        'norm_b': zeros((embed_dim,)),
        'blocks': [],
    }
    for _ in range(depth):
        blk = {
            'ln1_g': ones((embed_dim,)),
            'ln1_b': zeros((embed_dim,)),
            'qkv_w': nrm(next(keys), (embed_dim, 3 * embed_dim)),
            'qkv_b': zeros((3 * embed_dim,)),                 # qkv_bias=False
            'proj_w': nrm(next(keys), (embed_dim, embed_dim)),
            'proj_b': zeros((embed_dim,)),
            'lnq_g': ones((embed_dim,)),
            'lnq_b': zeros((embed_dim,)),
            'q_w': nrm(next(keys), (embed_dim, embed_dim)),
            'q_b': zeros((embed_dim,)),
            'kv_w': nrm(next(keys), (embed_dim, 2 * embed_dim)),
            'kv_b': zeros((2 * embed_dim,)),
            'cproj_w': nrm(next(keys), (embed_dim, embed_dim)),
            'cproj_b': zeros((embed_dim,)),
            'ln2_g': ones((embed_dim,)),
            'ln2_b': zeros((embed_dim,)),
            'fc1_w': nrm(next(keys), (embed_dim, hidden)),
            'fc1_b': zeros((hidden,)),
            'fc2_w': nrm(next(keys), (hidden, embed_dim)),
            'fc2_b': zeros((embed_dim,)),
        }
        params['blocks'].append(blk)
    return params


# ---------------------------------------------------------------------------

if __name__ == "__main__":
    # small shapes consistent with the module's forward
    B, T, N, F = 2, 2, 4, 16            # batch, frames, patches, in_features
    embed_dim, depth, num_heads, mlp_ratio = 128, 2, 4, 4.0
    S = 8                               # memory sequence length

    key = jax.random.PRNGKey(0)
    k_trg, k_mem, k_par = jax.random.split(key, 3)
    trg = jax.random.normal(k_trg, (B, T, N, F), jnp.float32)
    memory = jax.random.normal(k_mem, (B, S, embed_dim), jnp.float32)

    params = init_params(k_par, F, N, embed_dim, depth, mlp_ratio)
    scale = (embed_dim // num_heads) ** -0.5    # qk_scale=None -> head_dim ** -0.5

    fwd = jax.jit(functools.partial(cross_attention_forward,
                                    num_heads=num_heads, scale=scale))
    out = fwd(params, trg, memory)
    out = jax.block_until_ready(out)
    assert out.shape == (B, N * T, embed_dim), out.shape
    assert bool(jnp.all(jnp.isfinite(out.astype(jnp.float32))))
    print("KERNEL_OK")
</pallas_src>

<mosaic_0001>
module attributes {stable_mosaic.version = 11 : i64} {
  func.func @_ln_linear_kernel(%arg0: i32, %arg1: i32, %arg2: memref<16x128xbf16, #tpu.memory_space<vmem>>, %arg3: memref<1x128xbf16, #tpu.memory_space<vmem>>, %arg4: memref<1x128xbf16, #tpu.memory_space<vmem>>, %arg5: memref<128x384xbf16, #tpu.memory_space<vmem>>, %arg6: memref<1x384xbf16, #tpu.memory_space<vmem>>, %arg7: memref<16x384xbf16, #tpu.memory_space<vmem>>) attributes {dimension_semantics = [#tpu.dimension_semantics<parallel>, #tpu.dimension_semantics<parallel>], iteration_bounds = array<i64: 1, 1>, scalar_prefetch = 0 : i64, scratch_operands = 0 : i64, tpu.core_type = #tpu.core_type<tc>, window_params = [{transform_indices = @transform_0, window_bounds = array<i64: 16, 128>}, {pipeline_mode = #tpu.pipeline_mode<synchronous>, transform_indices = @transform_1, window_bounds = array<i64: 1, 128>}, {pipeline_mode = #tpu.pipeline_mode<synchronous>, transform_indices = @transform_2, window_bounds = array<i64: 1, 128>}, {transform_indices = @transform_3, window_bounds = array<i64: 128, 384>}, {transform_indices = @transform_4, window_bounds = array<i64: 1, 384>}, {transform_indices = @transform_5, window_bounds = array<i64: 16, 384>}]} {
    %c0 = arith.constant 0 : index
    %c0_0 = arith.constant 0 : index
    %0 = vector.load %arg2[%c0, %c0_0] : memref<16x128xbf16, #tpu.memory_space<vmem>>, vector<16x128xbf16>
    %c0_1 = arith.constant 0 : index
    %c0_2 = arith.constant 0 : index
    %1 = vector.load %arg3[%c0_1, %c0_2] : memref<1x128xbf16, #tpu.memory_space<vmem>>, vector<1x128xbf16>
    %c0_3 = arith.constant 0 : index
    %c0_4 = arith.constant 0 : index
    %2 = vector.load %arg4[%c0_3, %c0_4] : memref<1x128xbf16, #tpu.memory_space<vmem>>, vector<1x128xbf16>
    %3 = arith.extf %0 : vector<16x128xbf16> to vector<16x128xf32>
    %cst = arith.constant dense<0.000000e+00> : vector<16xf32>
    %4 = vector.multi_reduction <add>, %3, %cst [1] : vector<16x128xf32> to vector<16xf32>
    %5 = vector.shape_cast %4 : vector<16xf32> to vector<16x1xf32>
    %cst_5 = arith.constant 1.280000e+02 : f32
    %6 = vector.broadcast %cst_5 : f32 to vector<16x1xf32>
    %7 = arith.divf %5, %6 : vector<16x1xf32>
    %8 = vector.broadcast %7 : vector<16x1xf32> to vector<16x128xf32>
    %9 = arith.subf %3, %8 : vector<16x128xf32>
    %10 = arith.mulf %9, %9 : vector<16x128xf32>
    %cst_6 = arith.constant dense<0.000000e+00> : vector<16xf32>
    %11 = vector.multi_reduction <add>, %10, %cst_6 [1] : vector<16x128xf32> to vector<16xf32>
    %12 = vector.shape_cast %11 : vector<16xf32> to vector<16x1xf32>
    %cst_7 = arith.constant 1.280000e+02 : f32
    %13 = vector.broadcast %cst_7 : f32 to vector<16x1xf32>
    %14 = arith.divf %12, %13 : vector<16x1xf32>
    %15 = vector.broadcast %7 : vector<16x1xf32> to vector<16x128xf32>
    %16 = arith.subf %3, %15 : vector<16x128xf32>
    %cst_8 = arith.constant 9.99999974E-6 : f32
    %17 = vector.broadcast %cst_8 : f32 to vector<16x1xf32>
    %18 = arith.addf %14, %17 : vector<16x1xf32>
    %19 = math.rsqrt %18 : vector<16x1xf32>
    %20 = vector.broadcast %19 : vector<16x1xf32> to vector<16x128xf32>
    %21 = arith.mulf %16, %20 : vector<16x128xf32>
    %22 = arith.extf %1 : vector<1x128xbf16> to vector<1x128xf32>
    %23 = vector.broadcast %22 : vector<1x128xf32> to vector<16x128xf32>
    %24 = arith.mulf %21, %23 : vector<16x128xf32>
    %25 = arith.extf %2 : vector<1x128xbf16> to vector<1x128xf32>
    %26 = vector.broadcast %25 : vector<1x128xf32> to vector<16x128xf32>
    %27 = arith.addf %24, %26 : vector<16x128xf32>
    %28 = arith.truncf %27 : vector<16x128xf32> to vector<16x128xbf16>
    %c0_9 = arith.constant 0 : index
    %c0_10 = arith.constant 0 : index
    %29 = vector.load %arg5[%c0_9, %c0_10] : memref<128x384xbf16, #tpu.memory_space<vmem>>, vector<128x384xbf16>
    %cst_11 = arith.constant dense<0.000000e+00> : vector<16x384xf32>
    %30 = tpu.matmul %28, %29, %cst_11 {dimension_numbers = #tpu.dot_dimension_numbers<[1], [0], [0], [1], [0, 0, 1, 1], [], []>} : vector<16x128xbf16>, vector<128x384xbf16>, vector<16x384xf32> -> vector<16x384xf32>
    %c0_12 = arith.constant 0 : index
    %c0_13 = arith.constant 0 : index
    %31 = vector.load %arg6[%c0_12, %c0_13] : memref<1x384xbf16, #tpu.memory_space<vmem>>, vector<1x384xbf16>
    %32 = arith.extf %31 : vector<1x384xbf16> to vector<1x384xf32>
    %33 = vector.broadcast %32 : vector<1x384xf32> to vector<16x384xf32>
    %34 = arith.addf %30, %33 : vector<16x384xf32>
    %35 = arith.truncf %34 : vector<16x384xf32> to vector<16x384xbf16>
    %c0_14 = arith.constant 0 : index
    %c0_15 = arith.constant 0 : index
    %36 = vector.load %arg7[%c0_14, %c0_15] : memref<16x384xbf16, #tpu.memory_space<vmem>>, vector<16x384xbf16>
    tpu.vector_store %arg7[%c0_14, %c0_15], %35 {strides = array<i32>} : memref<16x384xbf16, #tpu.memory_space<vmem>>, vector<16x384xbf16>,
    return
  }
  func.func @transform_0(%arg0: i32, %arg1: i32) -> (i32, i32) {
    %c0_i32 = arith.constant 0 : i32
    %c0_i32_0 = arith.constant 0 : i32
    return %arg0, %c0_i32 : i32, i32
  }
  func.func @transform_1(%arg0: i32, %arg1: i32) -> (i32, i32) {
    %c0_i32 = arith.constant 0 : i32
    %c0_i32_0 = arith.constant 0 : i32
    %c0_i32_1 = arith.constant 0 : i32
    return %c0_i32, %c0_i32_0 : i32, i32
  }
  func.func @transform_2(%arg0: i32, %arg1: i32) -> (i32, i32) {
    %c0_i32 = arith.constant 0 : i32
    %c0_i32_0 = arith.constant 0 : i32
    %c0_i32_1 = arith.constant 0 : i32
    return %c0_i32, %c0_i32_0 : i32, i32
  }
  func.func @transform_3(%arg0: i32, %arg1: i32) -> (i32, i32) {
    %c0_i32 = arith.constant 0 : i32
    %c0_i32_0 = arith.constant 0 : i32
    return %c0_i32, %arg1 : i32, i32
  }
  func.func @transform_4(%arg0: i32, %arg1: i32) -> (i32, i32) {
    %c0_i32 = arith.constant 0 : i32
    %c0_i32_0 = arith.constant 0 : i32
    return %c0_i32, %arg1 : i32, i32
  }
  func.func @transform_5(%arg0: i32, %arg1: i32) -> (i32, i32) {
    %c0_i32 = arith.constant 0 : i32
    return %arg0, %arg1 : i32, i32
  }
}

module attributes {stable_mosaic.version = 11 : i64} {
  func.func @_matmul_kernel(%arg0: i32, %arg1: i32, %arg2: i32, %arg3: memref<16x16xbf16, #tpu.memory_space<vmem>>, %arg4: memref<16x128xbf16, #tpu.memory_space<vmem>>, %arg5: memref<1x128xbf16, #tpu.memory_space<vmem>>, %arg6: memref<16x128xbf16, #tpu.memory_space<vmem>>, %arg7: memref<16x128xf32, #tpu.memory_space<vmem>>) attributes {dimension_semantics = [#tpu.dimension_semantics<parallel>, #tpu.dimension_semantics<parallel>, #tpu.dimension_semantics<arbitrary>], iteration_bounds = array<i64: 1, 1, 1>, scalar_prefetch = 0 : i64, scratch_operands = 1 : i64, tpu.core_type = #tpu.core_type<tc>, window_params = [{transform_indices = @transform_0, window_bounds = array<i64: 16, 16>}, {transform_indices = @transform_1, window_bounds = array<i64: 16, 128>}, {transform_indices = @transform_2, window_bounds = array<i64: 1, 128>}, {transform_indices = @transform_3, window_bounds = array<i64: 16, 128>}]} {
    %c0_i32 = arith.constant 0 : i32
    %0 = arith.cmpi eq, %arg2, %c0_i32 : i32
    %1 = arith.extui %0 : i1 to i32
    %c0_i32_0 = arith.constant 0 : i32
    %2 = arith.cmpi ne, %1, %c0_i32_0 : i32
    scf.if %2 {
      %cst_10 = arith.constant 0.000000e+00 : f32
      %12 = vector.broadcast %cst_10 : f32 to vector<16x128xf32>
      %c0_11 = arith.constant 0 : index
      %c0_12 = arith.constant 0 : index
      %13 = vector.load %arg7[%c0_11, %c0_12] : memref<16x128xf32, #tpu.memory_space<vmem>>, vector<16x128xf32>
      tpu.vector_store %arg7[%c0_11, %c0_12], %12 {strides = array<i32>} : memref<16x128xf32, #tpu.memory_space<vmem>>, vector<16x128xf32>,
    } else {
    }
    %c0 = arith.constant 0 : index
    %c0_1 = arith.constant 0 : index
    %3 = vector.load %arg7[%c0, %c0_1] : memref<16x128xf32, #tpu.memory_space<vmem>>, vector<16x128xf32>
    %c0_2 = arith.constant 0 : index
    %c0_3 = arith.constant 0 : index
    %4 = vector.load %arg3[%c0_2, %c0_3] : memref<16x16xbf16, #tpu.memory_space<vmem>>, vector<16x16xbf16>
    %c0_4 = arith.constant 0 : index
    %c0_5 = arith.constant 0 : index
    %5 = vector.load %arg4[%c0_4, %c0_5] : memref<16x128xbf16, #tpu.memory_space<vmem>>, vector<16x128xbf16>
    %cst = arith.constant dense<0.000000e+00> : vector<16x128xf32>
    %6 = tpu.matmul %4, %5, %cst {dimension_numbers = #tpu.dot_dimension_numbers<[1], [0], [0], [1], [0, 0, 1, 1], [], []>} : vector<16x16xbf16>, vector<16x128xbf16>, vector<16x128xf32> -> vector<16x128xf32>
    %7 = arith.addf %3, %6 : vector<16x128xf32>
    %c0_6 = arith.constant 0 : index
    %c0_7 = arith.constant 0 : index
    %8 = vector.load %arg7[%c0_6, %c0_7] : memref<16x128xf32, #tpu.memory_space<vmem>>, vector<16x128xf32>
    tpu.vector_store %arg7[%c0_6, %c0_7], %7 {strides = array<i32>} : memref<16x128xf32, #tpu.memory_space<vmem>>, vector<16x128xf32>,
    %c0_i32_8 = arith.constant 0 : i32
    %9 = arith.cmpi eq, %arg2, %c0_i32_8 : i32
    %10 = arith.extui %9 : i1 to i32
    %c0_i32_9 = arith.constant 0 : i32
    %11 = arith.cmpi ne, %10, %c0_i32_9 : i32
    scf.if %11 {
      %c0_10 = arith.constant 0 : index
      %c0_11 = arith.constant 0 : index
      %12 = vector.load %arg7[%c0_10, %c0_11] : memref<16x128xf32, #tpu.memory_space<vmem>>, vector<16x128xf32>
      %c0_12 = arith.constant 0 : index
      %c0_13 = arith.constant 0 : index
      %13 = vector.load %arg5[%c0_12, %c0_13] : memref<1x128xbf16, #tpu.memory_space<vmem>>, vector<1x128xbf16>
      %14 = arith.extf %13 : vector<1x128xbf16> to vector<1x128xf32>
      %15 = vector.broadcast %14 : vector<1x128xf32> to vector<16x128xf32>
      %16 = arith.addf %12, %15 : vector<16x128xf32>
      %17 = arith.truncf %16 : vector<16x128xf32> to vector<16x128xbf16>
      %c0_14 = arith.constant 0 : index
      %c0_15 = arith.constant 0 : index
      %18 = vector.load %arg6[%c0_14, %c0_15] : memref<16x128xbf16, #tpu.memory_space<vmem>>, vector<16x128xbf16>
      tpu.vector_store %arg6[%c0_14, %c0_15], %17 {strides = array<i32>} : memref<16x128xbf16, #tpu.memory_space<vmem>>, vector<16x128xbf16>,
    } else {
    }
    return
  }
  func.func @transform_0(%arg0: i32, %arg1: i32, %arg2: i32) -> (i32, i32) {
    %c0_i32 = arith.constant 0 : i32
    return %arg0, %arg2 : i32, i32
  }
  func.func @transform_1(%arg0: i32, %arg1: i32, %arg2: i32) -> (i32, i32) {
    %c0_i32 = arith.constant 0 : i32
    return %arg2, %arg1 : i32, i32
  }
  func.func @transform_2(%arg0: i32, %arg1: i32, %arg2: i32) -> (i32, i32) {
    %c0_i32 = arith.constant 0 : i32
    %c0_i32_0 = arith.constant 0 : i32
    return %c0_i32, %arg1 : i32, i32
  }
  func.func @transform_3(%arg0: i32, %arg1: i32, %arg2: i32) -> (i32, i32) {
    %c0_i32 = arith.constant 0 : i32
    return %arg0, %arg1 : i32, i32
  }
}

module attributes {stable_mosaic.version = 11 : i64} {
  func.func @_attn_kernel(%arg0: i32, %arg1: i32, %arg2: i32, %arg3: memref<1x8x128xbf16, #tpu.memory_space<vmem>>, %arg4: memref<1x8x256xbf16, #tpu.memory_space<vmem>>, %arg5: memref<128x128xbf16, #tpu.memory_space<vmem>>, %arg6: memref<1x128xbf16, #tpu.memory_space<vmem>>, %arg7: memref<1x8x128xbf16, #tpu.memory_space<vmem>>, %arg8: memref<1x8x128xbf16, #tpu.memory_space<vmem>>, %arg9: memref<8x4xf32, #tpu.memory_space<vmem>>, %arg10: memref<8x4xf32, #tpu.memory_space<vmem>>, %arg11: memref<8x128xf32, #tpu.memory_space<vmem>>) attributes {dimension_semantics = [#tpu.dimension_semantics<parallel>, #tpu.dimension_semantics<parallel>, #tpu.dimension_semantics<arbitrary>], iteration_bounds = array<i64: 2, 1, 1>, scalar_prefetch = 0 : i64, scratch_operands = 3 : i64, tpu.core_type = #tpu.core_type<tc>, window_params = [{transform_indices = @transform_0, window_bounds = array<i64: 1, 8, 128>}, {transform_indices = @transform_1, window_bounds = array<i64: 1, 8, 256>}, {pipeline_mode = #tpu.pipeline_mode<synchronous>, transform_indices = @transform_2, window_bounds = array<i64: 128, 128>}, {pipeline_mode = #tpu.pipeline_mode<synchronous>, transform_indices = @transform_3, window_bounds = array<i64: 1, 128>}, {transform_indices = @transform_4, window_bounds = array<i64: 1, 8, 128>}, {transform_indices = @transform_5, window_bounds = array<i64: 1, 8, 128>}]} {
    %c0_i32 = arith.constant 0 : i32
    %0 = arith.cmpi eq, %arg2, %c0_i32 : i32
    %1 = arith.extui %0 : i1 to i32
    %c0_i32_0 = arith.constant 0 : i32
    %2 = arith.cmpi ne, %1, %c0_i32_0 : i32
    scf.if %2 {
      %cst_69 = arith.constant 0xFF800000 : f32
      %128 = vector.broadcast %cst_69 : f32 to vector<8x4xf32>
      %c0_70 = arith.constant 0 : index
      %c0_71 = arith.constant 0 : index
      %129 = vector.load %arg9[%c0_70, %c0_71] : memref<8x4xf32, #tpu.memory_space<vmem>>, vector<8x4xf32>
      tpu.vector_store %arg9[%c0_70, %c0_71], %128 {strides = array<i32>} : memref<8x4xf32, #tpu.memory_space<vmem>>, vector<8x4xf32>,
      %cst_72 = arith.constant 0.000000e+00 : f32
      %130 = vector.broadcast %cst_72 : f32 to vector<8x4xf32>
      %c0_73 = arith.constant 0 : index
      %c0_74 = arith.constant 0 : index
      %131 = vector.load %arg10[%c0_73, %c0_74] : memref<8x4xf32, #tpu.memory_space<vmem>>, vector<8x4xf32>
      tpu.vector_store %arg10[%c0_73, %c0_74], %130 {strides = array<i32>} : memref<8x4xf32, #tpu.memory_space<vmem>>, vector<8x4xf32>,
      %cst_75 = arith.constant 0.000000e+00 : f32
      %132 = vector.broadcast %cst_75 : f32 to vector<8x128xf32>
      %c0_76 = arith.constant 0 : index
      %c0_77 = arith.constant 0 : index
      %133 = vector.load %arg11[%c0_76, %c0_77] : memref<8x128xf32, #tpu.memory_space<vmem>>, vector<8x128xf32>
      tpu.vector_store %arg11[%c0_76, %c0_77], %132 {strides = array<i32>} : memref<8x128xf32, #tpu.memory_space<vmem>>, vector<8x128xf32>,
    } else {
    }
    %c0 = arith.constant 0 : index
    %c0_1 = arith.constant 0 : index
    %c0_2 = arith.constant 0 : index
    %3 = vector.load %arg3[%c0, %c0_1, %c0_2] : memref<1x8x128xbf16, #tpu.memory_space<vmem>>, vector<1x8x128xbf16>
    %4 = vector.shape_cast %3 : vector<1x8x128xbf16> to vector<8x128xbf16>
    %c0_3 = arith.constant 0 : index
    %c0_4 = arith.constant 0 : index
    %c0_5 = arith.constant 0 : index
    %5 = vector.load %arg4[%c0_3, %c0_4, %c0_5] : memref<1x8x256xbf16, #tpu.memory_space<vmem>>, vector<1x8x256xbf16>
    %6 = vector.shape_cast %5 : vector<1x8x256xbf16> to vector<8x256xbf16>
    %7 = vector.extract_strided_slice %6 {offsets = [0, 0], sizes = [8, 128], strides = [1, 1]} : vector<8x256xbf16> to vector<8x128xbf16>
    %8 = vector.extract_strided_slice %6 {offsets = [0, 128], sizes = [8, 128], strides = [1, 1]} : vector<8x256xbf16> to vector<8x128xbf16>
    %9 = vector.extract_strided_slice %4 {offsets = [0, 0], sizes = [8, 32], strides = [1, 1]} : vector<8x128xbf16> to vector<8x32xbf16>
    %10 = vector.extract_strided_slice %7 {offsets = [0, 0], sizes = [8, 32], strides = [1, 1]} : vector<8x128xbf16> to vector<8x32xbf16>
    %11 = vector.extract_strided_slice %8 {offsets = [0, 0], sizes = [8, 32], strides = [1, 1]} : vector<8x128xbf16> to vector<8x32xbf16>
    %cst = arith.constant dense<0.000000e+00> : vector<8x8xf32>
    %12 = tpu.matmul %9, %10, %cst {dimension_numbers = #tpu.dot_dimension_numbers<[1], [1], [0], [0], [0, 0, 1, 0], [], []>} : vector<8x32xbf16>, vector<8x32xbf16>, vector<8x8xf32> -> vector<8x8xf32>
    %cst_6 = arith.constant 0.176776692 : f32
    %13 = vector.broadcast %cst_6 : f32 to vector<8x8xf32>
    %14 = arith.mulf %12, %13 : vector<8x8xf32>
    %c0_7 = arith.constant 0 : index
    %c0_8 = arith.constant 0 : index
    %15 = vector.load %arg9[%c0_7, %c0_8] : memref<8x4xf32, #tpu.memory_space<vmem>>, vector<8x1xf32>
    %cst_9 = arith.constant dense<0xFF800000> : vector<8xf32>
    %16 = vector.multi_reduction <maximumf>, %14, %cst_9 [1] : vector<8x8xf32> to vector<8xf32>
    %17 = vector.shape_cast %16 : vector<8xf32> to vector<8x1xf32>
    %18 = arith.maximumf %15, %17 : vector<8x1xf32>
    %19 = arith.subf %15, %18 : vector<8x1xf32>
    %20 = math.exp %19 : vector<8x1xf32>
    %21 = vector.broadcast %18 : vector<8x1xf32> to vector<8x8xf32>
    %22 = arith.subf %14, %21 : vector<8x8xf32>
    %23 = math.exp %22 : vector<8x8xf32>
    %c0_10 = arith.constant 0 : index
    %c0_11 = arith.constant 0 : index
    %24 = vector.load %arg10[%c0_10, %c0_11] : memref<8x4xf32, #tpu.memory_space<vmem>>, vector<8x1xf32>
    %25 = arith.mulf %20, %24 : vector<8x1xf32>
    %cst_12 = arith.constant dense<0.000000e+00> : vector<8xf32>
    %26 = vector.multi_reduction <add>, %23, %cst_12 [1] : vector<8x8xf32> to vector<8xf32>
    %27 = vector.shape_cast %26 : vector<8xf32> to vector<8x1xf32>
    %28 = arith.addf %25, %27 : vector<8x1xf32>
    %c0_13 = arith.constant 0 : index
    %c0_14 = arith.constant 0 : index
    %29 = vector.load %arg10[%c0_13, %c0_14] : memref<8x4xf32, #tpu.memory_space<vmem>>, vector<8x1xf32>
    tpu.vector_store %arg10[%c0_13, %c0_14], %28 {strides = array<i32>} : memref<8x4xf32, #tpu.memory_space<vmem>>, vector<8x1xf32>,
    %30 = arith.truncf %23 : vector<8x8xf32> to vector<8x8xbf16>
    %cst_15 = arith.constant dense<0.000000e+00> : vector<8x32xf32>
    %31 = tpu.matmul %30, %11, %cst_15 {dimension_numbers = #tpu.dot_dimension_numbers<[1], [0], [0], [1], [0, 0, 1, 1], [], []>} : vector<8x8xbf16>, vector<8x32xbf16>, vector<8x32xf32> -> vector<8x32xf32>
    %c0_16 = arith.constant 0 : index
    %c0_17 = arith.constant 0 : index
    %32 = vector.load %arg11[%c0_16, %c0_17] : memref<8x128xf32, #tpu.memory_space<vmem>>, vector<8x32xf32>
    %33 = vector.broadcast %20 : vector<8x1xf32> to vector<8x32xf32>
    %34 = arith.mulf %33, %32 : vector<8x32xf32>
    %35 = arith.addf %34, %31 : vector<8x32xf32>
    %c0_18 = arith.constant 0 : index
    %c0_19 = arith.constant 0 : index
    %36 = vector.load %arg11[%c0_18, %c0_19] : memref<8x128xf32, #tpu.memory_space<vmem>>, vector<8x32xf32>
    tpu.vector_store %arg11[%c0_18, %c0_19], %35 {strides = array<i32>} : memref<8x128xf32, #tpu.memory_space<vmem>>, vector<8x32xf32>,
    %c0_20 = arith.constant 0 : index
    %c0_21 = arith.constant 0 : index
    %37 = vector.load %arg9[%c0_20, %c0_21] : memref<8x4xf32, #tpu.memory_space<vmem>>, vector<8x1xf32>
    tpu.vector_store %arg9[%c0_20, %c0_21], %18 {strides = array<i32>} : memref<8x4xf32, #tpu.memory_space<vmem>>, vector<8x1xf32>,
    %38 = vector.extract_strided_slice %4 {offsets = [0, 32], sizes = [8, 32], strides = [1, 1]} : vector<8x128xbf16> to vector<8x32xbf16>
    %39 = vector.extract_strided_slice %7 {offsets = [0, 32], sizes = [8, 32], strides = [1, 1]} : vector<8x128xbf16> to vector<8x32xbf16>
    %40 = vector.extract_strided_slice %8 {offsets = [0, 32], sizes = [8, 32], strides = [1, 1]} : vector<8x128xbf16> to vector<8x32xbf16>
    %cst_22 = arith.constant dense<0.000000e+00> : vector<8x8xf32>
    %41 = tpu.matmul %38, %39, %cst_22 {dimension_numbers = #tpu.dot_dimension_numbers<[1], [1], [0], [0], [0, 0, 1, 0], [], []>} : vector<8x32xbf16>, vector<8x32xbf16>, vector<8x8xf32> -> vector<8x8xf32>
    %cst_23 = arith.constant 0.176776692 : f32
    %42 = vector.broadcast %cst_23 : f32 to vector<8x8xf32>
    %43 = arith.mulf %41, %42 : vector<8x8xf32>
    %c0_24 = arith.constant 0 : index
    %c1 = arith.constant 1 : index
    %44 = vector.load %arg9[%c0_24, %c1] : memref<8x4xf32, #tpu.memory_space<vmem>>, vector<8x1xf32>
    %cst_25 = arith.constant dense<0xFF800000> : vector<8xf32>
    %45 = vector.multi_reduction <maximumf>, %43, %cst_25 [1] : vector<8x8xf32> to vector<8xf32>
    %46 = vector.shape_cast %45 : vector<8xf32> to vector<8x1xf32>
    %47 = arith.maximumf %44, %46 : vector<8x1xf32>
    %48 = arith.subf %44, %47 : vector<8x1xf32>
    %49 = math.exp %48 : vector<8x1xf32>
    %50 = vector.broadcast %47 : vector<8x1xf32> to vector<8x8xf32>
    %51 = arith.subf %43, %50 : vector<8x8xf32>
    %52 = math.exp %51 : vector<8x8xf32>
    %c0_26 = arith.constant 0 : index
    %c1_27 = arith.constant 1 : index
    %53 = vector.load %arg10[%c0_26, %c1_27] : memref<8x4xf32, #tpu.memory_space<vmem>>, vector<8x1xf32>
    %54 = arith.mulf %49, %53 : vector<8x1xf32>
    %cst_28 = arith.constant dense<0.000000e+00> : vector<8xf32>
    %55 = vector.multi_reduction <add>, %52, %cst_28 [1] : vector<8x8xf32> to vector<8xf32>
    %56 = vector.shape_cast %55 : vector<8xf32> to vector<8x1xf32>
    %57 = arith.addf %54, %56 : vector<8x1xf32>
    %c0_29 = arith.constant 0 : index
    %c1_30 = arith.constant 1 : index
    %58 = vector.load %arg10[%c0_29, %c1_30] : memref<8x4xf32, #tpu.memory_space<vmem>>, vector<8x1xf32>
    tpu.vector_store %arg10[%c0_29, %c1_30], %57 {strides = array<i32>} : memref<8x4xf32, #tpu.memory_space<vmem>>, vector<8x1xf32>,
    %59 = arith.truncf %52 : vector<8x8xf32> to vector<8x8xbf16>
    %cst_31 = arith.constant dense<0.000000e+00> : vector<8x32xf32>
    %60 = tpu.matmul %59, %40, %cst_31 {dimension_numbers = #tpu.dot_dimension_numbers<[1], [0], [0], [1], [0, 0, 1, 1], [], []>} : vector<8x8xbf16>, vector<8x32xbf16>, vector<8x32xf32> -> vector<8x32xf32>
    %c0_32 = arith.constant 0 : index
    %c32 = arith.constant 32 : index
    %61 = vector.load %arg11[%c0_32, %c32] : memref<8x128xf32, #tpu.memory_space<vmem>>, vector<8x32xf32>
    %62 = vector.broadcast %49 : vector<8x1xf32> to vector<8x32xf32>
    %63 = arith.mulf %62, %61 : vector<8x32xf32>
    %64 = arith.addf %63, %60 : vector<8x32xf32>
    %c0_33 = arith.constant 0 : index
    %c32_34 = arith.constant 32 : index
    %65 = vector.load %arg11[%c0_33, %c32_34] : memref<8x128xf32, #tpu.memory_space<vmem>>, vector<8x32xf32>
    tpu.vector_store %arg11[%c0_33, %c32_34], %64 {strides = array<i32>} : memref<8x128xf32, #tpu.memory_space<vmem>>, vector<8x32xf32>,
    %c0_35 = arith.constant 0 : index
    %c1_36 = arith.constant 1 : index
    %66 = vector.load %arg9[%c0_35, %c1_36] : memref<8x4xf32, #tpu.memory_space<vmem>>, vector<8x1xf32>
    tpu.vector_store %arg9[%c0_35, %c1_36], %47 {strides = array<i32>} : memref<8x4xf32, #tpu.memory_space<vmem>>, vector<8x1xf32>,
    %67 = vector.extract_strided_slice %4 {offsets = [0, 64], sizes = [8, 32], strides = [1, 1]} : vector<8x128xbf16> to vector<8x32xbf16>
    %68 = vector.extract_strided_slice %7 {offsets = [0, 64], sizes = [8, 32], strides = [1, 1]} : vector<8x128xbf16> to vector<8x32xbf16>
    %69 = vector.extract_strided_slice %8 {offsets = [0, 64], sizes = [8, 32], strides = [1, 1]} : vector<8x128xbf16> to vector<8x32xbf16>
    %cst_37 = arith.constant dense<0.000000e+00> : vector<8x8xf32>
    %70 = tpu.matmul %67, %68, %cst_37 {dimension_numbers = #tpu.dot_dimension_numbers<[1], [1], [0], [0], [0, 0, 1, 0], [], []>} : vector<8x32xbf16>, vector<8x32xbf16>, vector<8x8xf32> -> vector<8x8xf32>
    %cst_38 = arith.constant 0.176776692 : f32
    %71 = vector.broadcast %cst_38 : f32 to vector<8x8xf32>
    %72 = arith.mulf %70, %71 : vector<8x8xf32>
    %c0_39 = arith.constant 0 : index
    %c2 = arith.constant 2 : index
    %73 = vector.load %arg9[%c0_39, %c2] : memref<8x4xf32, #tpu.memory_space<vmem>>, vector<8x1xf32>
    %cst_40 = arith.constant dense<0xFF800000> : vector<8xf32>
    %74 = vector.multi_reduction <maximumf>, %72, %cst_40 [1] : vector<8x8xf32> to vector<8xf32>
    %75 = vector.shape_cast %74 : vector<8xf32> to vector<8x1xf32>
    %76 = arith.maximumf %73, %75 : vector<8x1xf32>
    %77 = arith.subf %73, %76 : vector<8x1xf32>
    %78 = math.exp %77 : vector<8x1xf32>
    %79 = vector.broadcast %76 : vector<8x1xf32> to vector<8x8xf32>
    %80 = arith.subf %72, %79 : vector<8x8xf32>
    %81 = math.exp %80 : vector<8x8xf32>
    %c0_41 = arith.constant 0 : index
    %c2_42 = arith.constant 2 : index
    %82 = vector.load %arg10[%c0_41, %c2_42] : memref<8x4xf32, #tpu.memory_space<vmem>>, vector<8x1xf32>
    %83 = arith.mulf %78, %82 : vector<8x1xf32>
    %cst_43 = arith.constant dense<0.000000e+00> : vector<8xf32>
    %84 = vector.multi_reduction <add>, %81, %cst_43 [1] : vector<8x8xf32> to vector<8xf32>
    %85 = vector.shape_cast %84 : vector<8xf32> to vector<8x1xf32>
    %86 = arith.addf %83, %85 : vector<8x1xf32>
    %c0_44 = arith.constant 0 : index
    %c2_45 = arith.constant 2 : index
    %87 = vector.load %arg10[%c0_44, %c2_45] : memref<8x4xf32, #tpu.memory_space<vmem>>, vector<8x1xf32>
    tpu.vector_store %arg10[%c0_44, %c2_45], %86 {strides = array<i32>} : memref<8x4xf32, #tpu.memory_space<vmem>>, vector<8x1xf32>,
    %88 = arith.truncf %81 : vector<8x8xf32> to vector<8x8xbf16>
    %cst_46 = arith.constant dense<0.000000e+00> : vector<8x32xf32>
    %89 = tpu.matmul %88, %69, %cst_46 {dimension_numbers = #tpu.dot_dimension_numbers<[1], [0], [0], [1], [0, 0, 1, 1], [], []>} : vector<8x8xbf16>, vector<8x32xbf16>, vector<8x32xf32> -> vector<8x32xf32>
    %c0_47 = arith.constant 0 : index
    %c64 = arith.constant 64 : index
    %90 = vector.load %arg11[%c0_47, %c64] : memref<8x128xf32, #tpu.memory_space<vmem>>, vector<8x32xf32>
    %91 = vector.broadcast %78 : vector<8x1xf32> to vector<8x32xf32>
    %92 = arith.mulf %91, %90 : vector<8x32xf32>
    %93 = arith.addf %92, %89 : vector<8x32xf32>
    %c0_48 = arith.constant 0 : index
    %c64_49 = arith.constant 64 : index
    %94 = vector.load %arg11[%c0_48, %c64_49] : memref<8x128xf32, #tpu.memory_space<vmem>>, vector<8x32xf32>
    tpu.vector_store %arg11[%c0_48, %c64_49], %93 {strides = array<i32>} : memref<8x128xf32, #tpu.memory_space<vmem>>, vector<8x32xf32>,
    %c0_50 = arith.constant 0 : index
    %c2_51 = arith.constant 2 : index
    %95 = vector.load %arg9[%c0_50, %c2_51] : memref<8x4xf32, #tpu.memory_space<vmem>>, vector<8x1xf32>
    tpu.vector_store %arg9[%c0_50, %c2_51], %76 {strides = array<i32>} : memref<8x4xf32, #tpu.memory_space<vmem>>, vector<8x1xf32>,
    %96 = vector.extract_strided_slice %4 {offsets = [0, 96], sizes = [8, 32], strides = [1, 1]} : vector<8x128xbf16> to vector<8x32xbf16>
    %97 = vector.extract_strided_slice %7 {offsets = [0, 96], sizes = [8, 32], strides = [1, 1]} : vector<8x128xbf16> to vector<8x32xbf16>
    %98 = vector.extract_strided_slice %8 {offsets = [0, 96], sizes = [8, 32], strides = [1, 1]} : vector<8x128xbf16> to vector<8x32xbf16>
    %cst_52 = arith.constant dense<0.000000e+00> : vector<8x8xf32>
    %99 = tpu.matmul %96, %97, %cst_52 {dimension_numbers = #tpu.dot_dimension_numbers<[1], [1], [0], [0], [0, 0, 1, 0], [], []>} : vector<8x32xbf16>, vector<8x32xbf16>, vector<8x8xf32> -> vector<8x8xf32>
    %cst_53 = arith.constant 0.176776692 : f32
    %100 = vector.broadcast %cst_53 : f32 to vector<8x8xf32>
    %101 = arith.mulf %99, %100 : vector<8x8xf32>
    %c0_54 = arith.constant 0 : index
    %c3 = arith.constant 3 : index
    %102 = vector.load %arg9[%c0_54, %c3] : memref<8x4xf32, #tpu.memory_space<vmem>>, vector<8x1xf32>
    %cst_55 = arith.constant dense<0xFF800000> : vector<8xf32>
    %103 = vector.multi_reduction <maximumf>, %101, %cst_55 [1] : vector<8x8xf32> to vector<8xf32>
    %104 = vector.shape_cast %103 : vector<8xf32> to vector<8x1xf32>
    %105 = arith.maximumf %102, %104 : vector<8x1xf32>
    %106 = arith.subf %102, %105 : vector<8x1xf32>
    %107 = math.exp %106 : vector<8x1xf32>
    %108 = vector.broadcast %105 : vector<8x1xf32> to vector<8x8xf32>
    %109 = arith.subf %101, %108 : vector<8x8xf32>
    %110 = math.exp %109 : vector<8x8xf32>
    %c0_56 = arith.constant 0 : index
    %c3_57 = arith.constant 3 : index
    %111 = vector.load %arg10[%c0_56, %c3_57] : memref<8x4xf32, #tpu.memory_space<vmem>>, vector<8x1xf32>
    %112 = arith.mulf %107, %111 : vector<8x1xf32>
    %cst_58 = arith.constant dense<0.000000e+00> : vector<8xf32>
    %113 = vector.multi_reduction <add>, %110, %cst_58 [1] : vector<8x8xf32> to vector<8xf32>
    %114 = vector.shape_cast %113 : vector<8xf32> to vector<8x1xf32>
    %115 = arith.addf %112, %114 : vector<8x1xf32>
    %c0_59 = arith.constant 0 : index
    %c3_60 = arith.constant 3 : index
    %116 = vector.load %arg10[%c0_59, %c3_60] : memref<8x4xf32, #tpu.memory_space<vmem>>, vector<8x1xf32>
    tpu.vector_store %arg10[%c0_59, %c3_60], %115 {strides = array<i32>} : memref<8x4xf32, #tpu.memory_space<vmem>>, vector<8x1xf32>,
    %117 = arith.truncf %110 : vector<8x8xf32> to vector<8x8xbf16>
    %cst_61 = arith.constant dense<0.000000e+00> : vector<8x32xf32>
    %118 = tpu.matmul %117, %98, %cst_61 {dimension_numbers = #tpu.dot_dimension_numbers<[1], [0], [0], [1], [0, 0, 1, 1], [], []>} : vector<8x8xbf16>, vector<8x32xbf16>, vector<8x32xf32> -> vector<8x32xf32>
    %c0_62 = arith.constant 0 : index
    %c96 = arith.constant 96 : index
    %119 = vector.load %arg11[%c0_62, %c96] : memref<8x128xf32, #tpu.memory_space<vmem>>, vector<8x32xf32>
    %120 = vector.broadcast %107 : vector<8x1xf32> to vector<8x32xf32>
    %121 = arith.mulf %120, %119 : vector<8x32xf32>
    %122 = arith.addf %121, %118 : vector<8x32xf32>
    %c0_63 = arith.constant 0 : index
    %c96_64 = arith.constant 96 : index
    %123 = vector.load %arg11[%c0_63, %c96_64] : memref<8x128xf32, #tpu.memory_space<vmem>>, vector<8x32xf32>
    tpu.vector_store %arg11[%c0_63, %c96_64], %122 {strides = array<i32>} : memref<8x128xf32, #tpu.memory_space<vmem>>, vector<8x32xf32>,
    %c0_65 = arith.constant 0 : index
    %c3_66 = arith.constant 3 : index
    %124 = vector.load %arg9[%c0_65, %c3_66] : memref<8x4xf32, #tpu.memory_space<vmem>>, vector<8x1xf32>
    tpu.vector_store %arg9[%c0_65, %c3_66], %105 {strides = array<i32>} : memref<8x4xf32, #tpu.memory_space<vmem>>, vector<8x1xf32>,
    %c0_i32_67 = arith.constant 0 : i32
    %125 = arith.cmpi eq, %arg2, %c0_i32_67 : i32
    %126 = arith.extui %125 : i1 to i32
    %c0_i32_68 = arith.constant 0 : i32
    %127 = arith.cmpi ne, %126, %c0_i32_68 : i32
    scf.if %127 {
      %c0_69 = arith.constant 0 : index
      %c0_70 = arith.constant 0 : index
      %128 = vector.load %arg10[%c0_69, %c0_70] : memref<8x4xf32, #tpu.memory_space<vmem>>, vector<8x4xf32>
      %129 = tpu.reciprocal %128 {approx = true} : vector<8x4xf32> -> vector<8x4xf32>
      %c0_71 = arith.constant 0 : index
      %c0_72 = arith.constant 0 : index
      %130 = vector.load %arg11[%c0_71, %c0_72] : memref<8x128xf32, #tpu.memory_space<vmem>>, vector<8x32xf32>
      %131 = vector.extract_strided_slice %129 {offsets = [0, 0], sizes = [8, 1], strides = [1, 1]} : vector<8x4xf32> to vector<8x1xf32>
      %132 = vector.broadcast %131 : vector<8x1xf32> to vector<8x32xf32>
      %133 = arith.mulf %130, %132 : vector<8x32xf32>
      %c0_73 = arith.constant 0 : index
      %c0_74 = arith.constant 0 : index
      %134 = vector.load %arg11[%c0_73, %c0_74] : memref<8x128xf32, #tpu.memory_space<vmem>>, vector<8x32xf32>
      tpu.vector_store %arg11[%c0_73, %c0_74], %133 {strides = array<i32>} : memref<8x128xf32, #tpu.memory_space<vmem>>, vector<8x32xf32>,
      %c0_75 = arith.constant 0 : index
      %c32_76 = arith.constant 32 : index
      %135 = vector.load %arg11[%c0_75, %c32_76] : memref<8x128xf32, #tpu.memory_space<vmem>>, vector<8x32xf32>
      %136 = vector.extract_strided_slice %129 {offsets = [0, 1], sizes = [8, 1], strides = [1, 1]} : vector<8x4xf32> to vector<8x1xf32>
      %137 = vector.broadcast %136 : vector<8x1xf32> to vector<8x32xf32>
      %138 = arith.mulf %135, %137 : vector<8x32xf32>
      %c0_77 = arith.constant 0 : index
      %c32_78 = arith.constant 32 : index
      %139 = vector.load %arg11[%c0_77, %c32_78] : memref<8x128xf32, #tpu.memory_space<vmem>>, vector<8x32xf32>
      tpu.vector_store %arg11[%c0_77, %c32_78], %138 {strides = array<i32>} : memref<8x128xf32, #tpu.memory_space<vmem>>, vector<8x32xf32>,
      %c0_79 = arith.constant 0 : index
      %c64_80 = arith.constant 64 : index
      %140 = vector.load %arg11[%c0_79, %c64_80] : memref<8x128xf32, #tpu.memory_space<vmem>>, vector<8x32xf32>
      %141 = vector.extract_strided_slice %129 {offsets = [0, 2], sizes = [8, 1], strides = [1, 1]} : vector<8x4xf32> to vector<8x1xf32>
      %142 = vector.broadcast %141 : vector<8x1xf32> to vector<8x32xf32>
      %143 = arith.mulf %140, %142 : vector<8x32xf32>
      %c0_81 = arith.constant 0 : index
      %c64_82 = arith.constant 64 : index
      %144 = vector.load %arg11[%c0_81, %c64_82] : memref<8x128xf32, #tpu.memory_space<vmem>>, vector<8x32xf32>
      tpu.vector_store %arg11[%c0_81, %c64_82], %143 {strides = array<i32>} : memref<8x128xf32, #tpu.memory_space<vmem>>, vector<8x32xf32>,
      %c0_83 = arith.constant 0 : index
      %c96_84 = arith.constant 96 : index
      %145 = vector.load %arg11[%c0_83, %c96_84] : memref<8x128xf32, #tpu.memory_space<vmem>>, vector<8x32xf32>
      %146 = vector.extract_strided_slice %129 {offsets = [0, 3], sizes = [8, 1], strides = [1, 1]} : vector<8x4xf32> to vector<8x1xf32>
      %147 = vector.broadcast %146 : vector<8x1xf32> to vector<8x32xf32>
      %148 = arith.mulf %145, %147 : vector<8x32xf32>
      %c0_85 = arith.constant 0 : index
      %c96_86 = arith.constant 96 : index
      %149 = vector.load %arg11[%c0_85, %c96_86] : memref<8x128xf32, #tpu.memory_space<vmem>>, vector<8x32xf32>
      tpu.vector_store %arg11[%c0_85, %c96_86], %148 {strides = array<i32>} : memref<8x128xf32, #tpu.memory_space<vmem>>, vector<8x32xf32>,
      %c0_87 = arith.constant 0 : index
      %c0_88 = arith.constant 0 : index
      %150 = vector.load %arg11[%c0_87, %c0_88] : memref<8x128xf32, #tpu.memory_space<vmem>>, vector<8x128xf32>
      %151 = arith.truncf %150 : vector<8x128xf32> to vector<8x128xbf16>
      %c0_89 = arith.constant 0 : index
      %c0_90 = arith.constant 0 : index
      %152 = vector.load %arg5[%c0_89, %c0_90] : memref<128x128xbf16, #tpu.memory_space<vmem>>, vector<128x128xbf16>
      %cst_91 = arith.constant dense<0.000000e+00> : vector<8x128xf32>
      %153 = tpu.matmul %151, %152, %cst_91 {dimension_numbers = #tpu.dot_dimension_numbers<[1], [0], [0], [1], [0, 0, 1, 1], [], []>} : vector<8x128xbf16>, vector<128x128xbf16>, vector<8x128xf32> -> vector<8x128xf32>
      %c0_92 = arith.constant 0 : index
      %c0_93 = arith.constant 0 : index
      %154 = vector.load %arg6[%c0_92, %c0_93] : memref<1x128xbf16, #tpu.memory_space<vmem>>, vector<1x128xbf16>
      %155 = arith.extf %154 : vector<1x128xbf16> to vector<1x128xf32>
      %156 = vector.broadcast %155 : vector<1x128xf32> to vector<8x128xf32>
      %157 = arith.addf %153, %156 : vector<8x128xf32>
      %c0_94 = arith.constant 0 : index
      %c0_95 = arith.constant 0 : index
      %c0_96 = arith.constant 0 : index
      %158 = vector.load %arg7[%c0_94, %c0_95, %c0_96] : memref<1x8x128xbf16, #tpu.memory_space<vmem>>, vector<1x8x128xbf16>
      %159 = vector.shape_cast %158 : vector<1x8x128xbf16> to vector<8x128xbf16>
      %160 = arith.extf %159 : vector<8x128xbf16> to vector<8x128xf32>
      %161 = arith.addf %157, %160 : vector<8x128xf32>
      %162 = arith.truncf %161 : vector<8x128xf32> to vector<8x128xbf16>
      %c0_97 = arith.constant 0 : index
      %c0_98 = arith.constant 0 : index
      %c0_99 = arith.constant 0 : index
      %163 = vector.load %arg8[%c0_97, %c0_98, %c0_99] : memref<1x8x128xbf16, #tpu.memory_space<vmem>>, vector<1x8x128xbf16>
      %164 = vector.shape_cast %163 : vector<1x8x128xbf16> to vector<8x128xbf16>
      %165 = vector.shape_cast %162 : vector<8x128xbf16> to vector<1x8x128xbf16>
      tpu.vector_store %arg8[%c0_97, %c0_98, %c0_99], %165 {strides = array<i32>} : memref<1x8x128xbf16, #tpu.memory_space<vmem>>, vector<1x8x128xbf16>,
    } else {
    }
    return
  }
  func.func @transform_0(%arg0: i32, %arg1: i32, %arg2: i32) -> (i32, i32, i32) {
    %c0_i32 = arith.constant 0 : i32
    %c0_i32_0 = arith.constant 0 : i32
    return %arg0, %arg1, %c0_i32 : i32, i32, i32
  }
  func.func @transform_1(%arg0: i32, %arg1: i32, %arg2: i32) -> (i32, i32, i32) {
    %c0_i32 = arith.constant 0 : i32
    %c0_i32_0 = arith.constant 0 : i32
    return %arg0, %arg2, %c0_i32 : i32, i32, i32
  }
  func.func @transform_2(%arg0: i32, %arg1: i32, %arg2: i32) -> (i32, i32) {
    %c0_i32 = arith.constant 0 : i32
    %c0_i32_0 = arith.constant 0 : i32
    %c0_i32_1 = arith.constant 0 : i32
    return %c0_i32, %c0_i32_0 : i32, i32
  }
  func.func @transform_3(%arg0: i32, %arg1: i32, %arg2: i32) -> (i32, i32) {
    %c0_i32 = arith.constant 0 : i32
    %c0_i32_0 = arith.constant 0 : i32
    %c0_i32_1 = arith.constant 0 : i32
    return %c0_i32, %c0_i32_0 : i32, i32
  }
  func.func @transform_4(%arg0: i32, %arg1: i32, %arg2: i32) -> (i32, i32, i32) {
    %c0_i32 = arith.constant 0 : i32
    %c0_i32_0 = arith.constant 0 : i32
    return %arg0, %arg1, %c0_i32 : i32, i32, i32
  }
  func.func @transform_5(%arg0: i32, %arg1: i32, %arg2: i32) -> (i32, i32, i32) {
    %c0_i32 = arith.constant 0 : i32
    %c0_i32_0 = arith.constant 0 : i32
    return %arg0, %arg1, %c0_i32 : i32, i32, i32
  }
}

module attributes {stable_mosaic.version = 11 : i64} {
  func.func @_ln_linear_kernel(%arg0: i32, %arg1: i32, %arg2: memref<16x128xbf16, #tpu.memory_space<vmem>>, %arg3: memref<1x128xbf16, #tpu.memory_space<vmem>>, %arg4: memref<1x128xbf16, #tpu.memory_space<vmem>>, %arg5: memref<128x128xbf16, #tpu.memory_space<vmem>>, %arg6: memref<1x128xbf16, #tpu.memory_space<vmem>>, %arg7: memref<16x128xbf16, #tpu.memory_space<vmem>>) attributes {dimension_semantics = [#tpu.dimension_semantics<parallel>, #tpu.dimension_semantics<parallel>], iteration_bounds = array<i64: 1, 1>, scalar_prefetch = 0 : i64, scratch_operands = 0 : i64, tpu.core_type = #tpu.core_type<tc>, window_params = [{transform_indices = @transform_0, window_bounds = array<i64: 16, 128>}, {pipeline_mode = #tpu.pipeline_mode<synchronous>, transform_indices = @transform_1, window_bounds = array<i64: 1, 128>}, {pipeline_mode = #tpu.pipeline_mode<synchronous>, transform_indices = @transform_2, window_bounds = array<i64: 1, 128>}, {transform_indices = @transform_3, window_bounds = array<i64: 128, 128>}, {transform_indices = @transform_4, window_bounds = array<i64: 1, 128>}, {transform_indices = @transform_5, window_bounds = array<i64: 16, 128>}]} {
    %c0 = arith.constant 0 : index
    %c0_0 = arith.constant 0 : index
    %0 = vector.load %arg2[%c0, %c0_0] : memref<16x128xbf16, #tpu.memory_space<vmem>>, vector<16x128xbf16>
    %c0_1 = arith.constant 0 : index
    %c0_2 = arith.constant 0 : index
    %1 = vector.load %arg3[%c0_1, %c0_2] : memref<1x128xbf16, #tpu.memory_space<vmem>>, vector<1x128xbf16>
    %c0_3 = arith.constant 0 : index
    %c0_4 = arith.constant 0 : index
    %2 = vector.load %arg4[%c0_3, %c0_4] : memref<1x128xbf16, #tpu.memory_space<vmem>>, vector<1x128xbf16>
    %3 = arith.extf %0 : vector<16x128xbf16> to vector<16x128xf32>
    %cst = arith.constant dense<0.000000e+00> : vector<16xf32>
    %4 = vector.multi_reduction <add>, %3, %cst [1] : vector<16x128xf32> to vector<16xf32>
    %5 = vector.shape_cast %4 : vector<16xf32> to vector<16x1xf32>
    %cst_5 = arith.constant 1.280000e+02 : f32
    %6 = vector.broadcast %cst_5 : f32 to vector<16x1xf32>
    %7 = arith.divf %5, %6 : vector<16x1xf32>
    %8 = vector.broadcast %7 : vector<16x1xf32> to vector<16x128xf32>
    %9 = arith.subf %3, %8 : vector<16x128xf32>
    %10 = arith.mulf %9, %9 : vector<16x128xf32>
    %cst_6 = arith.constant dense<0.000000e+00> : vector<16xf32>
    %11 = vector.multi_reduction <add>, %10, %cst_6 [1] : vector<16x128xf32> to vector<16xf32>
    %12 = vector.shape_cast %11 : vector<16xf32> to vector<16x1xf32>
    %cst_7 = arith.constant 1.280000e+02 : f32
    %13 = vector.broadcast %cst_7 : f32 to vector<16x1xf32>
    %14 = arith.divf %12, %13 : vector<16x1xf32>
    %15 = vector.broadcast %7 : vector<16x1xf32> to vector<16x128xf32>
    %16 = arith.subf %3, %15 : vector<16x128xf32>
    %cst_8 = arith.constant 9.99999974E-6 : f32
    %17 = vector.broadcast %cst_8 : f32 to vector<16x1xf32>
    %18 = arith.addf %14, %17 : vector<16x1xf32>
    %19 = math.rsqrt %18 : vector<16x1xf32>
    %20 = vector.broadcast %19 : vector<16x1xf32> to vector<16x128xf32>
    %21 = arith.mulf %16, %20 : vector<16x128xf32>
    %22 = arith.extf %1 : vector<1x128xbf16> to vector<1x128xf32>
    %23 = vector.broadcast %22 : vector<1x128xf32> to vector<16x128xf32>
    %24 = arith.mulf %21, %23 : vector<16x128xf32>
    %25 = arith.extf %2 : vector<1x128xbf16> to vector<1x128xf32>
    %26 = vector.broadcast %25 : vector<1x128xf32> to vector<16x128xf32>
    %27 = arith.addf %24, %26 : vector<16x128xf32>
    %28 = arith.truncf %27 : vector<16x128xf32> to vector<16x128xbf16>
    %c0_9 = arith.constant 0 : index
    %c0_10 = arith.constant 0 : index
    %29 = vector.load %arg5[%c0_9, %c0_10] : memref<128x128xbf16, #tpu.memory_space<vmem>>, vector<128x128xbf16>
    %cst_11 = arith.constant dense<0.000000e+00> : vector<16x128xf32>
    %30 = tpu.matmul %28, %29, %cst_11 {dimension_numbers = #tpu.dot_dimension_numbers<[1], [0], [0], [1], [0, 0, 1, 1], [], []>} : vector<16x128xbf16>, vector<128x128xbf16>, vector<16x128xf32> -> vector<16x128xf32>
    %c0_12 = arith.constant 0 : index
    %c0_13 = arith.constant 0 : index
    %31 = vector.load %arg6[%c0_12, %c0_13] : memref<1x128xbf16, #tpu.memory_space<vmem>>, vector<1x128xbf16>
    %32 = arith.extf %31 : vector<1x128xbf16> to vector<1x128xf32>
    %33 = vector.broadcast %32 : vector<1x128xf32> to vector<16x128xf32>
    %34 = arith.addf %30, %33 : vector<16x128xf32>
    %35 = arith.truncf %34 : vector<16x128xf32> to vector<16x128xbf16>
    %c0_14 = arith.constant 0 : index
    %c0_15 = arith.constant 0 : index
    %36 = vector.load %arg7[%c0_14, %c0_15] : memref<16x128xbf16, #tpu.memory_space<vmem>>, vector<16x128xbf16>
    tpu.vector_store %arg7[%c0_14, %c0_15], %35 {strides = array<i32>} : memref<16x128xbf16, #tpu.memory_space<vmem>>, vector<16x128xbf16>,
    return
  }
  func.func @transform_0(%arg0: i32, %arg1: i32) -> (i32, i32) {
    %c0_i32 = arith.constant 0 : i32
    %c0_i32_0 = arith.constant 0 : i32
    return %arg0, %c0_i32 : i32, i32
  }
  func.func @transform_1(%arg0: i32, %arg1: i32) -> (i32, i32) {
    %c0_i32 = arith.constant 0 : i32
    %c0_i32_0 = arith.constant 0 : i32
    %c0_i32_1 = arith.constant 0 : i32
    return %c0_i32, %c0_i32_0 : i32, i32
  }
  func.func @transform_2(%arg0: i32, %arg1: i32) -> (i32, i32) {
    %c0_i32 = arith.constant 0 : i32
    %c0_i32_0 = arith.constant 0 : i32
    %c0_i32_1 = arith.constant 0 : i32
    return %c0_i32, %c0_i32_0 : i32, i32
  }
  func.func @transform_3(%arg0: i32, %arg1: i32) -> (i32, i32) {
    %c0_i32 = arith.constant 0 : i32
    %c0_i32_0 = arith.constant 0 : i32
    return %c0_i32, %arg1 : i32, i32
  }
  func.func @transform_4(%arg0: i32, %arg1: i32) -> (i32, i32) {
    %c0_i32 = arith.constant 0 : i32
    %c0_i32_0 = arith.constant 0 : i32
    return %c0_i32, %arg1 : i32, i32
  }
  func.func @transform_5(%arg0: i32, %arg1: i32) -> (i32, i32) {
    %c0_i32 = arith.constant 0 : i32
    return %arg0, %arg1 : i32, i32
  }
}

module attributes {stable_mosaic.version = 11 : i64} {
  func.func @_matmul_kernel(%arg0: i32, %arg1: i32, %arg2: i32, %arg3: memref<16x128xbf16, #tpu.memory_space<vmem>>, %arg4: memref<128x256xbf16, #tpu.memory_space<vmem>>, %arg5: memref<1x256xbf16, #tpu.memory_space<vmem>>, %arg6: memref<16x256xbf16, #tpu.memory_space<vmem>>, %arg7: memref<16x256xf32, #tpu.memory_space<vmem>>) attributes {dimension_semantics = [#tpu.dimension_semantics<parallel>, #tpu.dimension_semantics<parallel>, #tpu.dimension_semantics<arbitrary>], iteration_bounds = array<i64: 1, 1, 1>, scalar_prefetch = 0 : i64, scratch_operands = 1 : i64, tpu.core_type = #tpu.core_type<tc>, window_params = [{transform_indices = @transform_0, window_bounds = array<i64: 16, 128>}, {transform_indices = @transform_1, window_bounds = array<i64: 128, 256>}, {transform_indices = @transform_2, window_bounds = array<i64: 1, 256>}, {transform_indices = @transform_3, window_bounds = array<i64: 16, 256>}]} {
    %c0_i32 = arith.constant 0 : i32
    %0 = arith.cmpi eq, %arg2, %c0_i32 : i32
    %1 = arith.extui %0 : i1 to i32
    %c0_i32_0 = arith.constant 0 : i32
    %2 = arith.cmpi ne, %1, %c0_i32_0 : i32
    scf.if %2 {
      %cst_10 = arith.constant 0.000000e+00 : f32
      %12 = vector.broadcast %cst_10 : f32 to vector<16x256xf32>
      %c0_11 = arith.constant 0 : index
      %c0_12 = arith.constant 0 : index
      %13 = vector.load %arg7[%c0_11, %c0_12] : memref<16x256xf32, #tpu.memory_space<vmem>>, vector<16x256xf32>
      tpu.vector_store %arg7[%c0_11, %c0_12], %12 {strides = array<i32>} : memref<16x256xf32, #tpu.memory_space<vmem>>, vector<16x256xf32>,
    } else {
    }
    %c0 = arith.constant 0 : index
    %c0_1 = arith.constant 0 : index
    %3 = vector.load %arg7[%c0, %c0_1] : memref<16x256xf32, #tpu.memory_space<vmem>>, vector<16x256xf32>
    %c0_2 = arith.constant 0 : index
    %c0_3 = arith.constant 0 : index
    %4 = vector.load %arg3[%c0_2, %c0_3] : memref<16x128xbf16, #tpu.memory_space<vmem>>, vector<16x128xbf16>
    %c0_4 = arith.constant 0 : index
    %c0_5 = arith.constant 0 : index
    %5 = vector.load %arg4[%c0_4, %c0_5] : memref<128x256xbf16, #tpu.memory_space<vmem>>, vector<128x256xbf16>
    %cst = arith.constant dense<0.000000e+00> : vector<16x256xf32>
    %6 = tpu.matmul %4, %5, %cst {dimension_numbers = #tpu.dot_dimension_numbers<[1], [0], [0], [1], [0, 0, 1, 1], [], []>} : vector<16x128xbf16>, vector<128x256xbf16>, vector<16x256xf32> -> vector<16x256xf32>
    %7 = arith.addf %3, %6 : vector<16x256xf32>
    %c0_6 = arith.constant 0 : index
    %c0_7 = arith.constant 0 : index
    %8 = vector.load %arg7[%c0_6, %c0_7] : memref<16x256xf32, #tpu.memory_space<vmem>>, vector<16x256xf32>
    tpu.vector_store %arg7[%c0_6, %c0_7], %7 {strides = array<i32>} : memref<16x256xf32, #tpu.memory_space<vmem>>, vector<16x256xf32>,
    %c0_i32_8 = arith.constant 0 : i32
    %9 = arith.cmpi eq, %arg2, %c0_i32_8 : i32
    %10 = arith.extui %9 : i1 to i32
    %c0_i32_9 = arith.constant 0 : i32
    %11 = arith.cmpi ne, %10, %c0_i32_9 : i32
    scf.if %11 {
      %c0_10 = arith.constant 0 : index
      %c0_11 = arith.constant 0 : index
      %12 = vector.load %arg7[%c0_10, %c0_11] : memref<16x256xf32, #tpu.memory_space<vmem>>, vector<16x256xf32>
      %c0_12 = arith.constant 0 : index
      %c0_13 = arith.constant 0 : index
      %13 = vector.load %arg5[%c0_12, %c0_13] : memref<1x256xbf16, #tpu.memory_space<vmem>>, vector<1x256xbf16>
      %14 = arith.extf %13 : vector<1x256xbf16> to vector<1x256xf32>
      %15 = vector.broadcast %14 : vector<1x256xf32> to vector<16x256xf32>
      %16 = arith.addf %12, %15 : vector<16x256xf32>
      %17 = arith.truncf %16 : vector<16x256xf32> to vector<16x256xbf16>
      %c0_14 = arith.constant 0 : index
      %c0_15 = arith.constant 0 : index
      %18 = vector.load %arg6[%c0_14, %c0_15] : memref<16x256xbf16, #tpu.memory_space<vmem>>, vector<16x256xbf16>
      tpu.vector_store %arg6[%c0_14, %c0_15], %17 {strides = array<i32>} : memref<16x256xbf16, #tpu.memory_space<vmem>>, vector<16x256xbf16>,
    } else {
    }
    return
  }
  func.func @transform_0(%arg0: i32, %arg1: i32, %arg2: i32) -> (i32, i32) {
    %c0_i32 = arith.constant 0 : i32
    return %arg0, %arg2 : i32, i32
  }
  func.func @transform_1(%arg0: i32, %arg1: i32, %arg2: i32) -> (i32, i32) {
    %c0_i32 = arith.constant 0 : i32
    return %arg2, %arg1 : i32, i32
  }
  func.func @transform_2(%arg0: i32, %arg1: i32, %arg2: i32) -> (i32, i32) {
    %c0_i32 = arith.constant 0 : i32
    %c0_i32_0 = arith.constant 0 : i32
    return %c0_i32, %arg1 : i32, i32
  }
  func.func @transform_3(%arg0: i32, %arg1: i32, %arg2: i32) -> (i32, i32) {
    %c0_i32 = arith.constant 0 : i32
    return %arg0, %arg1 : i32, i32
  }
}

module attributes {stable_mosaic.version = 11 : i64} {
  func.func @_matmul_residual_kernel(%arg0: i32, %arg1: i32, %arg2: i32, %arg3: memref<16x512xbf16, #tpu.memory_space<vmem>>, %arg4: memref<512x128xbf16, #tpu.memory_space<vmem>>, %arg5: memref<1x128xbf16, #tpu.memory_space<vmem>>, %arg6: memref<16x128xbf16, #tpu.memory_space<vmem>>, %arg7: memref<16x128xbf16, #tpu.memory_space<vmem>>, %arg8: memref<16x128xf32, #tpu.memory_space<vmem>>) attributes {dimension_semantics = [#tpu.dimension_semantics<parallel>, #tpu.dimension_semantics<parallel>, #tpu.dimension_semantics<arbitrary>], iteration_bounds = array<i64: 1, 1, 1>, scalar_prefetch = 0 : i64, scratch_operands = 1 : i64, tpu.core_type = #tpu.core_type<tc>, window_params = [{transform_indices = @transform_0, window_bounds = array<i64: 16, 512>}, {transform_indices = @transform_1, window_bounds = array<i64: 512, 128>}, {transform_indices = @transform_2, window_bounds = array<i64: 1, 128>}, {transform_indices = @transform_3, window_bounds = array<i64: 16, 128>}, {transform_indices = @transform_4, window_bounds = array<i64: 16, 128>}]} {
    %c0_i32 = arith.constant 0 : i32
    %0 = arith.cmpi eq, %arg2, %c0_i32 : i32
    %1 = arith.extui %0 : i1 to i32
    %c0_i32_0 = arith.constant 0 : i32
    %2 = arith.cmpi ne, %1, %c0_i32_0 : i32
    scf.if %2 {
      %cst_10 = arith.constant 0.000000e+00 : f32
      %12 = vector.broadcast %cst_10 : f32 to vector<16x128xf32>
      %c0_11 = arith.constant 0 : index
      %c0_12 = arith.constant 0 : index
      %13 = vector.load %arg8[%c0_11, %c0_12] : memref<16x128xf32, #tpu.memory_space<vmem>>, vector<16x128xf32>
      tpu.vector_store %arg8[%c0_11, %c0_12], %12 {strides = array<i32>} : memref<16x128xf32, #tpu.memory_space<vmem>>, vector<16x128xf32>,
    } else {
    }
    %c0 = arith.constant 0 : index
    %c0_1 = arith.constant 0 : index
    %3 = vector.load %arg8[%c0, %c0_1] : memref<16x128xf32, #tpu.memory_space<vmem>>, vector<16x128xf32>
    %c0_2 = arith.constant 0 : index
    %c0_3 = arith.constant 0 : index
    %4 = vector.load %arg3[%c0_2, %c0_3] : memref<16x512xbf16, #tpu.memory_space<vmem>>, vector<16x512xbf16>
    %c0_4 = arith.constant 0 : index
    %c0_5 = arith.constant 0 : index
    %5 = vector.load %arg4[%c0_4, %c0_5] : memref<512x128xbf16, #tpu.memory_space<vmem>>, vector<512x128xbf16>
    %cst = arith.constant dense<0.000000e+00> : vector<16x128xf32>
    %6 = tpu.matmul %4, %5, %cst {dimension_numbers = #tpu.dot_dimension_numbers<[1], [0], [0], [1], [0, 0, 1, 1], [], []>} : vector<16x512xbf16>, vector<512x128xbf16>, vector<16x128xf32> -> vector<16x128xf32>
    %7 = arith.addf %3, %6 : vector<16x128xf32>
    %c0_6 = arith.constant 0 : index
    %c0_7 = arith.constant 0 : index
    %8 = vector.load %arg8[%c0_6, %c0_7] : memref<16x128xf32, #tpu.memory_space<vmem>>, vector<16x128xf32>
    tpu.vector_store %arg8[%c0_6, %c0_7], %7 {strides = array<i32>} : memref<16x128xf32, #tpu.memory_space<vmem>>, vector<16x128xf32>,
    %c0_i32_8 = arith.constant 0 : i32
    %9 = arith.cmpi eq, %arg2, %c0_i32_8 : i32
    %10 = arith.extui %9 : i1 to i32
    %c0_i32_9 = arith.constant 0 : i32
    %11 = arith.cmpi ne, %10, %c0_i32_9 : i32
    scf.if %11 {
      %c0_10 = arith.constant 0 : index
      %c0_11 = arith.constant 0 : index
      %12 = vector.load %arg8[%c0_10, %c0_11] : memref<16x128xf32, #tpu.memory_space<vmem>>, vector<16x128xf32>
      %c0_12 = arith.constant 0 : index
      %c0_13 = arith.constant 0 : index
      %13 = vector.load %arg5[%c0_12, %c0_13] : memref<1x128xbf16, #tpu.memory_space<vmem>>, vector<1x128xbf16>
      %14 = arith.extf %13 : vector<1x128xbf16> to vector<1x128xf32>
      %15 = vector.broadcast %14 : vector<1x128xf32> to vector<16x128xf32>
      %16 = arith.addf %12, %15 : vector<16x128xf32>
      %c0_14 = arith.constant 0 : index
      %c0_15 = arith.constant 0 : index
      %17 = vector.load %arg6[%c0_14, %c0_15] : memref<16x128xbf16, #tpu.memory_space<vmem>>, vector<16x128xbf16>
      %18 = arith.extf %17 : vector<16x128xbf16> to vector<16x128xf32>
      %19 = arith.addf %16, %18 : vector<16x128xf32>
      %20 = arith.truncf %19 : vector<16x128xf32> to vector<16x128xbf16>
      %c0_16 = arith.constant 0 : index
      %c0_17 = arith.constant 0 : index
      %21 = vector.load %arg7[%c0_16, %c0_17] : memref<16x128xbf16, #tpu.memory_space<vmem>>, vector<16x128xbf16>
      tpu.vector_store %arg7[%c0_16, %c0_17], %20 {strides = array<i32>} : memref<16x128xbf16, #tpu.memory_space<vmem>>, vector<16x128xbf16>,
    } else {
    }
    return
  }
  func.func @transform_0(%arg0: i32, %arg1: i32, %arg2: i32) -> (i32, i32) {
    %c0_i32 = arith.constant 0 : i32
    return %arg0, %arg2 : i32, i32
  }
  func.func @transform_1(%arg0: i32, %arg1: i32, %arg2: i32) -> (i32, i32) {
    %c0_i32 = arith.constant 0 : i32
    return %arg2, %arg1 : i32, i32
  }
  func.func @transform_2(%arg0: i32, %arg1: i32, %arg2: i32) -> (i32, i32) {
    %c0_i32 = arith.constant 0 : i32
    %c0_i32_0 = arith.constant 0 : i32
    return %c0_i32, %arg1 : i32, i32
  }
  func.func @transform_3(%arg0: i32, %arg1: i32, %arg2: i32) -> (i32, i32) {
    %c0_i32 = arith.constant 0 : i32
    return %arg0, %arg1 : i32, i32
  }
  func.func @transform_4(%arg0: i32, %arg1: i32, %arg2: i32) -> (i32, i32) {
    %c0_i32 = arith.constant 0 : i32
    return %arg0, %arg1 : i32, i32
  }
}

module attributes {stable_mosaic.version = 11 : i64} {
  func.func @_ln_linear_kernel(%arg0: i32, %arg1: i32, %arg2: memref<16x128xbf16, #tpu.memory_space<vmem>>, %arg3: memref<1x128xbf16, #tpu.memory_space<vmem>>, %arg4: memref<1x128xbf16, #tpu.memory_space<vmem>>, %arg5: memref<128x512xbf16, #tpu.memory_space<vmem>>, %arg6: memref<1x512xbf16, #tpu.memory_space<vmem>>, %arg7: memref<16x512xbf16, #tpu.memory_space<vmem>>) attributes {dimension_semantics = [#tpu.dimension_semantics<parallel>, #tpu.dimension_semantics<parallel>], iteration_bounds = array<i64: 1, 1>, scalar_prefetch = 0 : i64, scratch_operands = 0 : i64, tpu.core_type = #tpu.core_type<tc>, window_params = [{transform_indices = @transform_0, window_bounds = array<i64: 16, 128>}, {pipeline_mode = #tpu.pipeline_mode<synchronous>, transform_indices = @transform_1, window_bounds = array<i64: 1, 128>}, {pipeline_mode = #tpu.pipeline_mode<synchronous>, transform_indices = @transform_2, window_bounds = array<i64: 1, 128>}, {transform_indices = @transform_3, window_bounds = array<i64: 128, 512>}, {transform_indices = @transform_4, window_bounds = array<i64: 1, 512>}, {transform_indices = @transform_5, window_bounds = array<i64: 16, 512>}]} {
    %c0 = arith.constant 0 : index
    %c0_0 = arith.constant 0 : index
    %0 = vector.load %arg2[%c0, %c0_0] : memref<16x128xbf16, #tpu.memory_space<vmem>>, vector<16x128xbf16>
    %c0_1 = arith.constant 0 : index
    %c0_2 = arith.constant 0 : index
    %1 = vector.load %arg3[%c0_1, %c0_2] : memref<1x128xbf16, #tpu.memory_space<vmem>>, vector<1x128xbf16>
    %c0_3 = arith.constant 0 : index
    %c0_4 = arith.constant 0 : index
    %2 = vector.load %arg4[%c0_3, %c0_4] : memref<1x128xbf16, #tpu.memory_space<vmem>>, vector<1x128xbf16>
    %3 = arith.extf %0 : vector<16x128xbf16> to vector<16x128xf32>
    %cst = arith.constant dense<0.000000e+00> : vector<16xf32>
    %4 = vector.multi_reduction <add>, %3, %cst [1] : vector<16x128xf32> to vector<16xf32>
    %5 = vector.shape_cast %4 : vector<16xf32> to vector<16x1xf32>
    %cst_5 = arith.constant 1.280000e+02 : f32
    %6 = vector.broadcast %cst_5 : f32 to vector<16x1xf32>
    %7 = arith.divf %5, %6 : vector<16x1xf32>
    %8 = vector.broadcast %7 : vector<16x1xf32> to vector<16x128xf32>
    %9 = arith.subf %3, %8 : vector<16x128xf32>
    %10 = arith.mulf %9, %9 : vector<16x128xf32>
    %cst_6 = arith.constant dense<0.000000e+00> : vector<16xf32>
    %11 = vector.multi_reduction <add>, %10, %cst_6 [1] : vector<16x128xf32> to vector<16xf32>
    %12 = vector.shape_cast %11 : vector<16xf32> to vector<16x1xf32>
    %cst_7 = arith.constant 1.280000e+02 : f32
    %13 = vector.broadcast %cst_7 : f32 to vector<16x1xf32>
    %14 = arith.divf %12, %13 : vector<16x1xf32>
    %15 = vector.broadcast %7 : vector<16x1xf32> to vector<16x128xf32>
    %16 = arith.subf %3, %15 : vector<16x128xf32>
    %cst_8 = arith.constant 9.99999974E-6 : f32
    %17 = vector.broadcast %cst_8 : f32 to vector<16x1xf32>
    %18 = arith.addf %14, %17 : vector<16x1xf32>
    %19 = math.rsqrt %18 : vector<16x1xf32>
    %20 = vector.broadcast %19 : vector<16x1xf32> to vector<16x128xf32>
    %21 = arith.mulf %16, %20 : vector<16x128xf32>
    %22 = arith.extf %1 : vector<1x128xbf16> to vector<1x128xf32>
    %23 = vector.broadcast %22 : vector<1x128xf32> to vector<16x128xf32>
    %24 = arith.mulf %21, %23 : vector<16x128xf32>
    %25 = arith.extf %2 : vector<1x128xbf16> to vector<1x128xf32>
    %26 = vector.broadcast %25 : vector<1x128xf32> to vector<16x128xf32>
    %27 = arith.addf %24, %26 : vector<16x128xf32>
    %28 = arith.truncf %27 : vector<16x128xf32> to vector<16x128xbf16>
    %c0_9 = arith.constant 0 : index
    %c0_10 = arith.constant 0 : index
    %29 = vector.load %arg5[%c0_9, %c0_10] : memref<128x512xbf16, #tpu.memory_space<vmem>>, vector<128x512xbf16>
    %cst_11 = arith.constant dense<0.000000e+00> : vector<16x512xf32>
    %30 = tpu.matmul %28, %29, %cst_11 {dimension_numbers = #tpu.dot_dimension_numbers<[1], [0], [0], [1], [0, 0, 1, 1], [], []>} : vector<16x128xbf16>, vector<128x512xbf16>, vector<16x512xf32> -> vector<16x512xf32>
    %c0_12 = arith.constant 0 : index
    %c0_13 = arith.constant 0 : index
    %31 = vector.load %arg6[%c0_12, %c0_13] : memref<1x512xbf16, #tpu.memory_space<vmem>>, vector<1x512xbf16>
    %32 = arith.extf %31 : vector<1x512xbf16> to vector<1x512xf32>
    %33 = vector.broadcast %32 : vector<1x512xf32> to vector<16x512xf32>
    %34 = arith.addf %30, %33 : vector<16x512xf32>
    %cst_14 = arith.constant 5.000000e-01 : f32
    %35 = vector.broadcast %cst_14 : f32 to vector<16x512xf32>
    %36 = arith.mulf %35, %34 : vector<16x512xf32>
    %cst_15 = arith.constant 4.471500e-02 : f32
    %37 = vector.broadcast %cst_15 : f32 to vector<16x512xf32>
    %38 = arith.mulf %37, %34 : vector<16x512xf32>
    %39 = arith.mulf %38, %34 : vector<16x512xf32>
    %40 = arith.mulf %39, %34 : vector<16x512xf32>
    %41 = arith.addf %34, %40 : vector<16x512xf32>
    %cst_16 = arith.constant 0.797884583 : f32
    %42 = vector.broadcast %cst_16 : f32 to vector<16x512xf32>
    %43 = arith.mulf %42, %41 : vector<16x512xf32>
    %44 = math.tanh %43 : vector<16x512xf32>
    %cst_17 = arith.constant 1.000000e+00 : f32
    %45 = vector.broadcast %cst_17 : f32 to vector<16x512xf32>
    %46 = arith.addf %45, %44 : vector<16x512xf32>
    %47 = arith.mulf %36, %46 : vector<16x512xf32>
    %48 = arith.truncf %47 : vector<16x512xf32> to vector<16x512xbf16>
    %c0_18 = arith.constant 0 : index
    %c0_19 = arith.constant 0 : index
    %49 = vector.load %arg7[%c0_18, %c0_19] : memref<16x512xbf16, #tpu.memory_space<vmem>>, vector<16x512xbf16>
    tpu.vector_store %arg7[%c0_18, %c0_19], %48 {strides = array<i32>} : memref<16x512xbf16, #tpu.memory_space<vmem>>, vector<16x512xbf16>,
    return
  }
  func.func @transform_0(%arg0: i32, %arg1: i32) -> (i32, i32) {
    %c0_i32 = arith.constant 0 : i32
    %c0_i32_0 = arith.constant 0 : i32
    return %arg0, %c0_i32 : i32, i32
  }
  func.func @transform_1(%arg0: i32, %arg1: i32) -> (i32, i32) {
    %c0_i32 = arith.constant 0 : i32
    %c0_i32_0 = arith.constant 0 : i32
    %c0_i32_1 = arith.constant 0 : i32
    return %c0_i32, %c0_i32_0 : i32, i32
  }
  func.func @transform_2(%arg0: i32, %arg1: i32) -> (i32, i32) {
    %c0_i32 = arith.constant 0 : i32
    %c0_i32_0 = arith.constant 0 : i32
    %c0_i32_1 = arith.constant 0 : i32
    return %c0_i32, %c0_i32_0 : i32, i32
  }
  func.func @transform_3(%arg0: i32, %arg1: i32) -> (i32, i32) {
    %c0_i32 = arith.constant 0 : i32
    %c0_i32_0 = arith.constant 0 : i32
    return %c0_i32, %arg1 : i32, i32
  }
  func.func @transform_4(%arg0: i32, %arg1: i32) -> (i32, i32) {
    %c0_i32 = arith.constant 0 : i32
    %c0_i32_0 = arith.constant 0 : i32
    return %c0_i32, %arg1 : i32, i32
  }
  func.func @transform_5(%arg0: i32, %arg1: i32) -> (i32, i32) {
    %c0_i32 = arith.constant 0 : i32
    return %arg0, %arg1 : i32, i32
  }
}

module attributes {stable_mosaic.version = 11 : i64} {
  func.func @_layernorm_kernel(%arg0: i32, %arg1: memref<16x128xbf16, #tpu.memory_space<vmem>>, %arg2: memref<1x128xbf16, #tpu.memory_space<vmem>>, %arg3: memref<1x128xbf16, #tpu.memory_space<vmem>>, %arg4: memref<16x128xbf16, #tpu.memory_space<vmem>>) attributes {dimension_semantics = [#tpu.dimension_semantics<parallel>], iteration_bounds = array<i64: 1>, scalar_prefetch = 0 : i64, scratch_operands = 0 : i64, tpu.core_type = #tpu.core_type<tc>, window_params = [{transform_indices = @transform_0, window_bounds = array<i64: 16, 128>}, {pipeline_mode = #tpu.pipeline_mode<synchronous>, transform_indices = @transform_1, window_bounds = array<i64: 1, 128>}, {pipeline_mode = #tpu.pipeline_mode<synchronous>, transform_indices = @transform_2, window_bounds = array<i64: 1, 128>}, {transform_indices = @transform_3, window_bounds = array<i64: 16, 128>}]} {
    %c0 = arith.constant 0 : index
    %c0_0 = arith.constant 0 : index
    %0 = vector.load %arg1[%c0, %c0_0] : memref<16x128xbf16, #tpu.memory_space<vmem>>, vector<16x128xbf16>
    %c0_1 = arith.constant 0 : index
    %c0_2 = arith.constant 0 : index
    %1 = vector.load %arg2[%c0_1, %c0_2] : memref<1x128xbf16, #tpu.memory_space<vmem>>, vector<1x128xbf16>
    %c0_3 = arith.constant 0 : index
    %c0_4 = arith.constant 0 : index
    %2 = vector.load %arg3[%c0_3, %c0_4] : memref<1x128xbf16, #tpu.memory_space<vmem>>, vector<1x128xbf16>
    %3 = arith.extf %0 : vector<16x128xbf16> to vector<16x128xf32>
    %cst = arith.constant dense<0.000000e+00> : vector<16xf32>
    %4 = vector.multi_reduction <add>, %3, %cst [1] : vector<16x128xf32> to vector<16xf32>
    %5 = vector.shape_cast %4 : vector<16xf32> to vector<16x1xf32>
    %cst_5 = arith.constant 1.280000e+02 : f32
    %6 = vector.broadcast %cst_5 : f32 to vector<16x1xf32>
    %7 = arith.divf %5, %6 : vector<16x1xf32>
    %8 = vector.broadcast %7 : vector<16x1xf32> to vector<16x128xf32>
    %9 = arith.subf %3, %8 : vector<16x128xf32>
    %10 = arith.mulf %9, %9 : vector<16x128xf32>
    %cst_6 = arith.constant dense<0.000000e+00> : vector<16xf32>
    %11 = vector.multi_reduction <add>, %10, %cst_6 [1] : vector<16x128xf32> to vector<16xf32>
    %12 = vector.shape_cast %11 : vector<16xf32> to vector<16x1xf32>
    %cst_7 = arith.constant 1.280000e+02 : f32
    %13 = vector.broadcast %cst_7 : f32 to vector<16x1xf32>
    %14 = arith.divf %12, %13 : vector<16x1xf32>
    %15 = vector.broadcast %7 : vector<16x1xf32> to vector<16x128xf32>
    %16 = arith.subf %3, %15 : vector<16x128xf32>
    %cst_8 = arith.constant 9.99999974E-6 : f32
    %17 = vector.broadcast %cst_8 : f32 to vector<16x1xf32>
    %18 = arith.addf %14, %17 : vector<16x1xf32>
    %19 = math.rsqrt %18 : vector<16x1xf32>
    %20 = vector.broadcast %19 : vector<16x1xf32> to vector<16x128xf32>
    %21 = arith.mulf %16, %20 : vector<16x128xf32>
    %22 = arith.extf %1 : vector<1x128xbf16> to vector<1x128xf32>
    %23 = vector.broadcast %22 : vector<1x128xf32> to vector<16x128xf32>
    %24 = arith.mulf %21, %23 : vector<16x128xf32>
    %25 = arith.extf %2 : vector<1x128xbf16> to vector<1x128xf32>
    %26 = vector.broadcast %25 : vector<1x128xf32> to vector<16x128xf32>
    %27 = arith.addf %24, %26 : vector<16x128xf32>
    %28 = arith.truncf %27 : vector<16x128xf32> to vector<16x128xbf16>
    %c0_9 = arith.constant 0 : index
    %c0_10 = arith.constant 0 : index
    %29 = vector.load %arg4[%c0_9, %c0_10] : memref<16x128xbf16, #tpu.memory_space<vmem>>, vector<16x128xbf16>
    tpu.vector_store %arg4[%c0_9, %c0_10], %28 {strides = array<i32>} : memref<16x128xbf16, #tpu.memory_space<vmem>>, vector<16x128xbf16>,
    return
  }
  func.func @transform_0(%arg0: i32) -> (i32, i32) {
    %c0_i32 = arith.constant 0 : i32
    %c0_i32_0 = arith.constant 0 : i32
    return %arg0, %c0_i32 : i32, i32
  }
  func.func @transform_1(%arg0: i32) -> (i32, i32) {
    %c0_i32 = arith.constant 0 : i32
    %c0_i32_0 = arith.constant 0 : i32
    %c0_i32_1 = arith.constant 0 : i32
    return %c0_i32, %c0_i32_0 : i32, i32
  }
  func.func @transform_2(%arg0: i32) -> (i32, i32) {
    %c0_i32 = arith.constant 0 : i32
    %c0_i32_0 = arith.constant 0 : i32
    %c0_i32_1 = arith.constant 0 : i32
    return %c0_i32, %c0_i32_0 : i32, i32
  }
  func.func @transform_3(%arg0: i32) -> (i32, i32) {
    %c0_i32 = arith.constant 0 : i32
    %c0_i32_0 = arith.constant 0 : i32
    return %arg0, %c0_i32 : i32, i32
  }
}

</mosaic_0001>

<bundles_post_ra>
// kernel: cross_attention_forward.16
= control target key start
LH: loop header
LB: loop body
LE: loop exit
PB: predicated region body
PF: predicated region fallthrough
CT: control target
= control target key end

     0   :  { %v138_v0 = vmov 0.0   ;;  %vm139_vm0 = vmmov 0   ;;  %vm38_vm1 = vcmask 130048   ;;  %v94_v3 = vlaneseq  ;;  %s172_s1 = inlined_call_operand.vmem [shape: bf16[16,128], index: 1, kind: input, shape index: {}]   ;;  %s173_s0 = inlined_call_operand.vmem [shape: bf16[16,16], index: 0, kind: input, shape index: {}]   ;;  %s174_s2 = inlined_call_operand.vmem [shape: bf16[1,128], index: 2, kind: input, shape index: {}]   ;;  %s175_s3 = inlined_call_operand.vmem [shape: bf16[16,128], index: 3, kind: output, shape index: {}]  }
   0x1   :  { %128 = vmatprep.subr.bf16.mxu0 %v138_v0  ;;  %v136_v1 = vld [vmem:[%s172_s1] sm:$0xff]   ;;  %130 = vmatprep.mubr.msk.bf16.mxu0 %vm139_vm0, %v138_v0 }
   0x2   :  { %v137_v2 = vld [vmem:[%s173_s0] sm:$0xff]   ;;  %129 = vmatpush3.bf16.msra.mxu0 %v136_v1  ;;  %v95_v4 = vshrl.u32 %v94_v3, 7 }
   0x3   :  { %v92_v5 = vld [vmem:[%s174_s2] sm:$0x1] }
   0x4   :  { %v93_v6 = vunpack.c.l.bf16 %v92_v5  ;;  %v96_v7 = vsub.s32 0, %v95_v4 }
   0x5   :  { %131 = vmatmul.mubr.msk.bf16.vlgmr.msra.gmra.mrb[0].mxu0 %vm38_vm1, %v137_v2 }
   0x6   :  { %v97_v8 = vrot.slane %v93_v6, %v96_v7 }
  0xd8   :  { %v76_v9 = vpop.f32.mrb[0].mxu0 }
  0xd9   :  { %v132_v10 = vpop.f32.mrb[1].mxu0  ;;  %v98_v12 = vadd.f32 %v97_v8, %v76_v9 }
  0xda   :  { %v79_v11 = vpop.f32.mrb[2].mxu0 }
  0xdb   :  { %v99_v13 = vadd.f32 %v97_v8, %v79_v11  ;;  %v133_v14 = vpop.f32.mrb[3].mxu0 }
  0xdd   :  { %v124_v15 = vpack.c.bf16 %v99_v13, %v98_v12 }
  0xdf   :  { %125 = vst [vmem:[%s175_s3] sm:$0xff] %v124_v15  }

// kernel: cross_attention_forward.17
= control target key start
LH: loop header
LB: loop body
LE: loop exit
PB: predicated region body
PF: predicated region fallthrough
CT: control target
= control target key end

     0   :  { %v471_v4 = vmov 0.0   ;;  %v472_v31 = vmov 0   ;;  %vm473_vm0 = vmmov 0   ;;  %v51_v41 = vlaneseq  ;;  %s619_s0 = inlined_call_operand.vmem [shape: bf16[16,128], index: 0, kind: input, shape index: {}]   ;;  %s620_s3 = inlined_call_operand.vmem [shape: bf16[128,384], index: 3, kind: input, shape index: {}]   ;;  %s621_s1 = inlined_call_operand.vmem [shape: bf16[1,128], index: 1, kind: input, shape index: {}]   ;;  %s622_s2 = inlined_call_operand.vmem [shape: bf16[1,128], index: 2, kind: input, shape index: {}]   ;;  %s623_s4 = inlined_call_operand.vmem [shape: bf16[1,384], index: 4, kind: input, shape index: {}]   ;;  %s624_s5 = inlined_call_operand.vmem [shape: bf16[16,384], index: 5, kind: output, shape index: {}]  }
   0x1   :  { %v400_v0 = vld [vmem:[%s619_s0] sm:$0xff]   ;;  %412 = vmatprep.subr.bf16.mxu1 %v471_v4  ;;  %v438_v6 = vld [vmem:[%s620_s3 + $0x8] ss:$12 sps:$4 sm:$0xff]   ;;  %v445_v19 = vld [vmem:[%s620_s3 + $0x30] ss:$12 sps:$4 sm:$0xff]   ;;  %287 = vmatprep.mubr.bf16.mxu0 %v472_v31 }
   0x2   :  { %v401_v1 = vunpack.c.l.bf16 %v400_v0  ;;  %v402_v2 = vunpack.c.h.bf16 %v400_v0  ;;  %v435_v3 = vld [vmem:[%s620_s3 + $0x4] ss:$12 sps:$4 sm:$0xff]   ;;  %v437_v5 = vld [vmem:[%s620_s3] ss:$12 sps:$4 sm:$0xff]   ;;  %v439_v7 = vld [vmem:[%s620_s3 + $0x1c] ss:$12 sps:$4 sm:$0xff]   ;;  %413 = vmatpush3.bf16.msra.mxu1 %v438_v6  ;;  %428 = vmatprep.mubr.msk.bf16.mxu1 %vm473_vm0, %v471_v4 }
   0x3   :  { %255 = vmatprep.subr.bf16.mxu0 %v435_v3  ;;  %414 = vmatprep.subr.bf16.mxu1 %v471_v4  ;;  %v441_v16 = vld [vmem:[%s620_s3 + $0x18] ss:$12 sps:$4 sm:$0xff]   ;;  %v442_v17 = vld [vmem:[%s620_s3 + $0x20] ss:$12 sps:$4 sm:$0xff]   ;;  %v449_v22 = vld [vmem:[%s620_s3 + $0x48] ss:$12 sps:$4 sm:$0xff]  }
   0x4   :  { %27 = vadd.xlane.f32.xlu0 %v401_v1  ;;  %256 = vmatpush1.bf16.msra.mxu0 %v437_v5  ;;  %v443_v18 = vld [vmem:[%s620_s3 + $0x34] ss:$12 sps:$4 sm:$0xff]   ;;  %v446_v20 = vld [vmem:[%s620_s3 + $0x38] ss:$12 sps:$4 sm:$0xff]   ;;  %v450_v23 = vld [vmem:[%s620_s3 + $0x50] ss:$12 sps:$4 sm:$0xff]  }
   0x5   :  { %257 = vmatprep.subr.bf16.mxu0 %v439_v7  ;;  %v447_v21 = vld [vmem:[%s620_s3 + $0x4c] ss:$12 sps:$4 sm:$0xff]   ;;  %v451_v24 = vld [vmem:[%s620_s3 + $0x64] ss:$12 sps:$4 sm:$0xff]   ;;  %v454_v26 = vld [vmem:[%s620_s3 + $0x68] ss:$12 sps:$4 sm:$0xff]  }
   0x6   :  { %415 = vmatpush3.bf16.msra.mxu1 %v442_v17  ;;  %v453_v25 = vld [vmem:[%s620_s3 + $0x60] ss:$12 sps:$4 sm:$0xff]   ;;  %v455_v27 = vld [vmem:[%s620_s3 + $0x7c] ss:$12 sps:$4 sm:$0xff]   ;;  %v457_v28 = vld [vmem:[%s620_s3 + $0x78] ss:$12 sps:$4 sm:$0xff]  }
   0x7   :  { %416 = vmatprep.subr.bf16.mxu1 %v471_v4  ;;  %v458_v29 = vld [vmem:[%s620_s3 + $0x80] ss:$12 sps:$4 sm:$0xff]   ;;  %v461_v32 = vld [vmem:[%s620_s3 + $0x90] ss:$12 sps:$4 sm:$0xff]   ;;  %v462_v33 = vld [vmem:[%s620_s3 + $0x98] ss:$12 sps:$4 sm:$0xff]  }
   0x8   :  { %29 = vadd.xlane.f32.xlu0 %v402_v2  ;;  %258 = vmatpush1.bf16.msra.mxu0 %v441_v16  ;;  %v459_v30 = vld [vmem:[%s620_s3 + $0x94] ss:$12 sps:$4 sm:$0xff]   ;;  %v463_v34 = vld [vmem:[%s620_s3 + $0xac] ss:$12 sps:$4 sm:$0xff]   ;;  %v466_v36 = vld [vmem:[%s620_s3 + $0xb0] ss:$12 sps:$4 sm:$0xff]  }
   0x9   :  { %259 = vmatprep.subr.bf16.mxu0 %v443_v18  ;;  %v465_v35 = vld [vmem:[%s620_s3 + $0xa8] ss:$12 sps:$4 sm:$0xff]   ;;  %v52_v44 = vshrl.u32 %v51_v41, 7  ;;  %v23_v45 = vld [vmem:[%s621_s1] sm:$0x1] }
   0xa   :  { %417 = vmatpush3.bf16.msra.mxu1 %v446_v20  ;;  %v50_v46 = vunpack.c.l.bf16 %v23_v45  ;;  %v24_v48 = vld [vmem:[%s622_s2] sm:$0x1] }
   0xb   :  { %418 = vmatprep.subr.bf16.mxu1 %v471_v4  ;;  %v53_v47 = vsub.s32 0, %v52_v44  ;;  %v57_v52 = vunpack.c.l.bf16 %v24_v48  ;;  %v97_v61 = vld [vmem:[%s623_s4] sm:$0x7]  ;;  %v110_v63 = vsub.s32 4, %v52_v44  ;;  %v106_v0 = vsub.s32 2, %v52_v44 }
   0xc   :  { %260 = vmatpush1.bf16.msra.mxu0 %v445_v19  ;;  %v98_v62 = vunpack.c.l.bf16 %v97_v61 }
   0xd   :  { %261 = vmatprep.subr.bf16.mxu0 %v447_v21  ;;  %v54_v51 = vrot.slane %v50_v46, %v53_v47  ;;  %v61_v56 = vrot.slane %v57_v52, %v53_v47 }
   0xe   :  { %419 = vmatpush3.bf16.msra.mxu1 %v450_v23  ;;  %v107_v3 = vrot.slane %v98_v62, %v106_v0 }
   0xf   :  { %420 = vmatprep.subr.bf16.mxu1 %v471_v4 }
  0x10   :  { %262 = vmatpush1.bf16.msra.mxu0 %v449_v22  ;;  %v122_v6 = vrot.slane %v107_v3, %v53_v47 }
  0x11   :  { %263 = vmatprep.subr.bf16.mxu0 %v451_v24 }
  0x12   :  { %421 = vmatpush3.bf16.msra.mxu1 %v454_v26 }
  0x13   :  { %422 = vmatprep.subr.bf16.mxu1 %v471_v4 }
  0x14   :  { %264 = vmatpush1.bf16.msra.mxu0 %v453_v25 }
  0x15   :  { %265 = vmatprep.subr.bf16.mxu0 %v455_v27 }
  0x16   :  { %423 = vmatpush3.bf16.msra.mxu1 %v458_v29 }
  0x17   :  { %424 = vmatprep.subr.bf16.mxu1 %v471_v4 }
  0x18   :  { %266 = vmatpush1.bf16.msra.mxu0 %v457_v28 }
  0x19   :  { %267 = vmatprep.subr.bf16.mxu0 %v459_v30 }
  0x1a   :  { %425 = vmatpush3.bf16.msra.mxu1 %v462_v33 }
  0x1b   :  { %426 = vmatprep.subr.bf16.mxu1 %v471_v4 }
  0x1c   :  { %268 = vmatpush1.bf16.msra.mxu0 %v461_v32 }
  0x1d   :  { %269 = vmatprep.subr.bf16.mxu0 %v463_v34 }
  0x1e   :  { %427 = vmatpush3.bf16.msra.mxu1 %v466_v36 }
  0x20   :  { %270 = vmatpush1.bf16.msra.mxu0 %v465_v35 }
  0x91   :  { %v28_v8 = vpop.xlane.xlu0 %27 }
  0x92   :  { %v32_v9 = vmul.f32 0.0078125, %v28_v8 }
  0x94   :  { %v521_v10 = vsub.f32 %v401_v1, %v32_v9  ;;  %v103_v1 = vrot.slane %v98_v62, %v53_v47 }
  0x95   :  { %v30_v11 = vpop.xlane.xlu0 %29 }
  0x96   :  { %v33_v12 = vmul.f32 0.0078125, %v30_v11  ;;  %v36_v13 = vmul.f32 %v521_v10, %v521_v10  ;;  %v118_v4 = vrot.slane %v103_v1, %v53_v47 }
  0x98   :  { %v525_v14 = vsub.f32 %v402_v2, %v33_v12  ;;  %38 = vadd.xlane.f32.xlu1 %v36_v13  ;;  %v111_v2 = vrot.slane %v98_v62, %v110_v63 }
  0x9a   :  { %v37_v15 = vmul.f32 %v525_v14, %v525_v14  ;;  %v126_v5 = vrot.slane %v111_v2, %v53_v47 }
  0x9c   :  { %40 = vadd.xlane.f32.xlu1 %v37_v15 }
 0x125   :  { %v39_v37 = vpop.xlane.xlu1 %38 }
 0x126   :  { %v42_v38 = vmul.f32 0.0078125, %v39_v37 }
 0x128   :  { %v44_v39 = vadd.f32 1e-05, %v42_v38 }
 0x129   :  { %v41_v40 = vpop.xlane.xlu1 %40 }
 0x12a   :  { %467 = vrsqrt.f32 %v44_v39  ;;  %v43_v42 = vmul.f32 0.0078125, %v41_v40 }
 0x12c   :  { %v45_v43 = vadd.f32 1e-05, %v43_v42 }
 0x12e   :  { %469 = vrsqrt.f32 %v45_v43 }
 0x134   :  { %v468_v49 = vpop.eup %467 }
 0x135   :  { %v48_v50 = vmul.f32 %v468_v49, %v521_v10 }
 0x137   :  { %v55_v55 = vmul.f32 %v54_v51, %v48_v50 }
 0x138   :  { %v470_v53 = vpop.eup %469 }
 0x139   :  { %v49_v54 = vmul.f32 %v470_v53, %v525_v14  ;;  %v62_v58 = vadd.f32 %v61_v56, %v55_v55 }
 0x13b   :  { %v56_v57 = vmul.f32 %v54_v51, %v49_v54 }
 0x13d   :  { %v63_v59 = vadd.f32 %v61_v56, %v56_v57 }
 0x13f   :  { %v64_v60 = vpack.c.bf16 %v63_v59, %v62_v58 }
 0x141   :  { %288 = vmatmul.mubr.bf16.vlgmr.msra.gmra.mrb[0].mxu0 %v64_v60  ;;  %429 = vmatmul.mubr.bf16.vlgmr.msra.gmra.mrb[0].mxu1 %v64_v60 }
 0x214   :  { %v289_v7 = vpop.f32.mrb[0].mxu0  ;;  %v332_v8 = vpop.f32.mrb[0].mxu1 }
 0x215   :  { %v290_v9 = vadd.f32 %v289_v7, %v118_v4  ;;  %v333_v10 = vadd.f32 %v332_v8, %v126_v5  ;;  %v291_v11 = vpop.f32.mrb[1].mxu0  ;;  %v430_v12 = vpop.f32.mrb[1].mxu1 }
 0x216   :  { %v292_v13 = vadd.f32 %v291_v11, %v122_v6  ;;  %v293_v14 = vpop.f32.mrb[2].mxu0  ;;  %v335_v15 = vpop.f32.mrb[2].mxu1 }
 0x217   :  { %v396_v16 = vpack.c.bf16 %v333_v10, %v333_v10  ;;  %v294_v17 = vadd.f32 %v293_v14, %v118_v4  ;;  %v336_v18 = vadd.f32 %v335_v15, %v126_v5  ;;  %v295_v19 = vpop.f32.mrb[3].mxu0  ;;  %v431_v20 = vpop.f32.mrb[3].mxu1 }
 0x218   :  { %v395_v21 = vpack.c.bf16 %v292_v13, %v290_v9  ;;  %v296_v22 = vadd.f32 %v295_v19, %v122_v6 }
 0x219   :  { %360 = vst [vmem:[%s624_s5 + $0x8] sm:$0xf] %v396_v16  ;;  %v398_v23 = vpack.c.bf16 %v336_v18, %v336_v18 }
 0x21a   :  { %359 = vst [vmem:[%s624_s5] sm:$0xff] %v395_v21  ;;  %v397_v24 = vpack.c.bf16 %v296_v22, %v294_v17 }
 0x21b   :  { %362 = vst [vmem:[%s624_s5 + $0x14] sm:$0xf] %v398_v23 }
 0x21c   :  { %361 = vst [vmem:[%s624_s5 + $0xc] sm:$0xff] %v397_v24 }

// kernel: cross_attention_forward.19
= control target key start
LH: loop header
LB: loop body
LE: loop exit
PB: predicated region body
PF: predicated region fallthrough
CT: control target
= control target key end

     0   :  { %v254_v3 = vmov 0.0   ;;  %vm255_vm0 = vmmov 0   ;;  %v51_v24 = vlaneseq  ;;  %s325_s0 = inlined_call_operand.vmem [shape: bf16[16,128], index: 0, kind: input, shape index: {}]   ;;  %s326_s3 = inlined_call_operand.vmem [shape: bf16[128,128], index: 3, kind: input, shape index: {}]   ;;  %s327_s1 = inlined_call_operand.vmem [shape: bf16[1,128], index: 1, kind: input, shape index: {}]   ;;  %s328_s2 = inlined_call_operand.vmem [shape: bf16[1,128], index: 2, kind: input, shape index: {}]   ;;  %s329_s4 = inlined_call_operand.vmem [shape: bf16[1,128], index: 4, kind: input, shape index: {}]   ;;  %s330_s5 = inlined_call_operand.vmem [shape: bf16[16,128], index: 5, kind: output, shape index: {}]  }
   0x1   :  { %v203_v0 = vld [vmem:[%s325_s0] sm:$0xff]   ;;  %220 = vmatprep.subr.bf16.mxu0 %v254_v3  ;;  %v243_v13 = vld [vmem:[%s326_s3 + $0x8] sm:$0xff]   ;;  %v244_v14 = vld [vmem:[%s326_s3 + $0x10] sm:$0xff]   ;;  %236 = vmatprep.mubr.msk.bf16.mxu0 %vm255_vm0, %v254_v3 }
   0x2   :  { %v204_v1 = vunpack.c.l.bf16 %v203_v0  ;;  %v205_v2 = vunpack.c.h.bf16 %v203_v0  ;;  %v242_v4 = vld [vmem:[%s326_s3] sm:$0xff]   ;;  %v245_v15 = vld [vmem:[%s326_s3 + $0x18] sm:$0xff]   ;;  %v247_v17 = vld [vmem:[%s326_s3 + $0x28] sm:$0xff]   ;;  %v52_v27 = vshrl.u32 %v51_v24, 7 }
   0x3   :  { %221 = vmatpush3.bf16.msra.mxu0 %v242_v4  ;;  %v246_v16 = vld [vmem:[%s326_s3 + $0x20] sm:$0xff]   ;;  %v248_v18 = vld [vmem:[%s326_s3 + $0x30] sm:$0xff]   ;;  %v249_v19 = vld [vmem:[%s326_s3 + $0x38] sm:$0xff]  }
   0x4   :  { %27 = vadd.xlane.f32.xlu0 %v204_v1  ;;  %222 = vmatprep.subr.bf16.mxu0 %v254_v3  ;;  %v23_v28 = vld [vmem:[%s327_s1] sm:$0x1]  ;;  %v53_v30 = vsub.s32 0, %v52_v27 }
   0x5   :  { %v50_v29 = vunpack.c.l.bf16 %v23_v28  ;;  %v24_v31 = vld [vmem:[%s328_s2] sm:$0x1] }
   0x6   :  { %v57_v35 = vunpack.c.l.bf16 %v24_v31  ;;  %v81_v44 = vld [vmem:[%s329_s4] sm:$0x1] }
   0x7   :  { %223 = vmatpush3.bf16.msra.mxu0 %v243_v13  ;;  %v54_v34 = vrot.slane %v50_v29, %v53_v30  ;;  %v82_v45 = vunpack.c.l.bf16 %v81_v44 }
   0x8   :  { %29 = vadd.xlane.f32.xlu0 %v205_v2  ;;  %224 = vmatprep.subr.bf16.mxu0 %v254_v3  ;;  %v61_v39 = vrot.slane %v57_v35, %v53_v30 }
   0x9   :  { %v86_v46 = vrot.slane %v82_v45, %v53_v30 }
   0xb   :  { %225 = vmatpush3.bf16.msra.mxu0 %v244_v14 }
   0xc   :  { %226 = vmatprep.subr.bf16.mxu0 %v254_v3 }
   0xf   :  { %227 = vmatpush3.bf16.msra.mxu0 %v245_v15 }
  0x10   :  { %228 = vmatprep.subr.bf16.mxu0 %v254_v3 }
  0x13   :  { %229 = vmatpush3.bf16.msra.mxu0 %v246_v16 }
  0x14   :  { %230 = vmatprep.subr.bf16.mxu0 %v254_v3 }
  0x17   :  { %231 = vmatpush3.bf16.msra.mxu0 %v247_v17 }
  0x18   :  { %232 = vmatprep.subr.bf16.mxu0 %v254_v3 }
  0x1b   :  { %233 = vmatpush3.bf16.msra.mxu0 %v248_v18 }
  0x1c   :  { %234 = vmatprep.subr.bf16.mxu0 %v254_v3 }
  0x1f   :  { %235 = vmatpush3.bf16.msra.mxu0 %v249_v19 }
  0x91   :  { %v28_v5 = vpop.xlane.xlu0 %27 }
  0x92   :  { %v32_v6 = vmul.f32 0.0078125, %v28_v5 }
  0x94   :  { %v34_v7 = vsub.f32 %v204_v1, %v32_v6 }
  0x95   :  { %v30_v8 = vpop.xlane.xlu0 %29 }
  0x96   :  { %v33_v9 = vmul.f32 0.0078125, %v30_v8  ;;  %v36_v10 = vmul.f32 %v34_v7, %v34_v7 }
  0x98   :  { %v35_v11 = vsub.f32 %v205_v2, %v33_v9  ;;  %38 = vadd.xlane.f32.xlu1 %v36_v10 }
  0x9a   :  { %v37_v12 = vmul.f32 %v35_v11, %v35_v11 }
  0x9c   :  { %40 = vadd.xlane.f32.xlu1 %v37_v12 }
 0x125   :  { %v39_v20 = vpop.xlane.xlu1 %38 }
 0x126   :  { %v42_v21 = vmul.f32 0.0078125, %v39_v20 }
 0x128   :  { %v44_v22 = vadd.f32 1e-05, %v42_v21 }
 0x129   :  { %v41_v23 = vpop.xlane.xlu1 %40 }
 0x12a   :  { %250 = vrsqrt.f32 %v44_v22  ;;  %v43_v25 = vmul.f32 0.0078125, %v41_v23 }
 0x12c   :  { %v45_v26 = vadd.f32 1e-05, %v43_v25 }
 0x12e   :  { %252 = vrsqrt.f32 %v45_v26 }
 0x134   :  { %v251_v32 = vpop.eup %250 }
 0x135   :  { %v48_v33 = vmul.f32 %v251_v32, %v34_v7 }
 0x137   :  { %v55_v38 = vmul.f32 %v54_v34, %v48_v33 }
 0x138   :  { %v253_v36 = vpop.eup %252 }
 0x139   :  { %v49_v37 = vmul.f32 %v253_v36, %v35_v11  ;;  %v62_v41 = vadd.f32 %v61_v39, %v55_v38 }
 0x13b   :  { %v56_v40 = vmul.f32 %v54_v34, %v49_v37 }
 0x13d   :  { %v63_v42 = vadd.f32 %v61_v39, %v56_v40 }
 0x13f   :  { %v64_v43 = vpack.c.bf16 %v63_v42, %v62_v41 }
 0x141   :  { %237 = vmatmul.mubr.bf16.vlgmr.msra.gmra.mrb[0].mxu0 %v64_v43 }
 0x214   :  { %v169_v47 = vpop.f32.mrb[0].mxu0 }
 0x215   :  { %v170_v48 = vadd.f32 %v169_v47, %v86_v46  ;;  %v238_v49 = vpop.f32.mrb[1].mxu0 }
 0x216   :  { %v172_v50 = vpop.f32.mrb[2].mxu0 }
 0x217   :  { %v173_v51 = vadd.f32 %v172_v50, %v86_v46  ;;  %v239_v52 = vpop.f32.mrb[3].mxu0 }
 0x219   :  { %v209_v53 = vpack.c.bf16 %v173_v51, %v170_v48 }
 0x21b   :  { %210 = vst [vmem:[%s330_s5] sm:$0xff] %v209_v53  }

// kernel: cross_attention_forward.18
= control target key start
LH: loop header
LB: loop body
LE: loop exit
PB: predicated region body
PF: predicated region fallthrough
CT: control target
= control target key end

     0   :  { %s1414_s18 = smov 0   ;;  %s1416_s19 = smov 0   ;;  %s1640_s0 = inlined_call_operand.vmem [shape: bf16[2,8,128], index: 0, kind: input, shape index: {}]   ;;  %s1641_s1 = inlined_call_operand.vmem [shape: bf16[2,8,256], index: 1, kind: input, shape index: {}]   ;;  %s1642_s2 = inlined_call_operand.vmem [shape: bf16[128,128], index: 2, kind: input, shape index: {}]   ;;  %s1643_s3 = inlined_call_operand.vmem [shape: bf16[1,128], index: 3, kind: input, shape index: {}]   ;;  %s1644_s4 = inlined_call_operand.vmem [shape: bf16[2,8,128], index: 4, kind: input, shape index: {}]   ;;  %s1645_s5 = inlined_call_operand.vmem [shape: bf16[2,8,128], index: 5, kind: output, shape index: {}]  }
   0x1   :  { %s1418_s20 = smov 0  }
   0x2 LB: > { %s34_s21 = sadd.s32 1, %s1368_s19  ;;  %p1155_p0 = scmp.ge.s32.totalorder %s1372_s20, 1  ;;  %s1372_s20 = sphi %s1418_s20, %s15_s20   ;;  %s1368_s19 = sphi %s1416_s19, %s1647_s19   ;;  %s1364_s18 = sphi %s1414_s18, %s1646_s18  }
   0x3   : > { %p36_p1 = scmp.ge.s32.totalorder %s34_s21, 2  ;;  %p242_p2 = scmp.lt.s32.totalorder %s1372_s20, 3 }
   0x5   : > { %s1649_s21 = smov (%p36_p1, %s34_s21), 0  ;;  %p243_p3 = pnand %p1155_p0, %p242_p2 }
   0x6   : > { %p290_p4 = scmp.lt.s32.totalorder (!%p243_p3), %s1364_s18, 1  ;;  %v1374_v0 = vmov (!%p243_p3), 0.0   ;;  %vm1375_vm0 = vmmov (!%p243_p3), 0   ;;  %vm331_vm1 = vcmask (!%p243_p3), 261120   ;;  %vm325_vm2 = vcmask (!%p243_p3), 31744   ;;  %s1378_s30 = smov (!%p243_p3), 96  }
   0x7   : > { %246 = sbr.rel (%p243_p3) target bundleno = 1673 (0x689), region = 40  ;;  %1208 = vmatprep.subr.bf16.mxu0 (!%p243_p3), %v1374_v0  ;;  %328 = vst [vmem:[#allocation4] sm:$0xff] (!%p243_p3), %v1374_v0  ;;  %1210 = vmatprep.mubr.msk.bf16.mxu0 (!%p243_p3), %vm1375_vm0, %v1374_v0  ;;  %v1376_v4 = vmov (!%p243_p3), -inf   ;;  %327 = vst.msk [vmem:[#allocation3] sm:$0xff] (!%p243_p3), %vm325_vm2, %v1374_v0  ;;  %vm380_vm3 = vcmask (!%p243_p3), 64512   ;;  %v1377_v11 = vmov (!%p243_p3), 0  }
   0x8   : > { %1232 = vmatprep.subr.bf16.mxu1 (!%p243_p3), %v1374_v0  ;;  %1234 = vmatprep.mubr.msk.bf16.mxu1 (!%p243_p3), %vm1375_vm0, %v1374_v0  ;;  %326 = vst.msk [vmem:[#allocation2] sm:$0xff] (!%p243_p3), %vm325_vm2, %v1376_v4  ;;  %s1379_s6 = smov (!%p243_p3), 64   ;;  %s1380_s7 = smov (!%p243_p3), 32   ;;  %vm402_vm4 = vcmask (!%p243_p3), 7168   ;;  %vm411_vm5 = vcmask (!%p243_p3), 1043456   ;;  %v1381_v56 = vmov (!%p243_p3), 1  }
   0x9   : > { %1310 = vset.pattern.permute.xlu0 (!%p243_p3), %v1377_v11  ;;  %1311 = vset.pattern.permute.xlu1 (!%p243_p3), %v1381_v56  ;;  %v1382_v57 = vmov (!%p243_p3), 2   ;;  %vm543_vm6 = vcmask (!%p243_p3), 15368   ;;  %v1383_v63 = vmov (!%p243_p3), 3   ;;  %vm682_vm7 = vcmask (!%p243_p3), 23568  }
   0xa   : > { %vm821_vm8 = vcmask (!%p243_p3), 31768   ;;  %vm606_vm9 = vcmask (!%p243_p3), 523520   ;;  %vm745_vm10 = vcmask (!%p243_p3), 785920   ;;  %vm884_vm11 = vcmask (!%p243_p3), 1048320  }
   0xe   : > { %s1651_s18 = smov (!%p290_p4, %s1364_s18), 1 }
   0xf   : > { %s1182_s22 = sshll.u32 %s1651_s18, 3  ;;  %s1442_s26 = sshll.u32 %s1651_s18, 2  ;;  %v1462_v14 = vld [vmem:[#allocation2] sm:$0xff] }
  0x10   : > { %s305_s25 = scalar_lea.vmem %s1641_s1, %s1182_s22  ;;  %s296_s29 = scalar_lea.vmem %s1640_s0, %s1442_s26 }
  0x11   : > { %v330_v1 = vld [vmem:[%s305_s25] sm:$0xff]  ;;  %s319_s10 = scalar_lea.vmem %s1645_s5, %s1442_s26 }
  0x12   : > { %v336_v2 = vsel %vm331_vm1, %v330_v1, 0  ;;  %v329_v3 = vld [vmem:[%s296_s29] sm:$0xf]  ;;  %v1165_v12 = vcombine.low %v330_v1, %v330_v1  ;;  %v1472_v18 = vcombine.high %v330_v1, %v330_v1 }
  0x13   : > { %1209 = vmatpush3.bf16.xpose.msra.mxu0 %v336_v2  ;;  %v1164_v13 = vcombine.low %v329_v3, %v329_v3 }
  0x14   : > { %1214 = vmatprep.subr.bf16.mxu0 %v1374_v0  ;;  %472 = vrot.lane.b32.xlu1 %v1165_v12, %s1378_s30  ;;  %v413_v19 = vsel %vm411_vm5, %v1472_v18, 0 }
  0x18   : > { %468 = vrot.lane.b32.xlu1 %v1164_v13, %s1378_s30 }
  0x1a   : > { %1211 = vmatmul.mubr.msk.bf16.vlgmr.msra.gmra.mrb[0].mxu0 %vm331_vm1, %v329_v3 }
  0x1b   : > { %1216 = vmatprep.mubr.msk.bf16.mxu0 %vm1375_vm0, %v1374_v0  ;;  %1215 = vmatpush3.bf16.msra.mxu0 %v413_v19 }
  0x1c   : > { %611 = vrot.lane.b32.xlu1 %v1165_v12, %s1379_s6  ;;  %1220 = vmatprep.subr.bf16.mxu0 %v1374_v0 }
  0x20   : > { %609 = vrot.lane.b32.xlu1 %v1164_v13, %s1379_s6 }
  0x24   : > { %750 = vrot.lane.b32.xlu1 %v1165_v12, %s1380_s7 }
  0x28   : > { %748 = vrot.lane.b32.xlu1 %v1164_v13, %s1380_s7 }
  0x86   : > { %v473_v20 = vpop.permute.xlu1 %472 }
  0x87   : > { %v478_v32 = vsel %vm331_vm1, %v473_v20, 0 }
  0x8a   : > { %v469_v21 = vpop.permute.xlu1 %468 }
  0x8e   : > { %v612_v22 = vpop.permute.xlu1 %611 }
  0x8f   : > { %v617_v23 = vsel %vm331_vm1, %v612_v22, 0 }
  0x90   : > { %1233 = vmatpush3.bf16.xpose.msra.mxu1 %v617_v23 }
  0x91   : > { %1244 = vmatprep.subr.bf16.mxu1 %v1374_v0 }
  0x92   : > { %v610_v24 = vpop.permute.xlu1 %609 }
  0x96   : > { %v751_v25 = vpop.permute.xlu1 %750 }
  0x97   : > { %1235 = vmatmul.mubr.msk.bf16.vlgmr.msra.gmra.mrb[0].mxu1 %vm331_vm1, %v610_v24  ;;  %v756_v26 = vsel %vm331_vm1, %v751_v25, 0 }
  0x98   : > { %1246 = vmatprep.mubr.msk.bf16.mxu1 %vm1375_vm0, %v1374_v0  ;;  %1245 = vmatpush3.bf16.xpose.msra.mxu1 %v756_v26 }
  0x99   : > { %1256 = vmatprep.subr.bf16.mxu1 %v1374_v0 }
  0x9a   : > { %v749_v27 = vpop.permute.xlu1 %748 }
  0x9f   : > { %1247 = vmatmul.mubr.msk.bf16.vlgmr.msra.gmra.mrb[4].mxu1 %vm331_vm1, %v749_v27 }
  0xa0   : > { %1272 = vmatprep.mubr.msk.bf16.mxu1 %vm1375_vm0, %v1374_v0 }
  0xed   : > { %v372_v5 = vpop.f32.mrb[0].mxu0 }
  0xee   : > { %v378_v6 = vmul.f32 0.17677669, %v372_v5  ;;  %v1212_v7 = vpop.f32.mrb[1].mxu0 }
  0xef   : > { %v375_v8 = vpop.f32.mrb[2].mxu0 }
  0xf0   : > { %v1213_v9 = vpop.f32.mrb[3].mxu0  ;;  %v381_v10 = vsel %vm380_vm3, %v378_v6, -inf }
  0xf1   : > { %382 = vmax.xlane.f32.xlu0 %v381_v10 }
 0x16a   : > { %v653_v34 = vpop.f32.mrb[0].mxu1 }
 0x16b   : > { %v1499_v35 = vmul.f32 0.17677669, %v653_v34  ;;  %v1236_v36 = vpop.f32.mrb[1].mxu1 }
 0x16c   : > { %v656_v37 = vpop.f32.mrb[2].mxu1 }
 0x16d   : > { %v1237_v38 = vpop.f32.mrb[3].mxu1  ;;  %v661_v39 = vsel %vm380_vm3, %v1499_v35, -inf }
 0x172   : > { %v792_v40 = vpop.f32.mrb[4].mxu1 }
 0x173   : > { %v1248_v41 = vpop.f32.mrb[5].mxu1  ;;  %v798_v51 = vmul.f32 0.17677669, %v792_v40 }
 0x174   : > { %v795_v42 = vpop.f32.mrb[6].mxu1  ;;  %v396_v41 = vld [vmem:[#allocation3] sm:$0xff] }
 0x175   : > { %v1249_v43 = vpop.f32.mrb[7].mxu1  ;;  %v800_v55 = vsel %vm380_vm3, %v798_v51, -inf }
 0x17e   : > { %v383_v15 = vpop.xlane.xlu0 %382 }
 0x17f   : > { %v1465_v16 = vmax.f32 %v1462_v14, %v383_v15 }
 0x181   : > { %v385_v17 = vsub.f32 %v1462_v14, %v1465_v16  ;;  %464 = vst.msk [vmem:[#allocation2] sm:$0xff] %vm402_vm4, %v1465_v16  ;;  %390 = vperm.xlu0 %1310, %v1465_v16  }
 0x185   : > { %1312 = vset.pattern.permute.xlu0 %v1382_v57 }
 0x188   : > { %v521_v58 = vld [vmem:[#allocation2] sm:$0xff] }
 0x1a0   : > { %662 = vmax.xlane.f32.xlu0 %v661_v39  ;;  %v386_v39 = vmul.f32 1.442695, %v385_v17 }
 0x200   : > { %v391_v28 = vpop.permute.xlu0 %390 }
 0x201   : > { %v393_v29 = vsub.f32 %v378_v6, %v391_v28 }
 0x203   : > { %v394_v30 = vmul.f32 1.442695, %v393_v29 }
 0x205   : > { %1332 = vpow2.f32 %v394_v30 }
 0x20f   : > { %v1487_v31 = vpop.eup %1332 }
 0x210   : > { %v404_v33 = vpack.c.bf16 %v1487_v31, %v1487_v31  ;;  %v398_v8 = vsel %vm380_vm3, %v1487_v31, 0.0 }
 0x212   : > { %1217 = vmatmul.mubr.msk.bf16.vlgmr.msra.gmra.mrb[4].mxu0 %vm380_vm3, %v404_v33 }
 0x213   : > { %1221 = vmatpush3.bf16.xpose.msra.mxu0 %v478_v32  ;;  %1222 = vmatprep.mubr.msk.bf16.mxu0 %vm1375_vm0, %v1374_v0 }
 0x214   : > { %1226 = vmatprep.subr.bf16.mxu0 %v1374_v0 }
 0x21a   : > { %1223 = vmatmul.mubr.msk.bf16.vlgmr.msra.gmra.mrb[8].mxu0 %vm331_vm1, %v469_v21 }
 0x21b   : > { %1228 = vmatprep.mubr.msk.bf16.mxu0 %vm1375_vm0, %v1374_v0 }
 0x22d   : > { %v663_v62 = vpop.xlane.xlu0 %662 }
 0x2e5   : > { %v1503_v44 = vpop.f32.mrb[4].mxu0 }
 0x2e6   : > { %v1218_v45 = vpop.f32.mrb[5].mxu0 }
 0x2e7   : > { %v452_v46 = vpop.f32.mrb[6].mxu0 }
 0x2e8   : > { %v1219_v47 = vpop.f32.mrb[7].mxu0 }
 0x2ed   : > { %v514_v48 = vpop.f32.mrb[8].mxu0 }
 0x2ee   : > { %v520_v49 = vmul.f32 0.17677669, %v514_v48  ;;  %v1224_v50 = vpop.f32.mrb[9].mxu0 }
 0x2ef   : > { %v517_v52 = vpop.f32.mrb[10].mxu0 }
 0x2f0   : > { %v1225_v53 = vpop.f32.mrb[11].mxu0  ;;  %v522_v54 = vsel %vm380_vm3, %v520_v49, -inf }
 0x2f1   : > { %523 = vmax.xlane.f32.xlu1 %v522_v54 }
 0x2f5   : > { %801 = vmax.xlane.f32.xlu1 %v800_v55 }
 0x37e   : > { %v524_v59 = vpop.xlane.xlu1 %523 }
 0x37f   : > { %v525_v60 = vmax.f32 %v521_v58, %v524_v59 }
 0x381   : > { %v526_v61 = vsub.f32 %v521_v58, %v525_v60  ;;  %608 = vst.msk [vmem:[#allocation2] sm:$0xff] %vm543_vm6, %v525_v60  ;;  %531 = vperm.xlu1 %1311, %v525_v60  }
 0x382   : > { %v802_v4 = vpop.xlane.xlu1 %801 }
 0x383   : > { %v527_v27 = vmul.f32 1.442695, %v526_v61 }
 0x385   : > { %546 = vrot.lane.b32.xlu1 %v1472_v18, %s1378_s30 }
 0x386   : > { %1313 = vset.pattern.permute.xlu1 %v1383_v63 }
 0x388   : > { %v1513_v1 = vld [vmem:[#allocation2] sm:$0xff] }
 0x389   : > { %v1516_v2 = vmax.f32 %v1513_v1, %v663_v62 }
 0x38b   : > { %v665_v3 = vsub.f32 %v1513_v1, %v1516_v2  ;;  %747 = vst.msk [vmem:[#allocation2] sm:$0xff] %vm682_vm7, %v1516_v2  ;;  %670 = vperm.xlu0 %1312, %v1516_v2  }
 0x38d   : > { %v666_v46 = vmul.f32 1.442695, %v665_v3 }
 0x38f   : > { %1315 = vset.pattern.permute.xlu0 %v1381_v56 }
 0x392   : > { %v1524_v5 = vld [vmem:[#allocation2] sm:$0xff] }
 0x393   : > { %v1527_v6 = vmax.f32 %v1524_v5, %v802_v4 }
 0x395   : > { %v804_v7 = vsub.f32 %v1524_v5, %v1527_v6  ;;  %886 = vst.msk [vmem:[#allocation2] sm:$0xff] %vm821_vm8, %v1527_v6  ;;  %809 = vperm.xlu1 %1313, %v1527_v6  }
 0x397   : > { %v805_v48 = vmul.f32 1.442695, %v804_v7 }
 0x399   : > { %685 = vrot.lane.b32.xlu1 %v1472_v18, %s1379_s6 }
 0x39a   : > { %1314 = vset.pattern.permute.xlu1 %v1377_v11 }
 0x39d   : > { %824 = vrot.lane.b32.xlu1 %v1472_v18, %s1380_s7 }
 0x3c1   : > { %399 = vadd.xlane.f32.xlu1 %v398_v8 }
 0x400   : > { %v532_v9 = vpop.permute.xlu1 %531 }
 0x401   : > { %v534_v10 = vsub.f32 %v520_v49, %v532_v9 }
 0x403   : > { %v535_v12 = vmul.f32 1.442695, %v534_v10 }
 0x404   : > { %v547_v13 = vpop.permute.xlu1 %546 }
 0x405   : > { %1334 = vpow2.f32 %v535_v12  ;;  %v552_v15 = vsel %vm411_vm5, %v547_v13, 0 }
 0x406   : > { %1227 = vmatpush3.bf16.msra.mxu0 %v552_v15 }
 0x407   : > { %1238 = vmatprep.subr.bf16.mxu0 %v1374_v0 }
 0x40a   : > { %v671_v19 = vpop.permute.xlu0 %670 }
 0x40b   : > { %v673_v20 = vsub.f32 %v1499_v35, %v671_v19 }
 0x40d   : > { %v674_v21 = vmul.f32 1.442695, %v673_v20  ;;  %v1325_v20 = vld [vmem:[%s1642_s2 + $0x8] sm:$0xff]  }
 0x40f   : > { %v1335_v22 = vpop.eup %1334  ;;  %1336 = vpow2.f32 %v674_v21  ;;  %v1329_v21 = vld [vmem:[%s1642_s2 + $0x28] sm:$0xff]  }
 0x410   : > { %v539_v18 = vsel %vm380_vm3, %v1335_v22, 0.0  ;;  %v545_v23 = vpack.c.bf16 %v1335_v22, %v1335_v22  ;;  %v1330_v22 = vld [vmem:[%s1642_s2 + $0x30] sm:$0xff]  }
 0x411   : > { %540 = vadd.xlane.f32.xlu0 %v539_v18  ;;  %v1331_v18 = vld [vmem:[%s1642_s2 + $0x38] sm:$0xff]  }
 0x412   : > { %1229 = vmatmul.mubr.msk.bf16.vlgmr.msra.gmra.mrb[12].mxu0 %vm380_vm3, %v545_v23 }
 0x413   : > { %1240 = vmatprep.mubr.msk.bf16.mxu0 %vm1375_vm0, %v1374_v0 }
 0x414   : > { %v810_v24 = vpop.permute.xlu1 %809 }
 0x415   : > { %v812_v25 = vsub.f32 %v798_v51, %v810_v24 }
 0x417   : > { %v813_v26 = vmul.f32 1.442695, %v812_v25 }
 0x418   : > { %v686_v28 = vpop.permute.xlu1 %685 }
 0x419   : > { %v1337_v29 = vpop.eup %1336  ;;  %1338 = vpow2.f32 %v813_v26  ;;  %v691_v30 = vsel %vm411_vm5, %v686_v28, 0 }
 0x41a   : > { %1239 = vmatpush3.bf16.msra.mxu0 %v691_v30  ;;  %v678_v31 = vsel %vm380_vm3, %v1337_v29, 0.0  ;;  %v684_v32 = vpack.c.bf16 %v1337_v29, %v1337_v29  ;;  %1340 = vpow2.f32 %v527_v27 }
 0x41b   : > { %679 = vadd.xlane.f32.xlu1 %v678_v31  ;;  %1250 = vmatprep.subr.bf16.mxu0 %v1374_v0  ;;  %1342 = vpow2.f32 %v386_v39 }
 0x41c   : > { %v825_v33 = vpop.permute.xlu1 %824  ;;  %1344 = vpow2.f32 %v666_v46 }
 0x41d   : > { %1241 = vmatmul.mubr.msk.bf16.vlgmr.msra.gmra.mrb[16].mxu0 %vm380_vm3, %v684_v32  ;;  %v830_v34 = vsel %vm411_vm5, %v825_v33, 0  ;;  %1346 = vpow2.f32 %v805_v48 }
 0x41e   : > { %1251 = vmatpush3.bf16.msra.mxu0 %v830_v34  ;;  %1252 = vmatprep.mubr.msk.bf16.mxu0 %vm1375_vm0, %v1374_v0 }
 0x423   : > { %v1339_v35 = vpop.eup %1338 }
 0x424   : > { %v817_v36 = vsel %vm380_vm3, %v1339_v35, 0.0  ;;  %v823_v37 = vpack.c.bf16 %v1339_v35, %v1339_v35  ;;  %v1341_v38 = vpop.eup %1340 }
 0x425   : > { %818 = vadd.xlane.f32.xlu1 %v817_v36  ;;  %v1343_v40 = vpop.eup %1342 }
 0x426   : > { %1253 = vmatmul.mubr.msk.bf16.vlgmr.msra.gmra.mrb[20].mxu0 %vm380_vm3, %v823_v37  ;;  %v397_v42 = vmul.f32 %v1343_v40, %v396_v41  ;;  %v1345_v49 = vpop.eup %1344 }
 0x427   : > { %597 = vperm.xlu0 %1315, %v1341_v38   ;;  %v1347_v55 = vpop.eup %1346 }
 0x42b   : > { %1322 = vset.pattern.permute.xlu0 %v1383_v63 }
 0x436   : > { %458 = vperm.xlu1 %1314, %v1343_v40  }
 0x43a   : > { %1316 = vset.pattern.permute.xlu1 %v1382_v57 }
 0x44e   : > { %v400_v43 = vpop.xlane.xlu1 %399 }
 0x44f   : > { %v401_v45 = vadd.f32 %v400_v43, %v397_v42 }
 0x451   : > { %403 = vst.msk [vmem:[#allocation3] sm:$0xff] %vm402_vm4, %v401_v45 }
 0x458   : > { %v537_v14 = vld [vmem:[#allocation3] sm:$0xff] }
 0x459   : > { %v538_v16 = vmul.f32 %v1341_v38, %v537_v14 }
 0x49e   : > { %v541_v17 = vpop.xlane.xlu0 %540 }
 0x49f   : > { %v542_v47 = vadd.f32 %v541_v17, %v538_v16 }
 0x4a1   : > { %544 = vst.msk [vmem:[#allocation3] sm:$0xff] %vm543_vm6, %v542_v47 }
 0x4a6   : > { %v598_v24 = vpop.permute.xlu0 %597 }
 0x4a8   : > { %v676_v50 = vld [vmem:[#allocation3] sm:$0xff]  ;;  %v680_v52 = vpop.xlane.xlu1 %679 }
 0x4a9   : > { %v677_v51 = vmul.f32 %v1345_v49, %v676_v50 }
 0x4ab   : > { %v681_v53 = vadd.f32 %v680_v52, %v677_v51  ;;  %v939_v51 = vld [vmem:[%s1643_s3] sm:$0x1] }
 0x4ac   : > { %v940_v52 = vunpack.c.l.bf16 %v939_v51 }
 0x4ad   : > { %683 = vst.msk [vmem:[#allocation3] sm:$0xff] %vm682_vm7, %v681_v53 }
 0x4b2   : > { %v819_v54 = vpop.xlane.xlu1 %818 }
 0x4b4   : > { %v815_v58 = vld [vmem:[#allocation3] sm:$0xff] }
 0x4b5   : > { %v816_v59 = vmul.f32 %v1347_v55, %v815_v58 }
 0x4b6   : > { %v459_v60 = vpop.permute.xlu1 %458 }
 0x4b7   : > { %v820_v61 = vadd.f32 %v819_v54, %v816_v59  ;;  %v461_v62 = vmul.f32 0.0, %v459_v60 }
 0x4b9   : > { %822 = vst.msk [vmem:[#allocation3] sm:$0xff] %vm821_vm8, %v820_v61  ;;  %v462_v1 = vadd.f32 %v461_v62, %v1503_v44 }
 0x4bb   : > { %463 = vst.msk [vmem:[#allocation4] sm:$0xff] %vm331_vm1, %v462_v1 }
 0x4c0   : > { %v890_v6 = vld [vmem:[#allocation3] sm:$0xff] }
 0x4c1   : > { %1348 = vrcp.f32 %v890_v6 }
 0x4c2   : > { %v594_v23 = vld [vmem:[#allocation4] sm:$0xff] }
 0x4c3   : > { %v600_v25 = vmul.f32 %v598_v24, %v594_v23 }
 0x4cb   : > { %v1349_v19 = vpop.eup %1348 }
 0x4e5   : > { %v588_v2 = vpop.f32.mrb[12].mxu0 }
 0x4e6   : > { %602 = vrot.lane.b32.xlu1 %v588_v2, %s1380_s7  ;;  %v1230_v3 = vpop.f32.mrb[13].mxu0  ;;  %s312_s7 = scalar_lea.vmem %s1644_s4, %s1442_s26 }
 0x4e7   : > { %v591_v4 = vpop.f32.mrb[14].mxu0  ;;  %v1033_v54 = vld [vmem:[%s312_s7] sm:$0xf] }
 0x4e8   : > { %v1231_v5 = vpop.f32.mrb[15].mxu0  ;;  %v1034_v58 = vunpack.c.l.bf16 %v1033_v54 }
 0x4ea   : > { %736 = vperm.xlu1 %1316, %v1345_v49   ;;  %v941_v49 = vlaneseq }
 0x4ec   : > { %v942_v50 = vshrl.u32 %v941_v49, 7 }
 0x4ee   : > { %1317 = vset.pattern.permute.xlu1 %v1383_v63  ;;  %v943_v53 = vsub.s32 0, %v942_v50 }
 0x4f0   : > { %v727_v7 = vpop.f32.mrb[16].mxu0 }
 0x4f1   : > { %741 = vrot.lane.b32.xlu1 %v727_v7, %s1379_s6  ;;  %v1242_v8 = vpop.f32.mrb[17].mxu0 }
 0x4f2   : > { %v730_v9 = vpop.f32.mrb[18].mxu0 }
 0x4f3   : > { %v1243_v10 = vpop.f32.mrb[19].mxu0 }
 0x4f5   : > { %875 = vperm.xlu1 %1317, %v1347_v55   ;;  %v944_v55 = vrot.slane %v940_v52, %v943_v53 }
 0x4f9   : > { %v866_v44 = vpop.f32.mrb[20].mxu0  ;;  %1318 = vset.pattern.permute.xlu1 %v1377_v11  ;;  %v1324_v11 = vld [vmem:[%s1642_s2] sm:$0xff]  }
 0x4fa   : > { %880 = vrot.lane.b32.xlu1 %v866_v44, %s1378_s30  ;;  %v1254_v12 = vpop.f32.mrb[21].mxu0  ;;  %1257 = vmatpush3.bf16.msra.mxu1 %v1324_v11 }
 0x4fb   : > { %v869_v13 = vpop.f32.mrb[22].mxu0  ;;  %1258 = vmatprep.subr.bf16.mxu1 %v1374_v0 }
 0x4fc   : > { %v1255_v15 = vpop.f32.mrb[23].mxu0 }
 0x4fe   : > { %895 = vperm.xlu1 %1318, %v1349_v19   ;;  %1259 = vmatpush3.bf16.msra.mxu1 %v1325_v20 }
 0x4ff   : > { %1260 = vmatprep.subr.bf16.mxu1 %v1374_v0 }
 0x502   : > { %1319 = vset.pattern.permute.xlu1 %v1381_v56  ;;  %v1326_v56 = vld [vmem:[%s1642_s2 + $0x10] sm:$0xff]  }
 0x503   : > { %902 = vperm.xlu1 %1319, %v1349_v19   ;;  %1261 = vmatpush3.bf16.msra.mxu1 %v1326_v56 }
 0x504   : > { %1262 = vmatprep.subr.bf16.mxu1 %v1374_v0 }
 0x507   : > { %1320 = vset.pattern.permute.xlu1 %v1382_v57  ;;  %v1327_v57 = vld [vmem:[%s1642_s2 + $0x18] sm:$0xff]  }
 0x508   : > { %909 = vperm.xlu1 %1320, %v1349_v19   ;;  %1263 = vmatpush3.bf16.msra.mxu1 %v1327_v57 }
 0x509   : > { %1264 = vmatprep.subr.bf16.mxu1 %v1374_v0 }
 0x50c   : > { %1321 = vset.pattern.permute.xlu1 %v1383_v63  ;;  %v1328_v63 = vld [vmem:[%s1642_s2 + $0x20] sm:$0xff]  }
 0x50d   : > { %916 = vperm.xlu1 %1321, %v1349_v19   ;;  %1265 = vmatpush3.bf16.msra.mxu1 %v1328_v63 }
 0x50e   : > { %1266 = vmatprep.subr.bf16.mxu1 %v1374_v0 }
 0x511   : > { %1267 = vmatpush3.bf16.msra.mxu1 %v1329_v21 }
 0x512   : > { %1268 = vmatprep.subr.bf16.mxu1 %v1374_v0 }
 0x515   : > { %1269 = vmatpush3.bf16.msra.mxu1 %v1330_v22 }
 0x516   : > { %1270 = vmatprep.subr.bf16.mxu1 %v1374_v0 }
 0x519   : > { %1271 = vmatpush3.bf16.msra.mxu1 %v1331_v18 }
 0x558   : > { %v603_v26 = vpop.permute.xlu1 %602 }
 0x559   : > { %v605_v27 = vadd.f32 %v603_v26, %v600_v25 }
 0x55b   : > { %607 = vst.msk [vmem:[#allocation4] sm:$0xff] %vm606_vm9, %v605_v27 }
 0x562   : > { %v733_v29 = vld [vmem:[#allocation4] sm:$0xff] }
 0x569   : > { %v737_v28 = vpop.permute.xlu1 %736 }
 0x56a   : > { %v739_v30 = vmul.f32 %v737_v28, %v733_v29 }
 0x56d   : > { %v742_v31 = vpop.permute.xlu1 %741 }
 0x56e   : > { %v744_v32 = vadd.f32 %v742_v31, %v739_v30 }
 0x570   : > { %746 = vst.msk [vmem:[#allocation4] sm:$0xff] %vm745_vm10, %v744_v32 }
 0x574   : > { %v876_v33 = vpop.permute.xlu1 %875 }
 0x577   : > { %v872_v34 = vld [vmem:[#allocation4] sm:$0xff] }
 0x578   : > { %v878_v0 = vmul.f32 %v876_v33, %v872_v34  ;;  %v881_v35 = vpop.permute.xlu1 %880 }
 0x57a   : > { %v883_v36 = vadd.f32 %v881_v35, %v878_v0 }
 0x57c   : > { %885 = vst.msk [vmem:[#allocation4] sm:$0xff] %vm884_vm11, %v883_v36 }
 0x57d   : > { %v896_v38 = vpop.permute.xlu1 %895 }
 0x582   : > { %v903_v41 = vpop.permute.xlu1 %902 }
 0x583   : > { %v892_v37 = vld [vmem:[#allocation4] sm:$0xff] }
 0x584   : > { %v898_v39 = vmul.f32 %v896_v38, %v892_v37 }
 0x586   : > { %899 = vst.msk [vmem:[#allocation4] sm:$0xff] %vm331_vm1, %v898_v39 }
 0x587   : > { %v910_v45 = vpop.permute.xlu1 %909 }
 0x58c   : > { %v917_v16 = vpop.permute.xlu1 %916 }
 0x58d   : > { %v900_v40 = vld [vmem:[#allocation4] sm:$0xff] }
 0x58e   : > { %v905_v42 = vmul.f32 %v903_v41, %v900_v40 }
 0x590   : > { %906 = vst.msk [vmem:[#allocation4] sm:$0xff] %vm606_vm9, %v905_v42 }
 0x597   : > { %v907_v43 = vld [vmem:[#allocation4] sm:$0xff] }
 0x598   : > { %v912_v46 = vmul.f32 %v910_v45, %v907_v43 }
 0x59a   : > { %913 = vst.msk [vmem:[#allocation4] sm:$0xff] %vm745_vm10, %v912_v46 }
 0x5a1   : > { %v914_v14 = vld [vmem:[#allocation4] sm:$0xff] }
 0x5a2   : > { %v919_v17 = vmul.f32 %v917_v16, %v914_v14 }
 0x5a4   : > { %920 = vst.msk [vmem:[#allocation4] sm:$0xff] %vm884_vm11, %v919_v17 }
 0x5ab   : > { %v921_v47 = vld [vmem:[#allocation4] sm:$0xff] }
 0x5ac   : > { %v922_v48 = vpack.c.bf16 %v921_v47, %v921_v47 }
 0x5ae   : > { %1273 = vmatmul.mubr.bf16.vlgmr.msra.gmra.mrb[8].mxu1 %v922_v48 }
 0x681   : > { %v1027_v59 = vpop.f32.mrb[8].mxu1 }
 0x682   : > { %v1028_v60 = vadd.f32 %v1027_v59, %v944_v55  ;;  %v1274_v61 = vpop.f32.mrb[9].mxu1 }
 0x683   : > { %v1030_v62 = vpop.f32.mrb[10].mxu1 }
 0x684   : > { %v1035_v1 = vadd.f32 %v1034_v58, %v1028_v60  ;;  %v1275_v2 = vpop.f32.mrb[11].mxu1 }
 0x686   : > { %v1036_v3 = vpack.c.bf16 %v1035_v1, %v1035_v1 }
 0x688   : > { %1037 = vst [vmem:[%s319_s10] sm:$0xf] %v1036_v3 }
 0x689 PF: > { %s15_s20 = sadd.s32 1, %s1372_s20   ;;  %s1646_s18 = smov %s1368_s19 }
 0x68a   : > { %p12_p5 = scmp.ge.s32.totalorder %s15_s20, 4   ;;  %s1647_s19 = smov %s1649_s21 }
 0x68c   :  { %14 = sbr.rel (!%p12_p5) target bundleno = 2 (0x2), region = 84 }

// kernel: cross_attention_forward.20
= control target key start
LH: loop header
LB: loop body
LE: loop exit
PB: predicated region body
PF: predicated region fallthrough
CT: control target
= control target key end

     0   :  { %v279_v1 = vmov 0   ;;  %v192_v18 = vlaneseq  ;;  %s360_s1 = inlined_call_operand.vmem [shape: bf16[128,256], index: 1, kind: input, shape index: {}]   ;;  %s361_s0 = inlined_call_operand.vmem [shape: bf16[16,128], index: 0, kind: input, shape index: {}]   ;;  %s362_s2 = inlined_call_operand.vmem [shape: bf16[1,256], index: 2, kind: input, shape index: {}]   ;;  %s363_s3 = inlined_call_operand.vmem [shape: bf16[16,256], index: 3, kind: output, shape index: {}]  }
   0x1   :  { %v254_v0 = vld [vmem:[%s360_s1 + $0x4] ss:$8 sps:$4 sm:$0xff]   ;;  %163 = vmatprep.mubr.bf16.mxu0 %v279_v1  ;;  %v256_v2 = vld [vmem:[%s360_s1] ss:$8 sps:$4 sm:$0xff]   ;;  %v257_v3 = vld [vmem:[%s360_s1 + $0x14] ss:$8 sps:$4 sm:$0xff]  }
   0x2   :  { %131 = vmatprep.subr.bf16.mxu0 %v254_v0  ;;  %v259_v4 = vld [vmem:[%s360_s1 + $0x10] ss:$8 sps:$4 sm:$0xff]   ;;  %v260_v5 = vld [vmem:[%s360_s1 + $0x24] ss:$8 sps:$4 sm:$0xff]   ;;  %v262_v6 = vld [vmem:[%s360_s1 + $0x20] ss:$8 sps:$4 sm:$0xff]  }
   0x3   :  { %132 = vmatpush1.bf16.msra.mxu0 %v256_v2  ;;  %v263_v7 = vld [vmem:[%s360_s1 + $0x34] ss:$8 sps:$4 sm:$0xff]   ;;  %v265_v8 = vld [vmem:[%s360_s1 + $0x30] ss:$8 sps:$4 sm:$0xff]   ;;  %v266_v9 = vld [vmem:[%s360_s1 + $0x44] ss:$8 sps:$4 sm:$0xff]  }
   0x4   :  { %133 = vmatprep.subr.bf16.mxu0 %v257_v3  ;;  %v268_v10 = vld [vmem:[%s360_s1 + $0x40] ss:$8 sps:$4 sm:$0xff]   ;;  %v269_v11 = vld [vmem:[%s360_s1 + $0x54] ss:$8 sps:$4 sm:$0xff]   ;;  %v271_v12 = vld [vmem:[%s360_s1 + $0x50] ss:$8 sps:$4 sm:$0xff]  }
   0x5   :  { %v272_v13 = vld [vmem:[%s360_s1 + $0x64] ss:$8 sps:$4 sm:$0xff]   ;;  %v274_v14 = vld [vmem:[%s360_s1 + $0x60] ss:$8 sps:$4 sm:$0xff]   ;;  %v275_v15 = vld [vmem:[%s360_s1 + $0x74] ss:$8 sps:$4 sm:$0xff]  }
   0x6   :  { %v277_v16 = vld [vmem:[%s360_s1 + $0x70] ss:$8 sps:$4 sm:$0xff]   ;;  %v278_v17 = vld [vmem:[%s361_s0] sm:$0xff]   ;;  %v193_v19 = vshrl.u32 %v192_v18, 7 }
   0x7   :  { %134 = vmatpush1.bf16.msra.mxu0 %v259_v4  ;;  %v189_v20 = vld [vmem:[%s362_s2] sm:$0x3] }
   0x8   :  { %135 = vmatprep.subr.bf16.mxu0 %v260_v5  ;;  %v190_v21 = vunpack.c.l.bf16 %v189_v20  ;;  %v194_v22 = vsub.s32 0, %v193_v19  ;;  %v198_v23 = vsub.s32 2, %v193_v19 }
   0xa   :  { %v195_v24 = vrot.slane %v190_v21, %v194_v22  ;;  %v199_v25 = vrot.slane %v190_v21, %v198_v23 }
   0xb   :  { %136 = vmatpush1.bf16.msra.mxu0 %v262_v6 }
   0xc   :  { %137 = vmatprep.subr.bf16.mxu0 %v263_v7  ;;  %v205_v26 = vrot.slane %v195_v24, %v194_v22  ;;  %v209_v27 = vrot.slane %v199_v25, %v194_v22 }
   0xf   :  { %138 = vmatpush1.bf16.msra.mxu0 %v265_v8 }
  0x10   :  { %139 = vmatprep.subr.bf16.mxu0 %v266_v9 }
  0x13   :  { %140 = vmatpush1.bf16.msra.mxu0 %v268_v10 }
  0x14   :  { %141 = vmatprep.subr.bf16.mxu0 %v269_v11 }
  0x17   :  { %142 = vmatpush1.bf16.msra.mxu0 %v271_v12 }
  0x18   :  { %143 = vmatprep.subr.bf16.mxu0 %v272_v13 }
  0x1b   :  { %144 = vmatpush1.bf16.msra.mxu0 %v274_v14 }
  0x1c   :  { %145 = vmatprep.subr.bf16.mxu0 %v275_v15 }
  0x1f   :  { %146 = vmatpush1.bf16.msra.mxu0 %v277_v16 }
  0x22   :  { %164 = vmatmul.mubr.bf16.vlgmr.msra.gmra.mrb[0].mxu0 %v278_v17 }
  0xf5   :  { %v165_v28 = vpop.f32.mrb[0].mxu0 }
  0xf6   :  { %v210_v29 = vadd.f32 %v205_v26, %v165_v28  ;;  %v167_v30 = vpop.f32.mrb[1].mxu0 }
  0xf7   :  { %v211_v31 = vadd.f32 %v209_v27, %v167_v30  ;;  %v169_v32 = vpop.f32.mrb[2].mxu0 }
  0xf8   :  { %v212_v33 = vadd.f32 %v205_v26, %v169_v32  ;;  %v171_v34 = vpop.f32.mrb[3].mxu0 }
  0xf9   :  { %v251_v35 = vpack.c.bf16 %v211_v31, %v210_v29  ;;  %v213_v36 = vadd.f32 %v209_v27, %v171_v34 }
  0xfb   :  { %226 = vst [vmem:[%s363_s3] sm:$0xff] %v251_v35  ;;  %v252_v37 = vpack.c.bf16 %v213_v36, %v212_v33 }
  0xfd   :  { %227 = vst [vmem:[%s363_s3 + $0x8] sm:$0xff] %v252_v37 }

// kernel: cross_attention_forward.23
= control target key start
LH: loop header
LB: loop body
LE: loop exit
PB: predicated region body
PF: predicated region fallthrough
CT: control target
= control target key end

     0   :  { %v399_v36 = vlaneseq  ;;  %s698_s1 = inlined_call_operand.vmem [shape: bf16[512,128], index: 1, kind: input, shape index: {}]   ;;  %s699_s0 = inlined_call_operand.vmem [shape: bf16[16,512], index: 0, kind: input, shape index: {}]   ;;  %s700_s2 = inlined_call_operand.vmem [shape: bf16[1,128], index: 2, kind: input, shape index: {}]   ;;  %s701_s3 = inlined_call_operand.vmem [shape: bf16[16,128], index: 3, kind: input, shape index: {}]   ;;  %s702_s4 = inlined_call_operand.vmem [shape: bf16[16,128], index: 4, kind: output, shape index: {}]  }
   0x1   :  { %v518_v0 = vld [vmem:[%s698_s1 + $0x40] sm:$0xff]   ;;  %v522_v4 = vld [vmem:[%s698_s1 + $0x48] sm:$0xff]   ;;  %v526_v8 = vld [vmem:[%s698_s1 + $0x50] sm:$0xff]  }
   0x2   :  { %v519_v1 = vld [vmem:[%s698_s1 + $0xc0] sm:$0xff]   ;;  %474 = vmatprep.subr.bf16.mxu0 %v518_v0  ;;  %v523_v5 = vld [vmem:[%s698_s1 + $0xc8] sm:$0xff]   ;;  %v527_v9 = vld [vmem:[%s698_s1 + $0xd0] sm:$0xff]   ;;  %v400_v37 = vshrl.u32 %v399_v36, 7 }
   0x3   :  { %v520_v2 = vld [vmem:[%s698_s1] sm:$0xff]   ;;  %496 = vmatprep.subr.bf16.mxu1 %v519_v1  ;;  %v524_v6 = vld [vmem:[%s698_s1 + $0x8] sm:$0xff]   ;;  %v528_v10 = vld [vmem:[%s698_s1 + $0x10] sm:$0xff]  }
   0x4   :  { %v521_v3 = vld [vmem:[%s698_s1 + $0x80] sm:$0xff]   ;;  %475 = vmatpush3.bf16.msra.mxu0 %v520_v2  ;;  %v525_v7 = vld [vmem:[%s698_s1 + $0x88] sm:$0xff]   ;;  %v529_v11 = vld [vmem:[%s698_s1 + $0x90] sm:$0xff]   ;;  %v401_v40 = vsub.s32 0, %v400_v37 }
   0x5   :  { %497 = vmatpush3.bf16.msra.mxu1 %v521_v3  ;;  %476 = vmatprep.subr.bf16.mxu0 %v522_v4  ;;  %v530_v12 = vld [vmem:[%s698_s1 + $0x58] sm:$0xff]   ;;  %v534_v16 = vld [vmem:[%s698_s1 + $0x60] sm:$0xff]   ;;  %v538_v20 = vld [vmem:[%s698_s1 + $0x68] sm:$0xff]  }
   0x6   :  { %498 = vmatprep.subr.bf16.mxu1 %v523_v5  ;;  %v531_v13 = vld [vmem:[%s698_s1 + $0xd8] sm:$0xff]   ;;  %v535_v17 = vld [vmem:[%s698_s1 + $0xe0] sm:$0xff]   ;;  %v539_v21 = vld [vmem:[%s698_s1 + $0xe8] sm:$0xff]  }
   0x7   :  { %v532_v14 = vld [vmem:[%s698_s1 + $0x18] sm:$0xff]   ;;  %v536_v18 = vld [vmem:[%s698_s1 + $0x20] sm:$0xff]   ;;  %v540_v22 = vld [vmem:[%s698_s1 + $0x28] sm:$0xff]  }
   0x8   :  { %477 = vmatpush3.bf16.msra.mxu0 %v524_v6  ;;  %v533_v15 = vld [vmem:[%s698_s1 + $0x98] sm:$0xff]   ;;  %v537_v19 = vld [vmem:[%s698_s1 + $0xa0] sm:$0xff]   ;;  %v541_v23 = vld [vmem:[%s698_s1 + $0xa8] sm:$0xff]  }
   0x9   :  { %499 = vmatpush3.bf16.msra.mxu1 %v525_v7  ;;  %478 = vmatprep.subr.bf16.mxu0 %v526_v8  ;;  %v542_v24 = vld [vmem:[%s698_s1 + $0x70] sm:$0xff]   ;;  %v546_v28 = vld [vmem:[%s698_s1 + $0x78] sm:$0xff]   ;;  %v397_v38 = vld [vmem:[%s700_s2] sm:$0x1] }
   0xa   :  { %500 = vmatprep.subr.bf16.mxu1 %v527_v9  ;;  %v543_v25 = vld [vmem:[%s698_s1 + $0xf0] sm:$0xff]   ;;  %v547_v29 = vld [vmem:[%s698_s1 + $0xf8] sm:$0xff]   ;;  %v398_v39 = vunpack.c.l.bf16 %v397_v38  ;;  %v466_v51 = vld [vmem:[%s701_s3] sm:$0xff]  }
   0xb   :  { %v544_v26 = vld [vmem:[%s698_s1 + $0x30] sm:$0xff]   ;;  %v548_v30 = vld [vmem:[%s698_s1 + $0x38] sm:$0xff]   ;;  %v467_v57 = vunpack.c.l.bf16 %v466_v51  ;;  %v468_v59 = vunpack.c.h.bf16 %v466_v51 }
   0xc   :  { %479 = vmatpush3.bf16.msra.mxu0 %v528_v10  ;;  %v545_v27 = vld [vmem:[%s698_s1 + $0xb0] sm:$0xff]   ;;  %v549_v31 = vld [vmem:[%s698_s1 + $0xb8] sm:$0xff]   ;;  %v402_v48 = vrot.slane %v398_v39, %v401_v40 }
   0xd   :  { %501 = vmatpush3.bf16.msra.mxu1 %v529_v11  ;;  %480 = vmatprep.subr.bf16.mxu0 %v530_v12  ;;  %v550_v32 = vld [vmem:[%s699_s0] ss:$16 sps:$4 sm:$0xff]   ;;  %v552_v33 = vld [vmem:[%s699_s0 + $0x4] ss:$16 sps:$4 sm:$0xff]   ;;  %v553_v34 = vld [vmem:[%s699_s0 + $0x8] ss:$16 sps:$4 sm:$0xff]  }
   0xe   :  { %502 = vmatprep.subr.bf16.mxu1 %v531_v13  ;;  %v555_v35 = vld [vmem:[%s699_s0 + $0xc] ss:$16 sps:$4 sm:$0xff]   ;;  %338 = vmatprep.mubr.bf16.mxu0 %v552_v33 }
   0xf   :  { %379 = vmatprep.mubr.bf16.mxu1 %v555_v35 }
  0x10   :  { %481 = vmatpush3.bf16.msra.mxu0 %v532_v14 }
  0x11   :  { %503 = vmatpush3.bf16.msra.mxu1 %v533_v15  ;;  %482 = vmatprep.subr.bf16.mxu0 %v534_v16 }
  0x12   :  { %504 = vmatprep.subr.bf16.mxu1 %v535_v17 }
  0x14   :  { %483 = vmatpush3.bf16.msra.mxu0 %v536_v18 }
  0x15   :  { %505 = vmatpush3.bf16.msra.mxu1 %v537_v19  ;;  %484 = vmatprep.subr.bf16.mxu0 %v538_v20 }
  0x16   :  { %506 = vmatprep.subr.bf16.mxu1 %v539_v21 }
  0x18   :  { %485 = vmatpush3.bf16.msra.mxu0 %v540_v22 }
  0x19   :  { %507 = vmatpush3.bf16.msra.mxu1 %v541_v23  ;;  %486 = vmatprep.subr.bf16.mxu0 %v542_v24 }
  0x1a   :  { %508 = vmatprep.subr.bf16.mxu1 %v543_v25 }
  0x1c   :  { %487 = vmatpush3.bf16.msra.mxu0 %v544_v26 }
  0x1d   :  { %509 = vmatpush3.bf16.msra.mxu1 %v545_v27  ;;  %488 = vmatprep.subr.bf16.mxu0 %v546_v28 }
  0x1e   :  { %510 = vmatprep.subr.bf16.mxu1 %v547_v29 }
  0x20   :  { %489 = vmatpush3.bf16.msra.mxu0 %v548_v30 }
  0x21   :  { %511 = vmatpush3.bf16.msra.mxu1 %v549_v31 }
  0x23   :  { %339 = vmatmul.mubr.bf16.vlgmr.msra.gmra.mrb[0].mxu0 %v550_v32 }
  0x24   :  { %380 = vmatmul.mubr.bf16.vlgmr.msra.gmra.mrb[0].mxu1 %v553_v34 }
  0xf6   :  { %v490_v41 = vpop.f32.mrb[0].mxu0 }
  0xf7   :  { %v512_v42 = vpop.f32.mrb[0].mxu1  ;;  %v491_v43 = vpop.f32.mrb[1].mxu0 }
  0xf8   :  { %v492_v44 = vadd.f32 %v491_v43, %v490_v41  ;;  %v513_v45 = vpop.f32.mrb[1].mxu1  ;;  %v493_v46 = vpop.f32.mrb[2].mxu0 }
  0xf9   :  { %v514_v47 = vadd.f32 %v513_v45, %v512_v42  ;;  %v515_v49 = vpop.f32.mrb[2].mxu1  ;;  %v494_v50 = vpop.f32.mrb[3].mxu0 }
  0xfa   :  { %v495_v52 = vadd.f32 %v494_v50, %v493_v46  ;;  %v516_v53 = vpop.f32.mrb[3].mxu1 }
  0xfb   :  { %v382_v54 = vadd.f32 %v514_v47, %v492_v44  ;;  %v517_v55 = vadd.f32 %v516_v53, %v515_v49 }
  0xfd   :  { %v403_v56 = vadd.f32 %v402_v48, %v382_v54  ;;  %v385_v58 = vadd.f32 %v517_v55, %v495_v52 }
  0xff   :  { %v404_v60 = vadd.f32 %v402_v48, %v385_v58  ;;  %v409_v61 = vadd.f32 %v467_v57, %v403_v56 }
 0x101   :  { %v410_v62 = vadd.f32 %v468_v59, %v404_v60 }
 0x103   :  { %v472_v63 = vpack.c.bf16 %v410_v62, %v409_v61 }
 0x105   :  { %473 = vst [vmem:[%s702_s4] sm:$0xff] %v472_v63  }

// kernel: cross_attention_forward.31
= control target key start
LH: loop header
LB: loop body
LE: loop exit
PB: predicated region body
PF: predicated region fallthrough
CT: control target
= control target key end

     0   :  { %s172_s0 = inlined_call_operand.vmem [shape: bf16[16,128], index: 0, kind: input, shape index: {}]   ;;  %s173_s1 = inlined_call_operand.vmem [shape: bf16[1,128], index: 1, kind: input, shape index: {}]   ;;  %s174_s2 = inlined_call_operand.vmem [shape: bf16[1,128], index: 2, kind: input, shape index: {}]   ;;  %s175_s3 = inlined_call_operand.hbm [shape: bf16[16,128], index: 3, kind: output, shape index: {}]  }
   0x1   :  { %v89_v0 = vld [vmem:[%s172_s0] sm:$0xff]  }
   0x2   :  { %8 = vsyncpa [#allocation3], 0  ;;  %v90_v1 = vunpack.c.l.bf16 %v89_v0  ;;  %v91_v2 = vunpack.c.h.bf16 %v89_v0  ;;  %v45_v15 = vlaneseq  ;;  %v17_v19 = vld [vmem:[%s173_s1] sm:$0x1]  ;;  %s128_s17 = smov [#allocation2]  }
   0x3   :  { %v44_v20 = vunpack.c.l.bf16 %v17_v19  ;;  %v18_v22 = vld [vmem:[%s174_s2] sm:$0x1]  ;;  %s73_s18 = sshll.u32 %s128_s17, 4  ;;  %s74_s18 = int_to_ptr.vmem [resolvable:$true] %s73_s18 }
   0x4   :  { %21 = vadd.xlane.f32.xlu0 %v90_v1  ;;  %v46_v18 = vshrl.u32 %v45_v15, 7  ;;  %v51_v26 = vunpack.c.l.bf16 %v18_v22  ;;  %s104_s1 = scalar_lea.vmem %s74_s18, 128  ;;  %p109_p1 = scmp.lt.s32.totalorder %s74_s18, %s74_s18 }
   0x5   :  { %p105_p0 = scmp.ne.s32.totalorder %s74_s18, %s104_s1  ;;  %p110_p2 = scmp.lt.s32.totalorder %s104_s1, %s104_s1 }
   0x6   :  { %v47_v21 = vsub.s32 0, %v46_v18 }
   0x7   :  { %p111_p3 = por %p110_p2, %p109_p1 }
   0x8   :  { %23 = vadd.xlane.f32.xlu0 %v91_v2  ;;  %v48_v25 = vrot.slane %v44_v20, %v47_v21  ;;  %v55_v30 = vrot.slane %v51_v26, %v47_v21 }
   0x9   :  { %p112_p4 = pnand %p111_p3, %p105_p0 }
  0x91   :  { %v22_v3 = vpop.xlane.xlu0 %21 }
  0x92   :  { %v26_v4 = vmul.f32 0.0078125, %v22_v3 }
  0x94   :  { %v28_v5 = vsub.f32 %v90_v1, %v26_v4 }
  0x95   :  { %v24_v6 = vpop.xlane.xlu0 %23 }
  0x96   :  { %v27_v7 = vmul.f32 0.0078125, %v24_v6  ;;  %v30_v8 = vmul.f32 %v28_v5, %v28_v5 }
  0x98   :  { %v29_v9 = vsub.f32 %v91_v2, %v27_v7  ;;  %32 = vadd.xlane.f32.xlu1 %v30_v8 }
  0x9a   :  { %v31_v10 = vmul.f32 %v29_v9, %v29_v9 }
  0x9c   :  { %34 = vadd.xlane.f32.xlu1 %v31_v10 }
 0x125   :  { %v33_v11 = vpop.xlane.xlu1 %32 }
 0x126   :  { %v36_v12 = vmul.f32 0.0078125, %v33_v11 }
 0x128   :  { %v38_v13 = vadd.f32 1e-05, %v36_v12 }
 0x129   :  { %v35_v14 = vpop.xlane.xlu1 %34 }
 0x12a   :  { %100 = vrsqrt.f32 %v38_v13  ;;  %v37_v16 = vmul.f32 0.0078125, %v35_v14 }
 0x12c   :  { %v39_v17 = vadd.f32 1e-05, %v37_v16 }
 0x12e   :  { %102 = vrsqrt.f32 %v39_v17 }
 0x134   :  { %v101_v23 = vpop.eup %100 }
 0x135   :  { %v42_v24 = vmul.f32 %v101_v23, %v28_v5 }
 0x137   :  { %v49_v29 = vmul.f32 %v48_v25, %v42_v24 }
 0x138   :  { %v103_v27 = vpop.eup %102 }
 0x139   :  { %v43_v28 = vmul.f32 %v103_v27, %v29_v9  ;;  %v56_v32 = vadd.f32 %v55_v30, %v49_v29 }
 0x13b   :  { %v50_v31 = vmul.f32 %v48_v25, %v43_v28 }
 0x13d   :  { %v57_v33 = vadd.f32 %v55_v30, %v50_v31 }
 0x13f   :  { %v95_v34 = vpack.c.bf16 %v57_v33, %v56_v32 }
 0x141   :  { %96 = vst [vmem:[#allocation2] sm:$0xff] %v95_v34  }
 0x142   :  { %115 = shalt.err (!%p112_p4)
}
 0x143   :  { %s116_s20 = scalar_lea.hbm %s175_s3, 128 }
 0x144   :  { %p117_p5 = scmp.ne.s32.totalorder %s175_s3, %s116_s20  ;;  %p120_p6 = scmp.lt.u32.totalorder %s116_s20, %s175_s3 }
 0x146   :  { %p122_p7 = pnand %p120_p6, %p117_p5 }
 0x148   :  { %125 = shalt.err (!%p122_p7)
}
 0x149   :  { %s129_s25 = smov 64   ;;  %s130_s26 = smov 4  }
 0x14a   :  { %79 = dma.vmem_to_hbm [thread:$0]  %s74_s18, 128, %s175_s3, [#allocation3], %s129_s25, %s129_s25, %s130_s26  }
 0x14b   :  { %126 = dma.done.wait [#allocation3], 128  }
 0x14c   :  { %127 = vsyncadd [#allocation3], 4294967168 }
 0x14d   :  { %83 = vsyncpa [#allocation3], 1 }

// kernel: cross_attention_forward.22
= control target key start
LH: loop header
LB: loop body
LE: loop exit
PB: predicated region body
PF: predicated region fallthrough
CT: control target
= control target key end

     0   :  { %v599_v37 = vmov 0   ;;  %v51_v48 = vlaneseq  ;;  %s816_s0 = inlined_call_operand.vmem [shape: bf16[16,128], index: 0, kind: input, shape index: {}]   ;;  %s817_s3 = inlined_call_operand.vmem [shape: bf16[128,512], index: 3, kind: input, shape index: {}]   ;;  %s818_s1 = inlined_call_operand.vmem [shape: bf16[1,128], index: 1, kind: input, shape index: {}]   ;;  %s819_s2 = inlined_call_operand.vmem [shape: bf16[1,128], index: 2, kind: input, shape index: {}]   ;;  %s820_s4 = inlined_call_operand.vmem [shape: bf16[1,512], index: 4, kind: input, shape index: {}]   ;;  %s821_s5 = inlined_call_operand.vmem [shape: bf16[16,512], index: 5, kind: output, shape index: {}]  }
   0x1   :  { %v527_v0 = vld [vmem:[%s816_s0] sm:$0xff]   ;;  %v533_v4 = vld [vmem:[%s817_s3 + $0xc] ss:$16 sps:$4 sm:$0xff]   ;;  %v536_v6 = vld [vmem:[%s817_s3 + $0x8] ss:$16 sps:$4 sm:$0xff]   ;;  %328 = vmatprep.mubr.bf16.mxu0 %v599_v37  ;;  %371 = vmatprep.mubr.bf16.mxu1 %v599_v37 }
   0x2   :  { %v528_v1 = vunpack.c.l.bf16 %v527_v0  ;;  %v529_v2 = vunpack.c.h.bf16 %v527_v0  ;;  %v531_v3 = vld [vmem:[%s817_s3 + $0x4] ss:$16 sps:$4 sm:$0xff]   ;;  %v535_v5 = vld [vmem:[%s817_s3] ss:$16 sps:$4 sm:$0xff]   ;;  %339 = vmatprep.subr.bf16.mxu1 %v533_v4  ;;  %v539_v8 = vld [vmem:[%s817_s3 + $0x2c] ss:$16 sps:$4 sm:$0xff]  }
   0x3   :  { %296 = vmatprep.subr.bf16.mxu0 %v531_v3  ;;  %v537_v7 = vld [vmem:[%s817_s3 + $0x24] ss:$16 sps:$4 sm:$0xff]   ;;  %340 = vmatpush1.bf16.msra.mxu1 %v536_v6  ;;  %v541_v17 = vld [vmem:[%s817_s3 + $0x20] ss:$16 sps:$4 sm:$0xff]   ;;  %v542_v18 = vld [vmem:[%s817_s3 + $0x28] ss:$16 sps:$4 sm:$0xff]  }
   0x4   :  { %27 = vadd.xlane.f32.xlu0 %v528_v1  ;;  %297 = vmatpush1.bf16.msra.mxu0 %v535_v5  ;;  %v543_v19 = vld [vmem:[%s817_s3 + $0x44] ss:$16 sps:$4 sm:$0xff]   ;;  %v545_v20 = vld [vmem:[%s817_s3 + $0x4c] ss:$16 sps:$4 sm:$0xff]   ;;  %v547_v21 = vld [vmem:[%s817_s3 + $0x40] ss:$16 sps:$4 sm:$0xff]  }
   0x5   :  { %298 = vmatprep.subr.bf16.mxu0 %v537_v7  ;;  %341 = vmatprep.subr.bf16.mxu1 %v539_v8  ;;  %v548_v22 = vld [vmem:[%s817_s3 + $0x48] ss:$16 sps:$4 sm:$0xff]   ;;  %v549_v23 = vld [vmem:[%s817_s3 + $0x64] ss:$16 sps:$4 sm:$0xff]   ;;  %v551_v24 = vld [vmem:[%s817_s3 + $0x6c] ss:$16 sps:$4 sm:$0xff]  }
   0x6   :  { %v553_v25 = vld [vmem:[%s817_s3 + $0x60] ss:$16 sps:$4 sm:$0xff]   ;;  %v554_v26 = vld [vmem:[%s817_s3 + $0x68] ss:$16 sps:$4 sm:$0xff]   ;;  %v555_v27 = vld [vmem:[%s817_s3 + $0x84] ss:$16 sps:$4 sm:$0xff]  }
   0x7   :  { %342 = vmatpush1.bf16.msra.mxu1 %v542_v18  ;;  %v557_v28 = vld [vmem:[%s817_s3 + $0x8c] ss:$16 sps:$4 sm:$0xff]   ;;  %v559_v29 = vld [vmem:[%s817_s3 + $0x80] ss:$16 sps:$4 sm:$0xff]   ;;  %v560_v30 = vld [vmem:[%s817_s3 + $0x88] ss:$16 sps:$4 sm:$0xff]  }
   0x8   :  { %29 = vadd.xlane.f32.xlu0 %v529_v2  ;;  %299 = vmatpush1.bf16.msra.mxu0 %v541_v17  ;;  %v561_v31 = vld [vmem:[%s817_s3 + $0xa4] ss:$16 sps:$4 sm:$0xff]   ;;  %v563_v32 = vld [vmem:[%s817_s3 + $0xac] ss:$16 sps:$4 sm:$0xff]   ;;  %v565_v33 = vld [vmem:[%s817_s3 + $0xa0] ss:$16 sps:$4 sm:$0xff]  }
   0x9   :  { %300 = vmatprep.subr.bf16.mxu0 %v543_v19  ;;  %343 = vmatprep.subr.bf16.mxu1 %v545_v20  ;;  %v566_v34 = vld [vmem:[%s817_s3 + $0xa8] ss:$16 sps:$4 sm:$0xff]   ;;  %v567_v35 = vld [vmem:[%s817_s3 + $0xc4] ss:$16 sps:$4 sm:$0xff]   ;;  %v569_v36 = vld [vmem:[%s817_s3 + $0xcc] ss:$16 sps:$4 sm:$0xff]  }
   0xa   :  { %v571_v38 = vld [vmem:[%s817_s3 + $0xc0] ss:$16 sps:$4 sm:$0xff]   ;;  %v572_v39 = vld [vmem:[%s817_s3 + $0xc8] ss:$16 sps:$4 sm:$0xff]   ;;  %v573_v40 = vld [vmem:[%s817_s3 + $0xe4] ss:$16 sps:$4 sm:$0xff]  }
   0xb   :  { %344 = vmatpush1.bf16.msra.mxu1 %v548_v22  ;;  %v575_v41 = vld [vmem:[%s817_s3 + $0xec] ss:$16 sps:$4 sm:$0xff]   ;;  %v577_v42 = vld [vmem:[%s817_s3 + $0xe0] ss:$16 sps:$4 sm:$0xff]   ;;  %v578_v43 = vld [vmem:[%s817_s3 + $0xe8] ss:$16 sps:$4 sm:$0xff]  }
   0xc   :  { %301 = vmatpush1.bf16.msra.mxu0 %v547_v21  ;;  %345 = vmatprep.subr.bf16.mxu1 %v551_v24  ;;  %v52_v51 = vshrl.u32 %v51_v48, 7  ;;  %v23_v52 = vld [vmem:[%s818_s1] sm:$0x1] }
   0xd   :  { %302 = vmatprep.subr.bf16.mxu0 %v549_v23  ;;  %v50_v53 = vunpack.c.l.bf16 %v23_v52  ;;  %v24_v55 = vld [vmem:[%s819_s2] sm:$0x1] }
   0xe   :  { %v53_v54 = vsub.s32 0, %v52_v51  ;;  %v57_v59 = vunpack.c.l.bf16 %v24_v55  ;;  %v97_v4 = vld [vmem:[%s820_s4] sm:$0xf]  ;;  %v110_v6 = vsub.s32 4, %v52_v51  ;;  %v106_v7 = vsub.s32 2, %v52_v51 }
   0xf   :  { %346 = vmatpush1.bf16.msra.mxu1 %v554_v26  ;;  %v98_v5 = vunpack.c.l.bf16 %v97_v4  ;;  %v114_v8 = vsub.s32 6, %v52_v51 }
  0x10   :  { %303 = vmatpush1.bf16.msra.mxu0 %v553_v25  ;;  %347 = vmatprep.subr.bf16.mxu1 %v557_v28  ;;  %v54_v58 = vrot.slane %v50_v53, %v53_v54  ;;  %v61_v63 = vrot.slane %v57_v59, %v53_v54 }
  0x11   :  { %304 = vmatprep.subr.bf16.mxu0 %v555_v27 }
  0x13   :  { %348 = vmatpush1.bf16.msra.mxu1 %v560_v30 }
  0x14   :  { %305 = vmatpush1.bf16.msra.mxu0 %v559_v29  ;;  %349 = vmatprep.subr.bf16.mxu1 %v563_v32 }
  0x15   :  { %306 = vmatprep.subr.bf16.mxu0 %v561_v31 }
  0x17   :  { %350 = vmatpush1.bf16.msra.mxu1 %v566_v34 }
  0x18   :  { %307 = vmatpush1.bf16.msra.mxu0 %v565_v33  ;;  %351 = vmatprep.subr.bf16.mxu1 %v569_v36 }
  0x19   :  { %308 = vmatprep.subr.bf16.mxu0 %v567_v35 }
  0x1b   :  { %352 = vmatpush1.bf16.msra.mxu1 %v572_v39 }
  0x1c   :  { %309 = vmatpush1.bf16.msra.mxu0 %v571_v38  ;;  %353 = vmatprep.subr.bf16.mxu1 %v575_v41 }
  0x1d   :  { %310 = vmatprep.subr.bf16.mxu0 %v573_v40 }
  0x1f   :  { %354 = vmatpush1.bf16.msra.mxu1 %v578_v43 }
  0x20   :  { %311 = vmatpush1.bf16.msra.mxu0 %v577_v42 }
  0x91   :  { %v28_v9 = vpop.xlane.xlu0 %27 }
  0x92   :  { %v32_v10 = vmul.f32 0.0078125, %v28_v9  ;;  %v103_v9 = vrot.slane %v98_v5, %v53_v54 }
  0x94   :  { %v651_v11 = vsub.f32 %v528_v1, %v32_v10  ;;  %v111_v10 = vrot.slane %v98_v5, %v110_v6 }
  0x95   :  { %v30_v12 = vpop.xlane.xlu0 %29 }
  0x96   :  { %v33_v13 = vmul.f32 0.0078125, %v30_v12  ;;  %v36_v14 = vmul.f32 %v651_v11, %v651_v11  ;;  %v115_v12 = vrot.slane %v98_v5, %v114_v8 }
  0x98   :  { %v655_v15 = vsub.f32 %v529_v2, %v33_v13  ;;  %38 = vadd.xlane.f32.xlu1 %v36_v14  ;;  %v123_v13 = vrot.slane %v103_v9, %v53_v54  ;;  %v131_v14 = vrot.slane %v111_v10, %v53_v54 }
  0x9a   :  { %v37_v16 = vmul.f32 %v655_v15, %v655_v15 }
  0x9c   :  { %40 = vadd.xlane.f32.xlu1 %v37_v16  ;;  %v135_v16 = vrot.slane %v115_v12, %v53_v54 }
 0x125   :  { %v39_v44 = vpop.xlane.xlu1 %38 }
 0x126   :  { %v42_v45 = vmul.f32 0.0078125, %v39_v44 }
 0x128   :  { %v44_v46 = vadd.f32 1e-05, %v42_v45 }
 0x129   :  { %v41_v47 = vpop.xlane.xlu1 %40 }
 0x12a   :  { %579 = vrsqrt.f32 %v44_v46  ;;  %v43_v49 = vmul.f32 0.0078125, %v41_v47 }
 0x12c   :  { %v45_v50 = vadd.f32 1e-05, %v43_v49 }
 0x12e   :  { %581 = vrsqrt.f32 %v45_v50 }
 0x134   :  { %v580_v56 = vpop.eup %579 }
 0x135   :  { %v48_v57 = vmul.f32 %v580_v56, %v651_v11  ;;  %v107_v11 = vrot.slane %v98_v5, %v106_v7 }
 0x137   :  { %v55_v62 = vmul.f32 %v54_v58, %v48_v57 }
 0x138   :  { %v582_v60 = vpop.eup %581 }
 0x139   :  { %v49_v61 = vmul.f32 %v582_v60, %v655_v15  ;;  %v62_v1 = vadd.f32 %v61_v63, %v55_v62  ;;  %v127_v15 = vrot.slane %v107_v11, %v53_v54 }
 0x13b   :  { %v56_v0 = vmul.f32 %v54_v58, %v49_v61 }
 0x13d   :  { %v63_v2 = vadd.f32 %v61_v63, %v56_v0 }
 0x13f   :  { %v64_v3 = vpack.c.bf16 %v63_v2, %v62_v1 }
 0x141   :  { %329 = vmatmul.mubr.bf16.vlgmr.msra.gmra.mrb[0].mxu0 %v64_v3  ;;  %372 = vmatmul.mubr.bf16.vlgmr.msra.gmra.mrb[0].mxu1 %v64_v3 }
 0x214   :  { %v330_v17 = vpop.f32.mrb[0].mxu0  ;;  %v373_v18 = vpop.f32.mrb[0].mxu1 }
 0x215   :  { %v748_v19 = vadd.f32 %v330_v17, %v123_v13  ;;  %v750_v20 = vadd.f32 %v373_v18, %v131_v14  ;;  %v332_v21 = vpop.f32.mrb[1].mxu0  ;;  %v375_v22 = vpop.f32.mrb[1].mxu1 }
 0x216   :  { %v752_v23 = vadd.f32 %v332_v21, %v127_v15  ;;  %v754_v24 = vadd.f32 %v375_v22, %v135_v16  ;;  %v334_v25 = vpop.f32.mrb[2].mxu0  ;;  %v377_v26 = vpop.f32.mrb[2].mxu1 }
 0x217   :  { %v390_v27 = vmul.f32 0.044715, %v748_v19  ;;  %v392_v28 = vmul.f32 0.044715, %v750_v20  ;;  %v762_v33 = vadd.f32 %v334_v25, %v123_v13  ;;  %v764_v34 = vadd.f32 %v377_v26, %v131_v14  ;;  %v336_v35 = vpop.f32.mrb[3].mxu0  ;;  %v379_v36 = vpop.f32.mrb[3].mxu1 }
 0x218   :  { %v391_v29 = vmul.f32 0.044715, %v752_v23  ;;  %v393_v30 = vmul.f32 0.044715, %v754_v24  ;;  %v768_v39 = vadd.f32 %v336_v35, %v127_v15  ;;  %v779_v49 = vadd.f32 %v379_v36, %v135_v16 }
 0x219   :  { %v398_v31 = vmul.f32 %v390_v27, %v748_v19  ;;  %v400_v32 = vmul.f32 %v392_v28, %v750_v20  ;;  %v394_v42 = vmul.f32 0.044715, %v762_v33  ;;  %v396_v45 = vmul.f32 0.044715, %v764_v34 }
 0x21a   :  { %v399_v37 = vmul.f32 %v391_v29, %v752_v23  ;;  %v401_v38 = vmul.f32 %v393_v30, %v754_v24  ;;  %v395_v53 = vmul.f32 0.044715, %v768_v39  ;;  %v397_v62 = vmul.f32 0.044715, %v779_v49 }
 0x21b   :  { %v406_v40 = vmul.f32 %v398_v31, %v748_v19  ;;  %v408_v41 = vmul.f32 %v400_v32, %v750_v20  ;;  %v402_v48 = vmul.f32 %v394_v42, %v762_v33  ;;  %v404_v52 = vmul.f32 %v396_v45, %v764_v34 }
 0x21c   :  { %v407_v43 = vmul.f32 %v399_v37, %v752_v23  ;;  %v409_v44 = vmul.f32 %v401_v38, %v754_v24  ;;  %v403_v60 = vmul.f32 %v395_v53, %v768_v39  ;;  %v405_v2 = vmul.f32 %v397_v62, %v779_v49 }
 0x21d   :  { %v414_v46 = vadd.f32 %v406_v40, %v748_v19  ;;  %v416_v47 = vadd.f32 %v408_v41, %v750_v20  ;;  %v410_v56 = vmul.f32 %v402_v48, %v762_v33  ;;  %v412_v59 = vmul.f32 %v404_v52, %v764_v34 }
 0x21e   :  { %v415_v50 = vadd.f32 %v407_v43, %v752_v23  ;;  %v417_v51 = vadd.f32 %v409_v44, %v754_v24  ;;  %v411_v0 = vmul.f32 %v403_v60, %v768_v39  ;;  %v413_v5 = vmul.f32 %v405_v2, %v779_v49 }
 0x21f   :  { %v422_v54 = vmul.f32 0.7978846, %v414_v46  ;;  %v424_v55 = vmul.f32 0.7978846, %v416_v47  ;;  %v418_v61 = vadd.f32 %v410_v56, %v762_v33  ;;  %v420_v63 = vadd.f32 %v412_v59, %v764_v34 }
 0x220   :  { %v423_v57 = vmul.f32 0.7978846, %v415_v50  ;;  %v425_v58 = vmul.f32 0.7978846, %v417_v51  ;;  %v419_v4 = vadd.f32 %v411_v0, %v768_v39  ;;  %v421_v7 = vadd.f32 %v413_v5, %v779_v49 }
 0x221   :  { %583 = vtanh.f32 %v422_v54  ;;  %v426_v1 = vmul.f32 0.7978846, %v418_v61  ;;  %v428_v3 = vmul.f32 0.7978846, %v420_v63  ;;  %v382_v11 = vmul.f32 0.5, %v748_v19 }
 0x222   :  { %585 = vtanh.f32 %v424_v55  ;;  %v427_v6 = vmul.f32 0.7978846, %v419_v4  ;;  %v429_v8 = vmul.f32 0.7978846, %v421_v7  ;;  %v384_v14 = vmul.f32 0.5, %v750_v20 }
 0x223   :  { %587 = vtanh.f32 %v423_v57  ;;  %v383_v18 = vmul.f32 0.5, %v752_v23  ;;  %v385_v26 = vmul.f32 0.5, %v754_v24  ;;  %v386_v19 = vmul.f32 0.5, %v762_v33 }
 0x224   :  { %589 = vtanh.f32 %v425_v58  ;;  %v387_v38 = vmul.f32 0.5, %v768_v39  ;;  %v388_v24 = vmul.f32 0.5, %v764_v34  ;;  %v389_v42 = vmul.f32 0.5, %v779_v49 }
 0x225   :  { %591 = vtanh.f32 %v426_v1 }
 0x226   :  { %593 = vtanh.f32 %v428_v3 }
 0x227   :  { %595 = vtanh.f32 %v427_v6 }
 0x228   :  { %597 = vtanh.f32 %v429_v8 }
 0x22b   :  { %v584_v9 = vpop.eup %583 }
 0x22c   :  { %v586_v10 = vpop.eup %585  ;;  %v438_v12 = vadd.f32 1.0, %v584_v9 }
 0x22d   :  { %v588_v13 = vpop.eup %587  ;;  %v440_v15 = vadd.f32 1.0, %v586_v10 }
 0x22e   :  { %v590_v16 = vpop.eup %589  ;;  %v446_v17 = vmul.f32 %v438_v12, %v382_v11  ;;  %v439_v21 = vadd.f32 1.0, %v588_v13 }
 0x22f   :  { %v592_v22 = vpop.eup %591  ;;  %v448_v25 = vmul.f32 %v440_v15, %v384_v14  ;;  %v441_v27 = vadd.f32 1.0, %v590_v16 }
 0x230   :  { %v594_v28 = vpop.eup %593  ;;  %v447_v29 = vmul.f32 %v439_v21, %v383_v18  ;;  %v442_v30 = vadd.f32 1.0, %v592_v22 }
 0x231   :  { %v449_v31 = vmul.f32 %v441_v27, %v385_v26  ;;  %v596_v32 = vpop.eup %595  ;;  %v444_v20 = vadd.f32 1.0, %v594_v28 }
 0x232   :  { %v522_v35 = vpack.c.bf16 %v447_v29, %v446_v17  ;;  %v450_v37 = vmul.f32 %v442_v30, %v386_v19  ;;  %v443_v23 = vadd.f32 1.0, %v596_v32  ;;  %v598_v40 = vpop.eup %597 }
 0x233   :  { %v523_v36 = vpack.c.bf16 %v449_v31, %v448_v25  ;;  %v452_v41 = vmul.f32 %v444_v20, %v388_v24  ;;  %v445_v43 = vadd.f32 1.0, %v598_v40 }
 0x234   :  { %478 = vst [vmem:[%s821_s5] sm:$0xff] %v522_v35  ;;  %v451_v33 = vmul.f32 %v443_v23, %v387_v38 }
 0x235   :  { %479 = vst [vmem:[%s821_s5 + $0x8] sm:$0xff] %v523_v36  ;;  %v453_v45 = vmul.f32 %v445_v43, %v389_v42 }
 0x236   :  { %v524_v44 = vpack.c.bf16 %v451_v33, %v450_v37 }
 0x237   :  { %v525_v39 = vpack.c.bf16 %v453_v45, %v452_v41 }
 0x238   :  { %480 = vst [vmem:[%s821_s5 + $0x10] sm:$0xff] %v524_v44 }
 0x239   :  { %481 = vst [vmem:[%s821_s5 + $0x18] sm:$0xff] %v525_v39 }

</bundles_post_ra>
